<compile_context>
chip_gen: v7x
topology: tpu7x:2x2x1
jax: 0.10.0
libtpu: 0.0.40
codegen_flags: <defaults>
</compile_context>

<pallas_src>
import functools
import math

import jax
import jax.numpy as jnp
from jax.experimental import pallas as pl
from jax.experimental.pallas import tpu as pltpu


# ----------------------------- config ---------------------------------------
VOCAB_SIZE = 128
BLOCK_SIZE = 16      # max positions
N_EMBD = 32
N_HEAD = 4
N_LAYER = 2
LN_EPS = 1e-5


# ------------------------- kernel helpers -----------------------------------
def _layernorm(x, w, b):
    # x: (N, C), w/b: (1, C)
    mu = jnp.mean(x, axis=-1, keepdims=True)
    var = jnp.mean((x - mu) ** 2, axis=-1, keepdims=True)
    return (x - mu) * jax.lax.rsqrt(var + LN_EPS) * w + b


# ------------------------- fused GPT kernel ----------------------------------
def _gpt_kernel(idx_ref, tokemb_ref, posemb_ref,
                ln1w_ref, ln1b_ref, ln2w_ref, ln2b_ref,
                qkvw_ref, qkvb_ref, projw_ref, projb_ref,
                w1_ref, b1_ref, w2_ref, b2_ref,
                lnfw_ref, lnfb_ref, wh_ref, bh_ref,
                o_ref,
                *, n_head, n_layer, batch, seq):
    tok = tokemb_ref[...]                                 # (V, C)
    V, C = tok.shape
    N = batch * seq
    hd = C // n_head
    nh3 = 3 * n_head
    nbh = batch * n_head
    scale = 1.0 / math.sqrt(hd)

    # ---------------- fused embeddings: one-hot matmul + positional add ------
    idx = idx_ref[...]                                                 # (N, 1) i32
    onehot = (idx == jax.lax.broadcasted_iota(jnp.int32, (N, V), 1)
              ).astype(jnp.float32)                                    # (N, V)
    x = jnp.dot(onehot, tok, preferred_element_type=jnp.float32)       # (N, C)
    x = (x.reshape(batch, seq, C) + posemb_ref[...][None]).reshape(N, C)

    # causal mask, shared across layers / batch / heads
    row = jax.lax.broadcasted_iota(jnp.int32, (seq, seq), 0)
    col = jax.lax.broadcasted_iota(jnp.int32, (seq, seq), 1)
    causal = (row >= col)[None]                                        # (1, T, T)
    neg = jnp.float32(-1e30)                  # finite mask value (no -inf NaNs)

    for li in range(n_layer):
        # ---------------- self-attention on ln1(x) ----------------
        h = _layernorm(x, ln1w_ref[li], ln1b_ref[li])                  # (N, C)
        wqkv = qkvw_ref[li]                                            # (3H, C, hd)
        bqkv = qkvb_ref[li]                                            # (3H, 1, hd)
        wproj = projw_ref[li]                                          # (H, hd, C)
        bproj = projb_ref[li]                                          # (1, C)

        # fused QKV: one 3-D batched matmul, (batch, 3*head) folded on the
        # leading (MXU batch) axis — no lane slicing, no per-batch Python loop.
        hb = jnp.broadcast_to(h.reshape(batch, 1, seq, C),
                              (batch, nh3, seq, C)).reshape(batch * nh3, seq, C)
        wf = jnp.broadcast_to(wqkv[None],
                              (batch, nh3, C, hd)).reshape(batch * nh3, C, hd)
        qkv = jnp.einsum("htc,hcd->htd", hb, wf,
                         preferred_element_type=jnp.float32)           # (B*3H, T, hd)
        qkv = qkv.reshape(batch, nh3, seq, hd) + bqkv                  # (B, 3H, T, hd)
        q = qkv[:, :n_head].reshape(nbh, seq, hd)                      # (B*H, T, hd)
        k = qkv[:, n_head:2 * n_head].reshape(nbh, seq, hd)
        v = qkv[:, 2 * n_head:].reshape(nbh, seq, hd)

        s = jnp.einsum("htd,hsd->hts", q, k,
                       preferred_element_type=jnp.float32) * scale     # (B*H, T, T)
        s = jnp.where(causal, s, neg)
        m = jnp.max(s, axis=-1, keepdims=True)
        e = jnp.exp(s - m)
        p = e * pl.reciprocal(jnp.sum(e, axis=-1, keepdims=True), approx=True)

        o = jnp.einsum("hts,hsd->htd", p, v,
                       preferred_element_type=jnp.float32)             # (B*H, T, hd)
        # per-head projection + sum over heads == concat(heads) @ Wp
        wpf = jnp.broadcast_to(wproj[None],
                               (batch, n_head, hd, C)).reshape(nbh, hd, C)
        op = jnp.einsum("htd,hdc->htc", o, wpf,
                        preferred_element_type=jnp.float32)            # (B*H, T, C)
        attn = op.reshape(batch, n_head, seq, C).sum(axis=1).reshape(N, C) + bproj
        x = x + attn

        # ---------------- feed-forward on ln2(x) ----------------
        h2 = _layernorm(x, ln2w_ref[li], ln2b_ref[li])
        f = jnp.dot(h2, w1_ref[li], preferred_element_type=jnp.float32) + b1_ref[li]
        f = jnp.maximum(f, 0.0)
        f = jnp.dot(f, w2_ref[li], preferred_element_type=jnp.float32) + b2_ref[li]
        x = x + f

    # ---------------- final LN + LM head (lane-dense output) ----------------
    hf = _layernorm(x, lnfw_ref[...], lnfb_ref[...])
    o_ref[...] = jnp.dot(hf, wh_ref[...],
                         preferred_element_type=jnp.float32) + bh_ref[...]


def _gpt_pallas(idx2, kp, *, batch, seq):
    """idx2: (B*T, 1) int32 token ids; kp: packed (layer-stacked) params."""
    N = batch * seq
    V = kp["wh"].shape[1]
    order = ["ln1_w", "ln1_b", "ln2_w", "ln2_b", "qkv_w", "qkv_b",
             "proj_w", "proj_b", "w1", "b1", "w2", "b2",
             "lnf_w", "lnf_b", "wh", "bh"]
    args = [idx2, kp["tok_emb"], kp["pos_emb"][:seq]] + [kp[n] for n in order]

    def full_spec(shape):
        nd = len(shape)
        return pl.BlockSpec(shape, lambda i, _nd=nd: (0,) * _nd)

    return pl.pallas_call(
        functools.partial(_gpt_kernel, n_head=N_HEAD, n_layer=N_LAYER,
                          batch=batch, seq=seq),
        out_shape=jax.ShapeDtypeStruct((N, V), jnp.float32),
        grid=(1,),
        in_specs=[full_spec(a.shape) for a in args],
        out_specs=pl.BlockSpec((N, V), lambda i: (0, 0)),
        compiler_params=pltpu.CompilerParams(
            dimension_semantics=("arbitrary",)),
    )(*args)


# ------------------------- parameter init / packing --------------------------
def init_params(key):
    C, V, H4 = N_EMBD, VOCAB_SIZE, 4 * N_EMBD
    keys = jax.random.split(key, 4 + N_LAYER)

    def norm(k, shape, scale=0.02):
        return (scale * jax.random.normal(k, shape)).astype(jnp.float32)

    params = {
        "tok_emb": norm(keys[0], (V, C)),
        "pos_emb": norm(keys[1], (BLOCK_SIZE, C)),
        "lnf_w": jnp.ones((1, C), jnp.float32),
        "lnf_b": jnp.zeros((1, C), jnp.float32),
        "wh": norm(keys[2], (C, V)),
        "bh": jnp.zeros((1, V), jnp.float32),
        "blocks": [],
    }
    for li in range(N_LAYER):
        bk = jax.random.split(keys[4 + li], 6)
        params["blocks"].append({
            "ln1_w": jnp.ones((1, C), jnp.float32),
            "ln1_b": jnp.zeros((1, C), jnp.float32),
            "wq": norm(bk[0], (C, C)), "bq": jnp.zeros((1, C), jnp.float32),
            "wk": norm(bk[1], (C, C)), "bk": jnp.zeros((1, C), jnp.float32),
            "wv": norm(bk[2], (C, C)), "bv": jnp.zeros((1, C), jnp.float32),
            "wp": norm(bk[3], (C, C)), "bp": jnp.zeros((1, C), jnp.float32),
            "ln2_w": jnp.ones((1, C), jnp.float32),
            "ln2_b": jnp.zeros((1, C), jnp.float32),
            "w1": norm(bk[4], (C, H4)), "b1": jnp.zeros((1, H4), jnp.float32),
            "w2": norm(bk[5], (H4, C)), "b2": jnp.zeros((1, C), jnp.float32),
        })
    return params


def pack_params(params):
    """Repack natural per-block params into layer-stacked, head-major arrays.

    Done ONCE outside the jitted forward (not re-executed per call).
    """
    C, H = N_EMBD, N_HEAD
    hd = C // H
    blocks = params["blocks"]

    def heads_out(w):        # (C, C) -> (H, C, hd); head split along output dim
        return w.reshape(C, H, hd).transpose(1, 0, 2)

    def heads_bias(b):       # (1, C) -> (H, 1, hd)
        return b.reshape(H, hd)[:, None, :]

    return {
        "tok_emb": params["tok_emb"],                             # (V, C)
        "pos_emb": params["pos_emb"],                             # (block, C)
        "ln1_w": jnp.stack([blk["ln1_w"] for blk in blocks]),     # (L, 1, C)
        "ln1_b": jnp.stack([blk["ln1_b"] for blk in blocks]),
        "ln2_w": jnp.stack([blk["ln2_w"] for blk in blocks]),
        "ln2_b": jnp.stack([blk["ln2_b"] for blk in blocks]),
        "qkv_w": jnp.stack([jnp.concatenate([heads_out(blk["wq"]),
                                             heads_out(blk["wk"]),
                                             heads_out(blk["wv"])], axis=0)
                            for blk in blocks]),                  # (L, 3H, C, hd)
        "qkv_b": jnp.stack([jnp.concatenate([heads_bias(blk["bq"]),
                                             heads_bias(blk["bk"]),
                                             heads_bias(blk["bv"])], axis=0)
                            for blk in blocks]),                  # (L, 3H, 1, hd)
        "proj_w": jnp.stack([blk["wp"].reshape(H, hd, C)
                             for blk in blocks]),                 # (L, H, hd, C)
        "proj_b": jnp.stack([blk["bp"] for blk in blocks]),       # (L, 1, C)
        "w1": jnp.stack([blk["w1"] for blk in blocks]),           # (L, C, 4C)
        "b1": jnp.stack([blk["b1"] for blk in blocks]),           # (L, 1, 4C)
        "w2": jnp.stack([blk["w2"] for blk in blocks]),           # (L, 4C, C)
        "b2": jnp.stack([blk["b2"] for blk in blocks]),           # (L, 1, C)
        "lnf_w": params["lnf_w"], "lnf_b": params["lnf_b"],
        "wh": params["wh"], "bh": params["bh"],
    }


# ------------------------- GPT forward (Pallas) ------------------------------
def gpt_forward(idx, kp):
    B, T = idx.shape
    idx2 = idx.reshape(B * T, 1).astype(jnp.int32)
    logits = _gpt_pallas(idx2, kp, batch=B, seq=T)
    return logits.reshape(B, T, VOCAB_SIZE)


# ------------------------- pure-JAX reference --------------------------------
def _ln_ref(x, w, b):
    mu = jnp.mean(x, axis=-1, keepdims=True)
    var = jnp.mean((x - mu) ** 2, axis=-1, keepdims=True)
    return (x - mu) / jnp.sqrt(var + LN_EPS) * w + b


def gpt_reference(idx, params):
    B, T = idx.shape
    C = N_EMBD
    hd = C // N_HEAD
    x = jnp.take(params["tok_emb"], idx, axis=0) + params["pos_emb"][:T][None, :, :]
    for p in params["blocks"]:
        h = _ln_ref(x, p["ln1_w"], p["ln1_b"])
        q = h @ p["wq"] + p["bq"]
        k = h @ p["wk"] + p["bk"]
        v = h @ p["wv"] + p["bv"]
        q = q.reshape(B, T, N_HEAD, hd).transpose(0, 2, 1, 3)
        k = k.reshape(B, T, N_HEAD, hd).transpose(0, 2, 1, 3)
        v = v.reshape(B, T, N_HEAD, hd).transpose(0, 2, 1, 3)
        att = jnp.einsum("bhtd,bhsd->bhts", q, k) / math.sqrt(hd)
        mask = jnp.tril(jnp.ones((T, T)))[None, None]
        att = jnp.where(mask == 0, -jnp.inf, att)
        att = jax.nn.softmax(att, axis=-1)
        out = jnp.einsum("bhts,bhsd->bhtd", att, v)
        out = out.transpose(0, 2, 1, 3).reshape(B, T, C)
        x = x + out @ p["wp"] + p["bp"]
        h2 = _ln_ref(x, p["ln2_w"], p["ln2_b"])
        f = jnp.maximum(h2 @ p["w1"] + p["b1"], 0.0) @ p["w2"] + p["b2"]
        x = x + f
    x = _ln_ref(x, params["lnf_w"], params["lnf_b"])
    return x @ params["wh"] + params["bh"]


# ------------------------------ main -----------------------------------------
if __name__ == "__main__":
    key = jax.random.PRNGKey(0)
    pkey, ikey = jax.random.split(key)
    params = init_params(pkey)
    kp = pack_params(params)          # pack once, outside the jitted forward

    B, T = 2, 8
    idx = jax.random.randint(ikey, (B, T), 0, VOCAB_SIZE, dtype=jnp.int32)

    fwd = jax.jit(gpt_forward)
    logits = jax.block_until_ready(fwd(idx, kp))

    ref = gpt_reference(idx, params)
    assert logits.shape == (B, T, VOCAB_SIZE)
    max_err = float(jnp.max(jnp.abs(logits - ref)))
    # Tolerance slightly relaxed because softmax uses the EUP approximate
    # reciprocal (pl.reciprocal(approx=True)); error is otherwise f32-exact.
    assert max_err < 2e-3, f"mismatch vs reference: max|diff|={max_err}"

    print("KERNEL_OK")
</pallas_src>

<mosaic_0001>
module attributes {stable_mosaic.version = 11 : i64} {
  func.func @_gpt_kernel(%arg0: i32, %arg1: memref<16x1xi32, #tpu.memory_space<vmem>>, %arg2: memref<128x32xf32, #tpu.memory_space<vmem>>, %arg3: memref<8x32xf32, #tpu.memory_space<vmem>>, %arg4: memref<2x1x32xf32, #tpu.memory_space<vmem>>, %arg5: memref<2x1x32xf32, #tpu.memory_space<vmem>>, %arg6: memref<2x1x32xf32, #tpu.memory_space<vmem>>, %arg7: memref<2x1x32xf32, #tpu.memory_space<vmem>>, %arg8: memref<2x12x32x8xf32, #tpu.memory_space<vmem>>, %arg9: memref<2x12x1x8xf32, #tpu.memory_space<vmem>>, %arg10: memref<2x4x8x32xf32, #tpu.memory_space<vmem>>, %arg11: memref<2x1x32xf32, #tpu.memory_space<vmem>>, %arg12: memref<2x32x128xf32, #tpu.memory_space<vmem>>, %arg13: memref<2x1x128xf32, #tpu.memory_space<vmem>>, %arg14: memref<2x128x32xf32, #tpu.memory_space<vmem>>, %arg15: memref<2x1x32xf32, #tpu.memory_space<vmem>>, %arg16: memref<1x32xf32, #tpu.memory_space<vmem>>, %arg17: memref<1x32xf32, #tpu.memory_space<vmem>>, %arg18: memref<32x128xf32, #tpu.memory_space<vmem>>, %arg19: memref<1x128xf32, #tpu.memory_space<vmem>>, %arg20: memref<16x128xf32, #tpu.memory_space<vmem>>) attributes {dimension_semantics = [#tpu.dimension_semantics<arbitrary>], iteration_bounds = array<i64: 1>, scalar_prefetch = 0 : i64, scratch_operands = 0 : i64, tpu.core_type = #tpu.core_type<tc>, window_params = [{pipeline_mode = #tpu.pipeline_mode<synchronous>, transform_indices = @transform_0, window_bounds = array<i64: 16, 1>}, {pipeline_mode = #tpu.pipeline_mode<synchronous>, transform_indices = @transform_1, window_bounds = array<i64: 128, 32>}, {pipeline_mode = #tpu.pipeline_mode<synchronous>, transform_indices = @transform_2, window_bounds = array<i64: 8, 32>}, {pipeline_mode = #tpu.pipeline_mode<synchronous>, transform_indices = @transform_3, window_bounds = array<i64: 2, 1, 32>}, {pipeline_mode = #tpu.pipeline_mode<synchronous>, transform_indices = @transform_4, window_bounds = array<i64: 2, 1, 32>}, {pipeline_mode = #tpu.pipeline_mode<synchronous>, transform_indices = @transform_5, window_bounds = array<i64: 2, 1, 32>}, {pipeline_mode = #tpu.pipeline_mode<synchronous>, transform_indices = @transform_6, window_bounds = array<i64: 2, 1, 32>}, {pipeline_mode = #tpu.pipeline_mode<synchronous>, transform_indices = @transform_7, window_bounds = array<i64: 2, 12, 32, 8>}, {pipeline_mode = #tpu.pipeline_mode<synchronous>, transform_indices = @transform_8, window_bounds = array<i64: 2, 12, 1, 8>}, {pipeline_mode = #tpu.pipeline_mode<synchronous>, transform_indices = @transform_9, window_bounds = array<i64: 2, 4, 8, 32>}, {pipeline_mode = #tpu.pipeline_mode<synchronous>, transform_indices = @transform_10, window_bounds = array<i64: 2, 1, 32>}, {pipeline_mode = #tpu.pipeline_mode<synchronous>, transform_indices = @transform_11, window_bounds = array<i64: 2, 32, 128>}, {pipeline_mode = #tpu.pipeline_mode<synchronous>, transform_indices = @transform_12, window_bounds = array<i64: 2, 1, 128>}, {pipeline_mode = #tpu.pipeline_mode<synchronous>, transform_indices = @transform_13, window_bounds = array<i64: 2, 128, 32>}, {pipeline_mode = #tpu.pipeline_mode<synchronous>, transform_indices = @transform_14, window_bounds = array<i64: 2, 1, 32>}, {pipeline_mode = #tpu.pipeline_mode<synchronous>, transform_indices = @transform_15, window_bounds = array<i64: 1, 32>}, {pipeline_mode = #tpu.pipeline_mode<synchronous>, transform_indices = @transform_16, window_bounds = array<i64: 1, 32>}, {pipeline_mode = #tpu.pipeline_mode<synchronous>, transform_indices = @transform_17, window_bounds = array<i64: 32, 128>}, {pipeline_mode = #tpu.pipeline_mode<synchronous>, transform_indices = @transform_18, window_bounds = array<i64: 1, 128>}, {pipeline_mode = #tpu.pipeline_mode<synchronous>, transform_indices = @transform_19, window_bounds = array<i64: 16, 128>}]} {
    %c0 = arith.constant 0 : index
    %c0_0 = arith.constant 0 : index
    %0 = vector.load %arg2[%c0, %c0_0] : memref<128x32xf32, #tpu.memory_space<vmem>>, vector<128x32xf32>
    %c0_1 = arith.constant 0 : index
    %c0_2 = arith.constant 0 : index
    %1 = vector.load %arg1[%c0_1, %c0_2] : memref<16x1xi32, #tpu.memory_space<vmem>>, vector<16x1xi32>
    %2 = tpu.iota {dimensions = array<i32: 1>} : vector<16x128xi32>
    %3 = vector.broadcast %1 : vector<16x1xi32> to vector<16x128xi32>
    %4 = arith.cmpi eq, %3, %2 : vector<16x128xi32>
    %5 = arith.extui %4 : vector<16x128xi1> to vector<16x128xi32>
    %6 = arith.sitofp %5 : vector<16x128xi32> to vector<16x128xf32>
    %cst = arith.constant dense<0.000000e+00> : vector<16x32xf32>
    %7 = tpu.matmul %6, %0, %cst {dimension_numbers = #tpu.dot_dimension_numbers<[1], [0], [0], [1], [0, 0, 1, 1], [], []>} : vector<16x128xf32>, vector<128x32xf32>, vector<16x32xf32> -> vector<16x32xf32>
    %8 = vector.shape_cast %7 : vector<16x32xf32> to vector<2x8x32xf32>
    %c0_3 = arith.constant 0 : index
    %c0_4 = arith.constant 0 : index
    %9 = vector.load %arg3[%c0_3, %c0_4] : memref<8x32xf32, #tpu.memory_space<vmem>>, vector<8x32xf32>
    %10 = vector.shape_cast %9 : vector<8x32xf32> to vector<1x8x32xf32>
    %11 = vector.broadcast %10 : vector<1x8x32xf32> to vector<2x8x32xf32>
    %12 = arith.addf %8, %11 : vector<2x8x32xf32>
    %13 = vector.shape_cast %12 : vector<2x8x32xf32> to vector<16x32xf32>
    %14 = tpu.iota {dimensions = array<i32: 0>} : vector<8x8xi32>
    %15 = tpu.iota {dimensions = array<i32: 1>} : vector<8x8xi32>
    %16 = arith.cmpi sge, %14, %15 : vector<8x8xi32>
    %17 = vector.shape_cast %16 : vector<8x8xi1> to vector<1x8x8xi1>
    %c0_5 = arith.constant 0 : index
    %c0_6 = arith.constant 0 : index
    %c0_7 = arith.constant 0 : index
    %18 = vector.load %arg4[%c0_5, %c0_6, %c0_7] : memref<2x1x32xf32, #tpu.memory_space<vmem>>, vector<1x1x32xf32>
    %19 = vector.shape_cast %18 : vector<1x1x32xf32> to vector<1x32xf32>
    %c0_8 = arith.constant 0 : index
    %c0_9 = arith.constant 0 : index
    %c0_10 = arith.constant 0 : index
    %20 = vector.load %arg5[%c0_8, %c0_9, %c0_10] : memref<2x1x32xf32, #tpu.memory_space<vmem>>, vector<1x1x32xf32>
    %21 = vector.shape_cast %20 : vector<1x1x32xf32> to vector<1x32xf32>
    %cst_11 = arith.constant dense<0.000000e+00> : vector<16xf32>
    %22 = vector.multi_reduction <add>, %13, %cst_11 [1] : vector<16x32xf32> to vector<16xf32>
    %23 = vector.shape_cast %22 : vector<16xf32> to vector<16x1xf32>
    %cst_12 = arith.constant 3.200000e+01 : f32
    %24 = vector.broadcast %cst_12 : f32 to vector<16x1xf32>
    %25 = arith.divf %23, %24 : vector<16x1xf32>
    %26 = vector.broadcast %25 : vector<16x1xf32> to vector<16x32xf32>
    %27 = arith.subf %13, %26 : vector<16x32xf32>
    %28 = arith.mulf %27, %27 : vector<16x32xf32>
    %cst_13 = arith.constant dense<0.000000e+00> : vector<16xf32>
    %29 = vector.multi_reduction <add>, %28, %cst_13 [1] : vector<16x32xf32> to vector<16xf32>
    %30 = vector.shape_cast %29 : vector<16xf32> to vector<16x1xf32>
    %cst_14 = arith.constant 3.200000e+01 : f32
    %31 = vector.broadcast %cst_14 : f32 to vector<16x1xf32>
    %32 = arith.divf %30, %31 : vector<16x1xf32>
    %33 = vector.broadcast %25 : vector<16x1xf32> to vector<16x32xf32>
    %34 = arith.subf %13, %33 : vector<16x32xf32>
    %cst_15 = arith.constant 9.99999974E-6 : f32
    %35 = vector.broadcast %cst_15 : f32 to vector<16x1xf32>
    %36 = arith.addf %32, %35 : vector<16x1xf32>
    %37 = math.rsqrt %36 : vector<16x1xf32>
    %38 = vector.broadcast %37 : vector<16x1xf32> to vector<16x32xf32>
    %39 = arith.mulf %34, %38 : vector<16x32xf32>
    %40 = vector.broadcast %19 : vector<1x32xf32> to vector<16x32xf32>
    %41 = arith.mulf %39, %40 : vector<16x32xf32>
    %42 = vector.broadcast %21 : vector<1x32xf32> to vector<16x32xf32>
    %43 = arith.addf %41, %42 : vector<16x32xf32>
    %c0_16 = arith.constant 0 : index
    %c0_17 = arith.constant 0 : index
    %c0_18 = arith.constant 0 : index
    %c0_19 = arith.constant 0 : index
    %44 = vector.load %arg8[%c0_16, %c0_17, %c0_18, %c0_19] : memref<2x12x32x8xf32, #tpu.memory_space<vmem>>, vector<1x12x32x8xf32>
    %45 = vector.shape_cast %44 : vector<1x12x32x8xf32> to vector<12x32x8xf32>
    %c0_20 = arith.constant 0 : index
    %c0_21 = arith.constant 0 : index
    %c0_22 = arith.constant 0 : index
    %c0_23 = arith.constant 0 : index
    %46 = vector.load %arg9[%c0_20, %c0_21, %c0_22, %c0_23] : memref<2x12x1x8xf32, #tpu.memory_space<vmem>>, vector<1x12x1x8xf32>
    %47 = vector.shape_cast %46 : vector<1x12x1x8xf32> to vector<12x1x8xf32>
    %c0_24 = arith.constant 0 : index
    %c0_25 = arith.constant 0 : index
    %c0_26 = arith.constant 0 : index
    %c0_27 = arith.constant 0 : index
    %48 = vector.load %arg10[%c0_24, %c0_25, %c0_26, %c0_27] : memref<2x4x8x32xf32, #tpu.memory_space<vmem>>, vector<1x4x8x32xf32>
    %49 = vector.shape_cast %48 : vector<1x4x8x32xf32> to vector<4x8x32xf32>
    %c0_28 = arith.constant 0 : index
    %c0_29 = arith.constant 0 : index
    %c0_30 = arith.constant 0 : index
    %50 = vector.load %arg11[%c0_28, %c0_29, %c0_30] : memref<2x1x32xf32, #tpu.memory_space<vmem>>, vector<1x1x32xf32>
    %51 = vector.shape_cast %50 : vector<1x1x32xf32> to vector<1x32xf32>
    %52 = vector.shape_cast %43 : vector<16x32xf32> to vector<2x1x8x32xf32>
    %53 = vector.shape_cast %52 : vector<2x1x8x32xf32> to vector<2x1x8x32xf32>
    %54 = vector.broadcast %53 : vector<2x1x8x32xf32> to vector<2x12x8x32xf32>
    %55 = vector.shape_cast %54 : vector<2x12x8x32xf32> to vector<24x8x32xf32>
    %56 = vector.shape_cast %45 : vector<12x32x8xf32> to vector<1x12x32x8xf32>
    %57 = vector.shape_cast %56 : vector<1x12x32x8xf32> to vector<1x12x32x8xf32>
    %58 = vector.broadcast %57 : vector<1x12x32x8xf32> to vector<2x12x32x8xf32>
    %59 = vector.shape_cast %58 : vector<2x12x32x8xf32> to vector<24x32x8xf32>
    "tpu.trace_start"() <{level = 10 : i32, message = "htc,hcd->htd"}> : () -> ()
    %cst_31 = arith.constant dense<0.000000e+00> : vector<24x8x8xf32>
    %60 = tpu.matmul %55, %59, %cst_31 {dimension_numbers = #tpu.dot_dimension_numbers<[2], [1], [1], [2], [0, 0, 0, 1, 1, 2], [0], [0]>} : vector<24x8x32xf32>, vector<24x32x8xf32>, vector<24x8x8xf32> -> vector<24x8x8xf32>
    "tpu.trace_stop"() : () -> ()
    %61 = vector.shape_cast %60 : vector<24x8x8xf32> to vector<2x12x8x8xf32>
    %62 = vector.shape_cast %47 : vector<12x1x8xf32> to vector<1x12x1x8xf32>
    %63 = vector.broadcast %62 : vector<1x12x1x8xf32> to vector<2x12x8x8xf32>
    %64 = arith.addf %61, %63 : vector<2x12x8x8xf32>
    %65 = vector.extract_strided_slice %64 {offsets = [0, 0, 0, 0], sizes = [2, 4, 8, 8], strides = [1, 1, 1, 1]} : vector<2x12x8x8xf32> to vector<2x4x8x8xf32>
    %66 = vector.shape_cast %65 : vector<2x4x8x8xf32> to vector<8x8x8xf32>
    %67 = vector.extract_strided_slice %64 {offsets = [0, 4, 0, 0], sizes = [2, 4, 8, 8], strides = [1, 1, 1, 1]} : vector<2x12x8x8xf32> to vector<2x4x8x8xf32>
    %68 = vector.shape_cast %67 : vector<2x4x8x8xf32> to vector<8x8x8xf32>
    %69 = vector.extract_strided_slice %64 {offsets = [0, 8, 0, 0], sizes = [2, 4, 8, 8], strides = [1, 1, 1, 1]} : vector<2x12x8x8xf32> to vector<2x4x8x8xf32>
    %70 = vector.shape_cast %69 : vector<2x4x8x8xf32> to vector<8x8x8xf32>
    "tpu.trace_start"() <{level = 10 : i32, message = "htd,hsd->hts"}> : () -> ()
    %cst_32 = arith.constant dense<0.000000e+00> : vector<8x8x8xf32>
    %71 = tpu.matmul %66, %68, %cst_32 {dimension_numbers = #tpu.dot_dimension_numbers<[2], [2], [1], [1], [0, 0, 0, 1, 1, 1], [0], [0]>} : vector<8x8x8xf32>, vector<8x8x8xf32>, vector<8x8x8xf32> -> vector<8x8x8xf32>
    "tpu.trace_stop"() : () -> ()
    %cst_33 = arith.constant 0.353553385 : f32
    %72 = vector.broadcast %cst_33 : f32 to vector<8x8x8xf32>
    %73 = arith.mulf %71, %72 : vector<8x8x8xf32>
    %cst_34 = arith.constant -1.000000e+30 : f32
    %74 = vector.shape_cast %17 : vector<1x8x8xi1> to vector<1x8x8xi1>
    %75 = vector.broadcast %74 : vector<1x8x8xi1> to vector<8x8x8xi1>
    %76 = vector.broadcast %cst_34 : f32 to vector<8x8x8xf32>
    %77 = arith.select %75, %73, %76 : vector<8x8x8xi1>, vector<8x8x8xf32>
    %cst_35 = arith.constant dense<0xFF800000> : vector<8x8xf32>
    %78 = vector.multi_reduction <maximumf>, %77, %cst_35 [2] : vector<8x8x8xf32> to vector<8x8xf32>
    %79 = vector.shape_cast %78 : vector<8x8xf32> to vector<8x8x1xf32>
    %80 = vector.broadcast %79 : vector<8x8x1xf32> to vector<8x8x8xf32>
    %81 = arith.subf %77, %80 : vector<8x8x8xf32>
    %82 = math.exp %81 : vector<8x8x8xf32>
    %cst_36 = arith.constant dense<0.000000e+00> : vector<8x8xf32>
    %83 = vector.multi_reduction <add>, %82, %cst_36 [2] : vector<8x8x8xf32> to vector<8x8xf32>
    %84 = vector.shape_cast %83 : vector<8x8xf32> to vector<8x8x1xf32>
    %85 = tpu.reciprocal %84 {approx = true} : vector<8x8x1xf32> -> vector<8x8x1xf32>
    %86 = vector.broadcast %85 : vector<8x8x1xf32> to vector<8x8x8xf32>
    %87 = arith.mulf %82, %86 : vector<8x8x8xf32>
    "tpu.trace_start"() <{level = 10 : i32, message = "hts,hsd->htd"}> : () -> ()
    %cst_37 = arith.constant dense<0.000000e+00> : vector<8x8x8xf32>
    %88 = tpu.matmul %87, %70, %cst_37 {dimension_numbers = #tpu.dot_dimension_numbers<[2], [1], [1], [2], [0, 0, 0, 1, 1, 2], [0], [0]>} : vector<8x8x8xf32>, vector<8x8x8xf32>, vector<8x8x8xf32> -> vector<8x8x8xf32>
    "tpu.trace_stop"() : () -> ()
    %89 = vector.shape_cast %49 : vector<4x8x32xf32> to vector<1x4x8x32xf32>
    %90 = vector.shape_cast %89 : vector<1x4x8x32xf32> to vector<1x4x8x32xf32>
    %91 = vector.broadcast %90 : vector<1x4x8x32xf32> to vector<2x4x8x32xf32>
    %92 = vector.shape_cast %91 : vector<2x4x8x32xf32> to vector<8x8x32xf32>
    "tpu.trace_start"() <{level = 10 : i32, message = "htd,hdc->htc"}> : () -> ()
    %cst_38 = arith.constant dense<0.000000e+00> : vector<8x8x32xf32>
    %93 = tpu.matmul %88, %92, %cst_38 {dimension_numbers = #tpu.dot_dimension_numbers<[2], [1], [1], [2], [0, 0, 0, 1, 1, 2], [0], [0]>} : vector<8x8x8xf32>, vector<8x8x32xf32>, vector<8x8x32xf32> -> vector<8x8x32xf32>
    "tpu.trace_stop"() : () -> ()
    %94 = vector.shape_cast %93 : vector<8x8x32xf32> to vector<2x4x8x32xf32>
    %cst_39 = arith.constant dense<0.000000e+00> : vector<2x8x32xf32>
    %95 = vector.multi_reduction <add>, %94, %cst_39 [1] : vector<2x4x8x32xf32> to vector<2x8x32xf32>
    %96 = vector.shape_cast %95 : vector<2x8x32xf32> to vector<16x32xf32>
    %97 = vector.broadcast %51 : vector<1x32xf32> to vector<16x32xf32>
    %98 = arith.addf %96, %97 : vector<16x32xf32>
    %99 = arith.addf %13, %98 : vector<16x32xf32>
    %c0_40 = arith.constant 0 : index
    %c0_41 = arith.constant 0 : index
    %c0_42 = arith.constant 0 : index
    %100 = vector.load %arg6[%c0_40, %c0_41, %c0_42] : memref<2x1x32xf32, #tpu.memory_space<vmem>>, vector<1x1x32xf32>
    %101 = vector.shape_cast %100 : vector<1x1x32xf32> to vector<1x32xf32>
    %c0_43 = arith.constant 0 : index
    %c0_44 = arith.constant 0 : index
    %c0_45 = arith.constant 0 : index
    %102 = vector.load %arg7[%c0_43, %c0_44, %c0_45] : memref<2x1x32xf32, #tpu.memory_space<vmem>>, vector<1x1x32xf32>
    %103 = vector.shape_cast %102 : vector<1x1x32xf32> to vector<1x32xf32>
    %cst_46 = arith.constant dense<0.000000e+00> : vector<16xf32>
    %104 = vector.multi_reduction <add>, %99, %cst_46 [1] : vector<16x32xf32> to vector<16xf32>
    %105 = vector.shape_cast %104 : vector<16xf32> to vector<16x1xf32>
    %cst_47 = arith.constant 3.200000e+01 : f32
    %106 = vector.broadcast %cst_47 : f32 to vector<16x1xf32>
    %107 = arith.divf %105, %106 : vector<16x1xf32>
    %108 = vector.broadcast %107 : vector<16x1xf32> to vector<16x32xf32>
    %109 = arith.subf %99, %108 : vector<16x32xf32>
    %110 = arith.mulf %109, %109 : vector<16x32xf32>
    %cst_48 = arith.constant dense<0.000000e+00> : vector<16xf32>
    %111 = vector.multi_reduction <add>, %110, %cst_48 [1] : vector<16x32xf32> to vector<16xf32>
    %112 = vector.shape_cast %111 : vector<16xf32> to vector<16x1xf32>
    %cst_49 = arith.constant 3.200000e+01 : f32
    %113 = vector.broadcast %cst_49 : f32 to vector<16x1xf32>
    %114 = arith.divf %112, %113 : vector<16x1xf32>
    %115 = vector.broadcast %107 : vector<16x1xf32> to vector<16x32xf32>
    %116 = arith.subf %99, %115 : vector<16x32xf32>
    %cst_50 = arith.constant 9.99999974E-6 : f32
    %117 = vector.broadcast %cst_50 : f32 to vector<16x1xf32>
    %118 = arith.addf %114, %117 : vector<16x1xf32>
    %119 = math.rsqrt %118 : vector<16x1xf32>
    %120 = vector.broadcast %119 : vector<16x1xf32> to vector<16x32xf32>
    %121 = arith.mulf %116, %120 : vector<16x32xf32>
    %122 = vector.broadcast %101 : vector<1x32xf32> to vector<16x32xf32>
    %123 = arith.mulf %121, %122 : vector<16x32xf32>
    %124 = vector.broadcast %103 : vector<1x32xf32> to vector<16x32xf32>
    %125 = arith.addf %123, %124 : vector<16x32xf32>
    %c0_51 = arith.constant 0 : index
    %c0_52 = arith.constant 0 : index
    %c0_53 = arith.constant 0 : index
    %126 = vector.load %arg12[%c0_51, %c0_52, %c0_53] : memref<2x32x128xf32, #tpu.memory_space<vmem>>, vector<1x32x128xf32>
    %127 = vector.shape_cast %126 : vector<1x32x128xf32> to vector<32x128xf32>
    %cst_54 = arith.constant dense<0.000000e+00> : vector<16x128xf32>
    %128 = tpu.matmul %125, %127, %cst_54 {dimension_numbers = #tpu.dot_dimension_numbers<[1], [0], [0], [1], [0, 0, 1, 1], [], []>} : vector<16x32xf32>, vector<32x128xf32>, vector<16x128xf32> -> vector<16x128xf32>
    %c0_55 = arith.constant 0 : index
    %c0_56 = arith.constant 0 : index
    %c0_57 = arith.constant 0 : index
    %129 = vector.load %arg13[%c0_55, %c0_56, %c0_57] : memref<2x1x128xf32, #tpu.memory_space<vmem>>, vector<1x1x128xf32>
    %130 = vector.shape_cast %129 : vector<1x1x128xf32> to vector<1x128xf32>
    %131 = vector.broadcast %130 : vector<1x128xf32> to vector<16x128xf32>
    %132 = arith.addf %128, %131 : vector<16x128xf32>
    %cst_58 = arith.constant 0.000000e+00 : f32
    %133 = vector.broadcast %cst_58 : f32 to vector<16x128xf32>
    %134 = arith.maximumf %132, %133 : vector<16x128xf32>
    %c0_59 = arith.constant 0 : index
    %c0_60 = arith.constant 0 : index
    %c0_61 = arith.constant 0 : index
    %135 = vector.load %arg14[%c0_59, %c0_60, %c0_61] : memref<2x128x32xf32, #tpu.memory_space<vmem>>, vector<1x128x32xf32>
    %136 = vector.shape_cast %135 : vector<1x128x32xf32> to vector<128x32xf32>
    %cst_62 = arith.constant dense<0.000000e+00> : vector<16x32xf32>
    %137 = tpu.matmul %134, %136, %cst_62 {dimension_numbers = #tpu.dot_dimension_numbers<[1], [0], [0], [1], [0, 0, 1, 1], [], []>} : vector<16x128xf32>, vector<128x32xf32>, vector<16x32xf32> -> vector<16x32xf32>
    %c0_63 = arith.constant 0 : index
    %c0_64 = arith.constant 0 : index
    %c0_65 = arith.constant 0 : index
    %138 = vector.load %arg15[%c0_63, %c0_64, %c0_65] : memref<2x1x32xf32, #tpu.memory_space<vmem>>, vector<1x1x32xf32>
    %139 = vector.shape_cast %138 : vector<1x1x32xf32> to vector<1x32xf32>
    %140 = vector.broadcast %139 : vector<1x32xf32> to vector<16x32xf32>
    %141 = arith.addf %137, %140 : vector<16x32xf32>
    %142 = arith.addf %99, %141 : vector<16x32xf32>
    %c1 = arith.constant 1 : index
    %c0_66 = arith.constant 0 : index
    %c0_67 = arith.constant 0 : index
    %143 = vector.load %arg4[%c1, %c0_66, %c0_67] : memref<2x1x32xf32, #tpu.memory_space<vmem>>, vector<1x1x32xf32>
    %144 = vector.shape_cast %143 : vector<1x1x32xf32> to vector<1x32xf32>
    %c1_68 = arith.constant 1 : index
    %c0_69 = arith.constant 0 : index
    %c0_70 = arith.constant 0 : index
    %145 = vector.load %arg5[%c1_68, %c0_69, %c0_70] : memref<2x1x32xf32, #tpu.memory_space<vmem>>, vector<1x1x32xf32>
    %146 = vector.shape_cast %145 : vector<1x1x32xf32> to vector<1x32xf32>
    %cst_71 = arith.constant dense<0.000000e+00> : vector<16xf32>
    %147 = vector.multi_reduction <add>, %142, %cst_71 [1] : vector<16x32xf32> to vector<16xf32>
    %148 = vector.shape_cast %147 : vector<16xf32> to vector<16x1xf32>
    %cst_72 = arith.constant 3.200000e+01 : f32
    %149 = vector.broadcast %cst_72 : f32 to vector<16x1xf32>
    %150 = arith.divf %148, %149 : vector<16x1xf32>
    %151 = vector.broadcast %150 : vector<16x1xf32> to vector<16x32xf32>
    %152 = arith.subf %142, %151 : vector<16x32xf32>
    %153 = arith.mulf %152, %152 : vector<16x32xf32>
    %cst_73 = arith.constant dense<0.000000e+00> : vector<16xf32>
    %154 = vector.multi_reduction <add>, %153, %cst_73 [1] : vector<16x32xf32> to vector<16xf32>
    %155 = vector.shape_cast %154 : vector<16xf32> to vector<16x1xf32>
    %cst_74 = arith.constant 3.200000e+01 : f32
    %156 = vector.broadcast %cst_74 : f32 to vector<16x1xf32>
    %157 = arith.divf %155, %156 : vector<16x1xf32>
    %158 = vector.broadcast %150 : vector<16x1xf32> to vector<16x32xf32>
    %159 = arith.subf %142, %158 : vector<16x32xf32>
    %cst_75 = arith.constant 9.99999974E-6 : f32
    %160 = vector.broadcast %cst_75 : f32 to vector<16x1xf32>
    %161 = arith.addf %157, %160 : vector<16x1xf32>
    %162 = math.rsqrt %161 : vector<16x1xf32>
    %163 = vector.broadcast %162 : vector<16x1xf32> to vector<16x32xf32>
    %164 = arith.mulf %159, %163 : vector<16x32xf32>
    %165 = vector.broadcast %144 : vector<1x32xf32> to vector<16x32xf32>
    %166 = arith.mulf %164, %165 : vector<16x32xf32>
    %167 = vector.broadcast %146 : vector<1x32xf32> to vector<16x32xf32>
    %168 = arith.addf %166, %167 : vector<16x32xf32>
    %c1_76 = arith.constant 1 : index
    %c0_77 = arith.constant 0 : index
    %c0_78 = arith.constant 0 : index
    %c0_79 = arith.constant 0 : index
    %169 = vector.load %arg8[%c1_76, %c0_77, %c0_78, %c0_79] : memref<2x12x32x8xf32, #tpu.memory_space<vmem>>, vector<1x12x32x8xf32>
    %170 = vector.shape_cast %169 : vector<1x12x32x8xf32> to vector<12x32x8xf32>
    %c1_80 = arith.constant 1 : index
    %c0_81 = arith.constant 0 : index
    %c0_82 = arith.constant 0 : index
    %c0_83 = arith.constant 0 : index
    %171 = vector.load %arg9[%c1_80, %c0_81, %c0_82, %c0_83] : memref<2x12x1x8xf32, #tpu.memory_space<vmem>>, vector<1x12x1x8xf32>
    %172 = vector.shape_cast %171 : vector<1x12x1x8xf32> to vector<12x1x8xf32>
    %c1_84 = arith.constant 1 : index
    %c0_85 = arith.constant 0 : index
    %c0_86 = arith.constant 0 : index
    %c0_87 = arith.constant 0 : index
    %173 = vector.load %arg10[%c1_84, %c0_85, %c0_86, %c0_87] : memref<2x4x8x32xf32, #tpu.memory_space<vmem>>, vector<1x4x8x32xf32>
    %174 = vector.shape_cast %173 : vector<1x4x8x32xf32> to vector<4x8x32xf32>
    %c1_88 = arith.constant 1 : index
    %c0_89 = arith.constant 0 : index
    %c0_90 = arith.constant 0 : index
    %175 = vector.load %arg11[%c1_88, %c0_89, %c0_90] : memref<2x1x32xf32, #tpu.memory_space<vmem>>, vector<1x1x32xf32>
    %176 = vector.shape_cast %175 : vector<1x1x32xf32> to vector<1x32xf32>
    %177 = vector.shape_cast %168 : vector<16x32xf32> to vector<2x1x8x32xf32>
    %178 = vector.shape_cast %177 : vector<2x1x8x32xf32> to vector<2x1x8x32xf32>
    %179 = vector.broadcast %178 : vector<2x1x8x32xf32> to vector<2x12x8x32xf32>
    %180 = vector.shape_cast %179 : vector<2x12x8x32xf32> to vector<24x8x32xf32>
    %181 = vector.shape_cast %170 : vector<12x32x8xf32> to vector<1x12x32x8xf32>
    %182 = vector.shape_cast %181 : vector<1x12x32x8xf32> to vector<1x12x32x8xf32>
    %183 = vector.broadcast %182 : vector<1x12x32x8xf32> to vector<2x12x32x8xf32>
    %184 = vector.shape_cast %183 : vector<2x12x32x8xf32> to vector<24x32x8xf32>
    "tpu.trace_start"() <{level = 10 : i32, message = "htc,hcd->htd"}> : () -> ()
    %cst_91 = arith.constant dense<0.000000e+00> : vector<24x8x8xf32>
    %185 = tpu.matmul %180, %184, %cst_91 {dimension_numbers = #tpu.dot_dimension_numbers<[2], [1], [1], [2], [0, 0, 0, 1, 1, 2], [0], [0]>} : vector<24x8x32xf32>, vector<24x32x8xf32>, vector<24x8x8xf32> -> vector<24x8x8xf32>
    "tpu.trace_stop"() : () -> ()
    %186 = vector.shape_cast %185 : vector<24x8x8xf32> to vector<2x12x8x8xf32>
    %187 = vector.shape_cast %172 : vector<12x1x8xf32> to vector<1x12x1x8xf32>
    %188 = vector.broadcast %187 : vector<1x12x1x8xf32> to vector<2x12x8x8xf32>
    %189 = arith.addf %186, %188 : vector<2x12x8x8xf32>
    %190 = vector.extract_strided_slice %189 {offsets = [0, 0, 0, 0], sizes = [2, 4, 8, 8], strides = [1, 1, 1, 1]} : vector<2x12x8x8xf32> to vector<2x4x8x8xf32>
    %191 = vector.shape_cast %190 : vector<2x4x8x8xf32> to vector<8x8x8xf32>
    %192 = vector.extract_strided_slice %189 {offsets = [0, 4, 0, 0], sizes = [2, 4, 8, 8], strides = [1, 1, 1, 1]} : vector<2x12x8x8xf32> to vector<2x4x8x8xf32>
    %193 = vector.shape_cast %192 : vector<2x4x8x8xf32> to vector<8x8x8xf32>
    %194 = vector.extract_strided_slice %189 {offsets = [0, 8, 0, 0], sizes = [2, 4, 8, 8], strides = [1, 1, 1, 1]} : vector<2x12x8x8xf32> to vector<2x4x8x8xf32>
    %195 = vector.shape_cast %194 : vector<2x4x8x8xf32> to vector<8x8x8xf32>
    "tpu.trace_start"() <{level = 10 : i32, message = "htd,hsd->hts"}> : () -> ()
    %cst_92 = arith.constant dense<0.000000e+00> : vector<8x8x8xf32>
    %196 = tpu.matmul %191, %193, %cst_92 {dimension_numbers = #tpu.dot_dimension_numbers<[2], [2], [1], [1], [0, 0, 0, 1, 1, 1], [0], [0]>} : vector<8x8x8xf32>, vector<8x8x8xf32>, vector<8x8x8xf32> -> vector<8x8x8xf32>
    "tpu.trace_stop"() : () -> ()
    %cst_93 = arith.constant 0.353553385 : f32
    %197 = vector.broadcast %cst_93 : f32 to vector<8x8x8xf32>
    %198 = arith.mulf %196, %197 : vector<8x8x8xf32>
    %cst_94 = arith.constant -1.000000e+30 : f32
    %199 = vector.shape_cast %17 : vector<1x8x8xi1> to vector<1x8x8xi1>
    %200 = vector.broadcast %199 : vector<1x8x8xi1> to vector<8x8x8xi1>
    %201 = vector.broadcast %cst_94 : f32 to vector<8x8x8xf32>
    %202 = arith.select %200, %198, %201 : vector<8x8x8xi1>, vector<8x8x8xf32>
    %cst_95 = arith.constant dense<0xFF800000> : vector<8x8xf32>
    %203 = vector.multi_reduction <maximumf>, %202, %cst_95 [2] : vector<8x8x8xf32> to vector<8x8xf32>
    %204 = vector.shape_cast %203 : vector<8x8xf32> to vector<8x8x1xf32>
    %205 = vector.broadcast %204 : vector<8x8x1xf32> to vector<8x8x8xf32>
    %206 = arith.subf %202, %205 : vector<8x8x8xf32>
    %207 = math.exp %206 : vector<8x8x8xf32>
    %cst_96 = arith.constant dense<0.000000e+00> : vector<8x8xf32>
    %208 = vector.multi_reduction <add>, %207, %cst_96 [2] : vector<8x8x8xf32> to vector<8x8xf32>
    %209 = vector.shape_cast %208 : vector<8x8xf32> to vector<8x8x1xf32>
    %210 = tpu.reciprocal %209 {approx = true} : vector<8x8x1xf32> -> vector<8x8x1xf32>
    %211 = vector.broadcast %210 : vector<8x8x1xf32> to vector<8x8x8xf32>
    %212 = arith.mulf %207, %211 : vector<8x8x8xf32>
    "tpu.trace_start"() <{level = 10 : i32, message = "hts,hsd->htd"}> : () -> ()
    %cst_97 = arith.constant dense<0.000000e+00> : vector<8x8x8xf32>
    %213 = tpu.matmul %212, %195, %cst_97 {dimension_numbers = #tpu.dot_dimension_numbers<[2], [1], [1], [2], [0, 0, 0, 1, 1, 2], [0], [0]>} : vector<8x8x8xf32>, vector<8x8x8xf32>, vector<8x8x8xf32> -> vector<8x8x8xf32>
    "tpu.trace_stop"() : () -> ()
    %214 = vector.shape_cast %174 : vector<4x8x32xf32> to vector<1x4x8x32xf32>
    %215 = vector.shape_cast %214 : vector<1x4x8x32xf32> to vector<1x4x8x32xf32>
    %216 = vector.broadcast %215 : vector<1x4x8x32xf32> to vector<2x4x8x32xf32>
    %217 = vector.shape_cast %216 : vector<2x4x8x32xf32> to vector<8x8x32xf32>
    "tpu.trace_start"() <{level = 10 : i32, message = "htd,hdc->htc"}> : () -> ()
    %cst_98 = arith.constant dense<0.000000e+00> : vector<8x8x32xf32>
    %218 = tpu.matmul %213, %217, %cst_98 {dimension_numbers = #tpu.dot_dimension_numbers<[2], [1], [1], [2], [0, 0, 0, 1, 1, 2], [0], [0]>} : vector<8x8x8xf32>, vector<8x8x32xf32>, vector<8x8x32xf32> -> vector<8x8x32xf32>
    "tpu.trace_stop"() : () -> ()
    %219 = vector.shape_cast %218 : vector<8x8x32xf32> to vector<2x4x8x32xf32>
    %cst_99 = arith.constant dense<0.000000e+00> : vector<2x8x32xf32>
    %220 = vector.multi_reduction <add>, %219, %cst_99 [1] : vector<2x4x8x32xf32> to vector<2x8x32xf32>
    %221 = vector.shape_cast %220 : vector<2x8x32xf32> to vector<16x32xf32>
    %222 = vector.broadcast %176 : vector<1x32xf32> to vector<16x32xf32>
    %223 = arith.addf %221, %222 : vector<16x32xf32>
    %224 = arith.addf %142, %223 : vector<16x32xf32>
    %c1_100 = arith.constant 1 : index
    %c0_101 = arith.constant 0 : index
    %c0_102 = arith.constant 0 : index
    %225 = vector.load %arg6[%c1_100, %c0_101, %c0_102] : memref<2x1x32xf32, #tpu.memory_space<vmem>>, vector<1x1x32xf32>
    %226 = vector.shape_cast %225 : vector<1x1x32xf32> to vector<1x32xf32>
    %c1_103 = arith.constant 1 : index
    %c0_104 = arith.constant 0 : index
    %c0_105 = arith.constant 0 : index
    %227 = vector.load %arg7[%c1_103, %c0_104, %c0_105] : memref<2x1x32xf32, #tpu.memory_space<vmem>>, vector<1x1x32xf32>
    %228 = vector.shape_cast %227 : vector<1x1x32xf32> to vector<1x32xf32>
    %cst_106 = arith.constant dense<0.000000e+00> : vector<16xf32>
    %229 = vector.multi_reduction <add>, %224, %cst_106 [1] : vector<16x32xf32> to vector<16xf32>
    %230 = vector.shape_cast %229 : vector<16xf32> to vector<16x1xf32>
    %cst_107 = arith.constant 3.200000e+01 : f32
    %231 = vector.broadcast %cst_107 : f32 to vector<16x1xf32>
    %232 = arith.divf %230, %231 : vector<16x1xf32>
    %233 = vector.broadcast %232 : vector<16x1xf32> to vector<16x32xf32>
    %234 = arith.subf %224, %233 : vector<16x32xf32>
    %235 = arith.mulf %234, %234 : vector<16x32xf32>
    %cst_108 = arith.constant dense<0.000000e+00> : vector<16xf32>
    %236 = vector.multi_reduction <add>, %235, %cst_108 [1] : vector<16x32xf32> to vector<16xf32>
    %237 = vector.shape_cast %236 : vector<16xf32> to vector<16x1xf32>
    %cst_109 = arith.constant 3.200000e+01 : f32
    %238 = vector.broadcast %cst_109 : f32 to vector<16x1xf32>
    %239 = arith.divf %237, %238 : vector<16x1xf32>
    %240 = vector.broadcast %232 : vector<16x1xf32> to vector<16x32xf32>
    %241 = arith.subf %224, %240 : vector<16x32xf32>
    %cst_110 = arith.constant 9.99999974E-6 : f32
    %242 = vector.broadcast %cst_110 : f32 to vector<16x1xf32>
    %243 = arith.addf %239, %242 : vector<16x1xf32>
    %244 = math.rsqrt %243 : vector<16x1xf32>
    %245 = vector.broadcast %244 : vector<16x1xf32> to vector<16x32xf32>
    %246 = arith.mulf %241, %245 : vector<16x32xf32>
    %247 = vector.broadcast %226 : vector<1x32xf32> to vector<16x32xf32>
    %248 = arith.mulf %246, %247 : vector<16x32xf32>
    %249 = vector.broadcast %228 : vector<1x32xf32> to vector<16x32xf32>
    %250 = arith.addf %248, %249 : vector<16x32xf32>
    %c1_111 = arith.constant 1 : index
    %c0_112 = arith.constant 0 : index
    %c0_113 = arith.constant 0 : index
    %251 = vector.load %arg12[%c1_111, %c0_112, %c0_113] : memref<2x32x128xf32, #tpu.memory_space<vmem>>, vector<1x32x128xf32>
    %252 = vector.shape_cast %251 : vector<1x32x128xf32> to vector<32x128xf32>
    %cst_114 = arith.constant dense<0.000000e+00> : vector<16x128xf32>
    %253 = tpu.matmul %250, %252, %cst_114 {dimension_numbers = #tpu.dot_dimension_numbers<[1], [0], [0], [1], [0, 0, 1, 1], [], []>} : vector<16x32xf32>, vector<32x128xf32>, vector<16x128xf32> -> vector<16x128xf32>
    %c1_115 = arith.constant 1 : index
    %c0_116 = arith.constant 0 : index
    %c0_117 = arith.constant 0 : index
    %254 = vector.load %arg13[%c1_115, %c0_116, %c0_117] : memref<2x1x128xf32, #tpu.memory_space<vmem>>, vector<1x1x128xf32>
    %255 = vector.shape_cast %254 : vector<1x1x128xf32> to vector<1x128xf32>
    %256 = vector.broadcast %255 : vector<1x128xf32> to vector<16x128xf32>
    %257 = arith.addf %253, %256 : vector<16x128xf32>
    %cst_118 = arith.constant 0.000000e+00 : f32
    %258 = vector.broadcast %cst_118 : f32 to vector<16x128xf32>
    %259 = arith.maximumf %257, %258 : vector<16x128xf32>
    %c1_119 = arith.constant 1 : index
    %c0_120 = arith.constant 0 : index
    %c0_121 = arith.constant 0 : index
    %260 = vector.load %arg14[%c1_119, %c0_120, %c0_121] : memref<2x128x32xf32, #tpu.memory_space<vmem>>, vector<1x128x32xf32>
    %261 = vector.shape_cast %260 : vector<1x128x32xf32> to vector<128x32xf32>
    %cst_122 = arith.constant dense<0.000000e+00> : vector<16x32xf32>
    %262 = tpu.matmul %259, %261, %cst_122 {dimension_numbers = #tpu.dot_dimension_numbers<[1], [0], [0], [1], [0, 0, 1, 1], [], []>} : vector<16x128xf32>, vector<128x32xf32>, vector<16x32xf32> -> vector<16x32xf32>
    %c1_123 = arith.constant 1 : index
    %c0_124 = arith.constant 0 : index
    %c0_125 = arith.constant 0 : index
    %263 = vector.load %arg15[%c1_123, %c0_124, %c0_125] : memref<2x1x32xf32, #tpu.memory_space<vmem>>, vector<1x1x32xf32>
    %264 = vector.shape_cast %263 : vector<1x1x32xf32> to vector<1x32xf32>
    %265 = vector.broadcast %264 : vector<1x32xf32> to vector<16x32xf32>
    %266 = arith.addf %262, %265 : vector<16x32xf32>
    %267 = arith.addf %224, %266 : vector<16x32xf32>
    %c0_126 = arith.constant 0 : index
    %c0_127 = arith.constant 0 : index
    %268 = vector.load %arg16[%c0_126, %c0_127] : memref<1x32xf32, #tpu.memory_space<vmem>>, vector<1x32xf32>
    %c0_128 = arith.constant 0 : index
    %c0_129 = arith.constant 0 : index
    %269 = vector.load %arg17[%c0_128, %c0_129] : memref<1x32xf32, #tpu.memory_space<vmem>>, vector<1x32xf32>
    %cst_130 = arith.constant dense<0.000000e+00> : vector<16xf32>
    %270 = vector.multi_reduction <add>, %267, %cst_130 [1] : vector<16x32xf32> to vector<16xf32>
    %271 = vector.shape_cast %270 : vector<16xf32> to vector<16x1xf32>
    %cst_131 = arith.constant 3.200000e+01 : f32
    %272 = vector.broadcast %cst_131 : f32 to vector<16x1xf32>
    %273 = arith.divf %271, %272 : vector<16x1xf32>
    %274 = vector.broadcast %273 : vector<16x1xf32> to vector<16x32xf32>
    %275 = arith.subf %267, %274 : vector<16x32xf32>
    %276 = arith.mulf %275, %275 : vector<16x32xf32>
    %cst_132 = arith.constant dense<0.000000e+00> : vector<16xf32>
    %277 = vector.multi_reduction <add>, %276, %cst_132 [1] : vector<16x32xf32> to vector<16xf32>
    %278 = vector.shape_cast %277 : vector<16xf32> to vector<16x1xf32>
    %cst_133 = arith.constant 3.200000e+01 : f32
    %279 = vector.broadcast %cst_133 : f32 to vector<16x1xf32>
    %280 = arith.divf %278, %279 : vector<16x1xf32>
    %281 = vector.broadcast %273 : vector<16x1xf32> to vector<16x32xf32>
    %282 = arith.subf %267, %281 : vector<16x32xf32>
    %cst_134 = arith.constant 9.99999974E-6 : f32
    %283 = vector.broadcast %cst_134 : f32 to vector<16x1xf32>
    %284 = arith.addf %280, %283 : vector<16x1xf32>
    %285 = math.rsqrt %284 : vector<16x1xf32>
    %286 = vector.broadcast %285 : vector<16x1xf32> to vector<16x32xf32>
    %287 = arith.mulf %282, %286 : vector<16x32xf32>
    %288 = vector.broadcast %268 : vector<1x32xf32> to vector<16x32xf32>
    %289 = arith.mulf %287, %288 : vector<16x32xf32>
    %290 = vector.broadcast %269 : vector<1x32xf32> to vector<16x32xf32>
    %291 = arith.addf %289, %290 : vector<16x32xf32>
    %c0_135 = arith.constant 0 : index
    %c0_136 = arith.constant 0 : index
    %292 = vector.load %arg18[%c0_135, %c0_136] : memref<32x128xf32, #tpu.memory_space<vmem>>, vector<32x128xf32>
    %cst_137 = arith.constant dense<0.000000e+00> : vector<16x128xf32>
    %293 = tpu.matmul %291, %292, %cst_137 {dimension_numbers = #tpu.dot_dimension_numbers<[1], [0], [0], [1], [0, 0, 1, 1], [], []>} : vector<16x32xf32>, vector<32x128xf32>, vector<16x128xf32> -> vector<16x128xf32>
    %c0_138 = arith.constant 0 : index
    %c0_139 = arith.constant 0 : index
    %294 = vector.load %arg19[%c0_138, %c0_139] : memref<1x128xf32, #tpu.memory_space<vmem>>, vector<1x128xf32>
    %295 = vector.broadcast %294 : vector<1x128xf32> to vector<16x128xf32>
    %296 = arith.addf %293, %295 : vector<16x128xf32>
    %c0_140 = arith.constant 0 : index
    %c0_141 = arith.constant 0 : index
    %297 = vector.load %arg20[%c0_140, %c0_141] : memref<16x128xf32, #tpu.memory_space<vmem>>, vector<16x128xf32>
    tpu.vector_store %arg20[%c0_140, %c0_141], %296 {strides = array<i32>} : memref<16x128xf32, #tpu.memory_space<vmem>>, vector<16x128xf32>,
    return
  }
  func.func @transform_0(%arg0: i32) -> (i32, i32) {
    %c0_i32 = arith.constant 0 : i32
    %c0_i32_0 = arith.constant 0 : i32
    %c0_i32_1 = arith.constant 0 : i32
    return %c0_i32, %c0_i32_0 : i32, i32
  }
  func.func @transform_1(%arg0: i32) -> (i32, i32) {
    %c0_i32 = arith.constant 0 : i32
    %c0_i32_0 = arith.constant 0 : i32
    %c0_i32_1 = arith.constant 0 : i32
    return %c0_i32, %c0_i32_0 : i32, i32
  }
  func.func @transform_2(%arg0: i32) -> (i32, i32) {
    %c0_i32 = arith.constant 0 : i32
    %c0_i32_0 = arith.constant 0 : i32
    %c0_i32_1 = arith.constant 0 : i32
    return %c0_i32, %c0_i32_0 : i32, i32
  }
  func.func @transform_3(%arg0: i32) -> (i32, i32, i32) {
    %c0_i32 = arith.constant 0 : i32
    %c0_i32_0 = arith.constant 0 : i32
    %c0_i32_1 = arith.constant 0 : i32
    %c0_i32_2 = arith.constant 0 : i32
    return %c0_i32, %c0_i32_0, %c0_i32_1 : i32, i32, i32
  }
  func.func @transform_4(%arg0: i32) -> (i32, i32, i32) {
    %c0_i32 = arith.constant 0 : i32
    %c0_i32_0 = arith.constant 0 : i32
    %c0_i32_1 = arith.constant 0 : i32
    %c0_i32_2 = arith.constant 0 : i32
    return %c0_i32, %c0_i32_0, %c0_i32_1 : i32, i32, i32
  }
  func.func @transform_5(%arg0: i32) -> (i32, i32, i32) {
    %c0_i32 = arith.constant 0 : i32
    %c0_i32_0 = arith.constant 0 : i32
    %c0_i32_1 = arith.constant 0 : i32
    %c0_i32_2 = arith.constant 0 : i32
    return %c0_i32, %c0_i32_0, %c0_i32_1 : i32, i32, i32
  }
  func.func @transform_6(%arg0: i32) -> (i32, i32, i32) {
    %c0_i32 = arith.constant 0 : i32
    %c0_i32_0 = arith.constant 0 : i32
    %c0_i32_1 = arith.constant 0 : i32
    %c0_i32_2 = arith.constant 0 : i32
    return %c0_i32, %c0_i32_0, %c0_i32_1 : i32, i32, i32
  }
  func.func @transform_7(%arg0: i32) -> (i32, i32, i32, i32) {
    %c0_i32 = arith.constant 0 : i32
    %c0_i32_0 = arith.constant 0 : i32
    %c0_i32_1 = arith.constant 0 : i32
    %c0_i32_2 = arith.constant 0 : i32
    %c0_i32_3 = arith.constant 0 : i32
    return %c0_i32, %c0_i32_0, %c0_i32_1, %c0_i32_2 : i32, i32, i32, i32
  }
  func.func @transform_8(%arg0: i32) -> (i32, i32, i32, i32) {
    %c0_i32 = arith.constant 0 : i32
    %c0_i32_0 = arith.constant 0 : i32
    %c0_i32_1 = arith.constant 0 : i32
    %c0_i32_2 = arith.constant 0 : i32
    %c0_i32_3 = arith.constant 0 : i32
    return %c0_i32, %c0_i32_0, %c0_i32_1, %c0_i32_2 : i32, i32, i32, i32
  }
  func.func @transform_9(%arg0: i32) -> (i32, i32, i32, i32) {
    %c0_i32 = arith.constant 0 : i32
    %c0_i32_0 = arith.constant 0 : i32
    %c0_i32_1 = arith.constant 0 : i32
    %c0_i32_2 = arith.constant 0 : i32
    %c0_i32_3 = arith.constant 0 : i32
    return %c0_i32, %c0_i32_0, %c0_i32_1, %c0_i32_2 : i32, i32, i32, i32
  }
  func.func @transform_10(%arg0: i32) -> (i32, i32, i32) {
    %c0_i32 = arith.constant 0 : i32
    %c0_i32_0 = arith.constant 0 : i32
    %c0_i32_1 = arith.constant 0 : i32
    %c0_i32_2 = arith.constant 0 : i32
    return %c0_i32, %c0_i32_0, %c0_i32_1 : i32, i32, i32
  }
  func.func @transform_11(%arg0: i32) -> (i32, i32, i32) {
    %c0_i32 = arith.constant 0 : i32
    %c0_i32_0 = arith.constant 0 : i32
    %c0_i32_1 = arith.constant 0 : i32
    %c0_i32_2 = arith.constant 0 : i32
    return %c0_i32, %c0_i32_0, %c0_i32_1 : i32, i32, i32
  }
  func.func @transform_12(%arg0: i32) -> (i32, i32, i32) {
    %c0_i32 = arith.constant 0 : i32
    %c0_i32_0 = arith.constant 0 : i32
    %c0_i32_1 = arith.constant 0 : i32
    %c0_i32_2 = arith.constant 0 : i32
    return %c0_i32, %c0_i32_0, %c0_i32_1 : i32, i32, i32
  }
  func.func @transform_13(%arg0: i32) -> (i32, i32, i32) {
    %c0_i32 = arith.constant 0 : i32
    %c0_i32_0 = arith.constant 0 : i32
    %c0_i32_1 = arith.constant 0 : i32
    %c0_i32_2 = arith.constant 0 : i32
    return %c0_i32, %c0_i32_0, %c0_i32_1 : i32, i32, i32
  }
  func.func @transform_14(%arg0: i32) -> (i32, i32, i32) {
    %c0_i32 = arith.constant 0 : i32
    %c0_i32_0 = arith.constant 0 : i32
    %c0_i32_1 = arith.constant 0 : i32
    %c0_i32_2 = arith.constant 0 : i32
    return %c0_i32, %c0_i32_0, %c0_i32_1 : i32, i32, i32
  }
  func.func @transform_15(%arg0: i32) -> (i32, i32) {
    %c0_i32 = arith.constant 0 : i32
    %c0_i32_0 = arith.constant 0 : i32
    %c0_i32_1 = arith.constant 0 : i32
    return %c0_i32, %c0_i32_0 : i32, i32
  }
  func.func @transform_16(%arg0: i32) -> (i32, i32) {
    %c0_i32 = arith.constant 0 : i32
    %c0_i32_0 = arith.constant 0 : i32
    %c0_i32_1 = arith.constant 0 : i32
    return %c0_i32, %c0_i32_0 : i32, i32
  }
  func.func @transform_17(%arg0: i32) -> (i32, i32) {
    %c0_i32 = arith.constant 0 : i32
    %c0_i32_0 = arith.constant 0 : i32
    %c0_i32_1 = arith.constant 0 : i32
    return %c0_i32, %c0_i32_0 : i32, i32
  }
  func.func @transform_18(%arg0: i32) -> (i32, i32) {
    %c0_i32 = arith.constant 0 : i32
    %c0_i32_0 = arith.constant 0 : i32
    %c0_i32_1 = arith.constant 0 : i32
    return %c0_i32, %c0_i32_0 : i32, i32
  }
  func.func @transform_19(%arg0: i32) -> (i32, i32) {
    %c0_i32 = arith.constant 0 : i32
    %c0_i32_0 = arith.constant 0 : i32
    %c0_i32_1 = arith.constant 0 : i32
    return %c0_i32, %c0_i32_0 : i32, i32
  }
}

</mosaic_0001>

<bundles_post_ra>
// kernel: gpt_forward.1
= control target key start
LH: loop header
LB: loop body
LE: loop exit
PB: predicated region body
PF: predicated region fallthrough
CT: control target
= control target key end

     0   :  { %s12191_s0 = inlined_call_operand.vmem [shape: s32[16,1], index: 0, kind: input, shape index: {}]   ;;  %s12192_s1 = inlined_call_operand.vmem [shape: f32[128,32], index: 1, kind: input, shape index: {}]   ;;  %s12193_s2 = inlined_call_operand.vmem [shape: f32[8,32], index: 2, kind: input, shape index: {}]   ;;  %s12194_s3 = inlined_call_operand.vmem [shape: f32[2,1,32], index: 3, kind: input, shape index: {}]   ;;  %s12195_s4 = inlined_call_operand.vmem [shape: f32[2,1,32], index: 4, kind: input, shape index: {}]   ;;  %s12196_s5 = inlined_call_operand.vmem [shape: f32[2,1,32], index: 5, kind: input, shape index: {}]   ;;  %s12197_s6 = inlined_call_operand.vmem [shape: f32[2,1,32], index: 6, kind: input, shape index: {}]   ;;  %s12198_s7 = inlined_call_operand.vmem [shape: f32[2,12,32,8], index: 7, kind: input, shape index: {}]   ;;  %s12199_s8 = inlined_call_operand.vmem [shape: f32[2,12,1,8], index: 8, kind: input, shape index: {}]   ;;  %s12200_s9 = inlined_call_operand.vmem [shape: f32[2,4,8,32], index: 9, kind: input, shape index: {}]   ;;  %s12201_s10 = inlined_call_operand.vmem [shape: f32[2,1,32], index: 10, kind: input, shape index: {}]   ;;  %s12202_s11 = inlined_call_operand.vmem [shape: f32[2,32,128], index: 11, kind: input, shape index: {}]   ;;  %s12203_s12 = inlined_call_operand.vmem [shape: f32[2,1,128], index: 12, kind: input, shape index: {}]   ;;  %s12204_s13 = inlined_call_operand.vmem [shape: f32[2,128,32], index: 13, kind: input, shape index: {}]   ;;  %s12205_s14 = inlined_call_operand.vmem [shape: f32[2,1,32], index: 14, kind: input, shape index: {}]   ;;  %s12206_s15 = inlined_call_operand.vmem [shape: f32[1,32], index: 15, kind: input, shape index: {}]   ;;  %s12207_s16 = inlined_call_operand.vmem [shape: f32[1,32], index: 16, kind: input, shape index: {}]   ;;  %s12208_s17 = inlined_call_operand.vmem [shape: f32[32,128], index: 17, kind: input, shape index: {}]   ;;  %s12209_s18 = inlined_call_operand.vmem [shape: f32[1,128], index: 18, kind: input, shape index: {}]   ;;  %s12210_s19 = inlined_call_operand.hbm [shape: f32[16,128], index: 19, kind: output, shape index: {}]  }
   0x1   :  { %12215 = sst [smem:[#allocation5_spill]] %s12191_s0 }
   0x2   :  { %12216 = sst [smem:[#allocation6_spill]] %s12192_s1 }
   0x3   :  { %12217 = sst [smem:[#allocation7_spill]] %s12193_s2 }
   0x4   :  { %12218 = sst [smem:[#allocation8_spill]] %s12194_s3 }
   0x5   :  { %12219 = sst [smem:[#allocation9_spill]] %s12205_s14 }
   0x6   :  { %s12220_s20 = sld [smem:[#allocation5_spill]]  ;;  %s12221_s14 = sld [smem:[#allocation6_spill]]  ;;  %v10506_v2 = vmov 0  }
   0x7   :  { %10397 = vset.pattern.permute.xlu0 %v10506_v2 }
   0xc   :  { %v79_v0 = vld [vmem:[%s12220_s20] sm:$0xff]  ;;  %v64_v3 = vld [vmem:[%s12221_s14 + $0x8] sm:$0xff]  ;;  %v65_v4 = vld [vmem:[%s12221_s14 + $0x10] sm:$0xff] }
   0xd   :  { %v63_v1 = vld [vmem:[%s12221_s14] sm:$0xff]  ;;  %v66_v5 = vld [vmem:[%s12221_s14 + $0x18] sm:$0xff]  ;;  %84 = vperm.xlu0 %10397, %v79_v0   ;;  %v80_v8 = vld [vmem:[%s12220_s20 + $0x8] sm:$0xff] }
   0xe   :  { %v9981_v6 = vpack.c.bf16 %v64_v3, %v63_v1  ;;  %v9985_v7 = vpack.c.bf16 %v66_v5, %v65_v4  ;;  %v67_v9 = vld [vmem:[%s12221_s14 + $0x20] sm:$0xff]  ;;  %v68_v10 = vld [vmem:[%s12221_s14 + $0x28] sm:$0xff] }
   0xf   :  { %v9989_v11 = vpack.c.bf16 %v68_v10, %v67_v9 }
  0x10   :  { %9982 = vmatprep.subr.bf16.mxu0 %v9981_v6 }
  0x11   :  { %9984 = vmatpush3.bf16.msra.mxu0 %v9981_v6  ;;  %87 = vperm.xlu0 %10397, %v80_v8  }
  0x12   :  { %9986 = vmatprep.subr.bf16.mxu0 %v9985_v7 }
  0x13   :  { %24 = vsyncpa [#allocation3], 0  ;;  %v69_v12 = vld [vmem:[%s12221_s14 + $0x30] sm:$0xff]  ;;  %v70_v13 = vld [vmem:[%s12221_s14 + $0x38] sm:$0xff]  ;;  %v81_v27 = vlaneseq  ;;  %v10507_v30 = vmov 1.0   ;;  %s12222_s24 = sld [smem:[#allocation7_spill]] }
  0x14   :  { %v9993_v14 = vpack.c.bf16 %v70_v13, %v69_v12  ;;  %v71_v15 = vld [vmem:[%s12221_s14 + $0x40] sm:$0xff]  ;;  %v72_v16 = vld [vmem:[%s12221_s14 + $0x48] sm:$0xff]  ;;  %v73_v18 = vld [vmem:[%s12221_s14 + $0x50] sm:$0xff]  ;;  %vm178_vm2 = vcmask 261120   ;;  %v10508_v54 = vmov 0.0|0.0   ;;  %vm10509_vm3 = vmmov 0  }
  0x15   :  { %9988 = vmatpush3.bf16.msra.mxu0 %v9985_v7  ;;  %v9997_v17 = vpack.c.bf16 %v72_v16, %v71_v15  ;;  %v74_v19 = vld [vmem:[%s12221_s14 + $0x58] sm:$0xff]  ;;  %v75_v21 = vld [vmem:[%s12221_s14 + $0x60] sm:$0xff]  ;;  %v76_v22 = vld [vmem:[%s12221_s14 + $0x68] sm:$0xff]  ;;  %v10669_v28 = vand.u32 127, %v81_v27  ;;  %10019 = vmatprep.subr.bf16.mxu1 %v10508_v54  ;;  %v10510_v62 = vmov 0.0   ;;  %s12223_s26 = sld [smem:[#allocation8_spill]] }
  0x16   :  { %9990 = vmatprep.subr.bf16.mxu0 %v9989_v11  ;;  %v10001_v20 = vpack.c.bf16 %v74_v19, %v73_v18  ;;  %v10005_v23 = vpack.c.bf16 %v76_v22, %v75_v21  ;;  %v77_v24 = vld [vmem:[%s12221_s14 + $0x70] sm:$0xff]  ;;  %v78_v25 = vld [vmem:[%s12221_s14 + $0x78] sm:$0xff]  ;;  %v222_v49 = vld [vmem:[%s12198_s7] sm:$0xff]  ;;  %9129 = vmatprep.mubr.msk.f32.mxu1 %vm10509_vm3, %v10510_v62  ;;  %vm2069_vm4 = vcmask 64512   ;;  %s12226_s3 = sld [smem:[#allocation9_spill]] }
  0x17   :  { %v10009_v26 = vpack.c.bf16 %v78_v25, %v77_v24  ;;  %v223_v50 = vld [vmem:[%s12198_s7 + $0x8] sm:$0xff]  ;;  %v226_v51 = vld [vmem:[%s12198_s7 + $0x20] sm:$0xff]  ;;  %v224_v56 = vld [vmem:[%s12198_s7 + $0x10] sm:$0xff] }
  0x18   :  { %v10701_v52 = vpack.c.bf16 %v223_v50, %v222_v49  ;;  %v227_v53 = vld [vmem:[%s12198_s7 + $0x28] sm:$0xff]  ;;  %v225_v57 = vld [vmem:[%s12198_s7 + $0x18] sm:$0xff]  ;;  %v228_v58 = vld [vmem:[%s12198_s7 + $0x30] sm:$0xff] }
  0x19   :  { %9992 = vmatpush3.bf16.msra.mxu0 %v9989_v11  ;;  %v170_v32 = vld [vmem:[%s12222_s24] sm:$0xff]  ;;  %v10708_v55 = vpack.c.bf16 %v227_v53, %v226_v51  ;;  %v10723_v59 = vpack.c.bf16 %v225_v57, %v224_v56  ;;  %v229_v60 = vld [vmem:[%s12198_s7 + $0x38] sm:$0xff]  ;;  %v231_v6 = vld [vmem:[%s12198_s7 + $0x48] sm:$0xff] }
  0x1a   :  { %9994 = vmatprep.subr.bf16.mxu0 %v9993_v14  ;;  %v10728_v61 = vpack.c.bf16 %v229_v60, %v228_v58  ;;  %v230_v4 = vld [vmem:[%s12198_s7 + $0x40] sm:$0xff]  ;;  %v239_v8 = vld [vmem:[%s12198_s7 + $0x88] sm:$0xff]  ;;  %v232_v13 = vld [vmem:[%s12198_s7 + $0x50] sm:$0xff] }
  0x1b   :  { %10021 = vmatpush3.bf16.msra.mxu1 %v10708_v55  ;;  %v10741_v3 = vld [vmem:[%s12223_s26] ss:$0 sm:$0xff]  ;;  %v10761_v11 = vpack.c.bf16 %v231_v6, %v230_v4  ;;  %v233_v15 = vld [vmem:[%s12198_s7 + $0x58] sm:$0xff]  ;;  %v240_v16 = vld [vmem:[%s12198_s7 + $0x90] sm:$0xff] }
  0x1c   :  { %10022 = vmatprep.subr.bf16.mxu1 %v10508_v54  ;;  %v238_v7 = vld [vmem:[%s12198_s7 + $0x80] sm:$0xff]  ;;  %v10786_v18 = vpack.c.bf16 %v233_v15, %v232_v13  ;;  %v235_v21 = vld [vmem:[%s12198_s7 + $0x68] sm:$0xff]  ;;  %v257_v49 = vld [vmem:[%s12198_s7 + $0x118] sm:$0xff] }
  0x1d   :  { %9996 = vmatpush3.bf16.msra.mxu0 %v9993_v14  ;;  %v10758_v9 = vld [vmem:[%s12195_s4] ss:$0 sm:$0xff]  ;;  %v10763_v12 = vpack.c.bf16 %v239_v8, %v238_v7  ;;  %v251_v56 = vld [vmem:[%s12198_s7 + $0xe8] sm:$0xff]  ;;  %v265_v4 = vld [vmem:[%s12198_s7 + $0x158] sm:$0xff] }
  0x1e   :  { %9998 = vmatprep.subr.bf16.mxu0 %v9997_v17  ;;  %v246_v22 = vld [vmem:[%s12198_s7 + $0xc0] sm:$0xff]  ;;  %v263_v58 = vld [vmem:[%s12198_s7 + $0x148] sm:$0xff] }
  0x1f   :  { %10024 = vmatpush3.bf16.msra.mxu1 %v10728_v61  ;;  %v250_v53 = vld [vmem:[%s12198_s7 + $0xe0] sm:$0xff]  ;;  %v259_v8 = vld [vmem:[%s12198_s7 + $0x128] sm:$0xff] }
  0x20   :  { %10025 = vmatprep.subr.bf16.mxu1 %v10508_v54  ;;  %v262_v57 = vld [vmem:[%s12198_s7 + $0x140] sm:$0xff]  ;;  %v10906_v60 = vpack.c.bf16 %v251_v56, %v250_v53 }
  0x21   :  { %10000 = vmatpush3.bf16.msra.mxu0 %v9997_v17  ;;  %v241_v17 = vld [vmem:[%s12198_s7 + $0x98] sm:$0xff]  ;;  %v258_v7 = vld [vmem:[%s12198_s7 + $0x120] sm:$0xff] }
  0x22   :  { %10002 = vmatprep.subr.bf16.mxu0 %v10001_v20  ;;  %v10788_v19 = vpack.c.bf16 %v241_v17, %v240_v16  ;;  %v10948_v13 = vpack.c.bf16 %v259_v8, %v258_v7  ;;  %v260_v16 = vld [vmem:[%s12198_s7 + $0x130] sm:$0xff]  ;;  %v261_v17 = vld [vmem:[%s12198_s7 + $0x138] sm:$0xff]  ;;  %v8446_v56 = vld [vmem:[%s12199_s8 + $0x3] ss:$0 sm:$0xff] }
  0x25   :  { %10004 = vmatpush3.bf16.msra.mxu0 %v10001_v20  ;;  %v234_v20 = vld [vmem:[%s12198_s7 + $0x60] sm:$0xff] }
  0x26   :  { %10006 = vmatprep.subr.bf16.mxu0 %v10005_v23  ;;  %v10810_v24 = vpack.c.bf16 %v235_v21, %v234_v20  ;;  %v266_v21 = vld [vmem:[%s12198_s7 + $0x160] sm:$0xff] }
  0x29   :  { %10008 = vmatpush3.bf16.msra.mxu0 %v10005_v23  ;;  %v247_v23 = vld [vmem:[%s12198_s7 + $0xc8] sm:$0xff] }
  0x2a   :  { %10010 = vmatprep.subr.bf16.mxu0 %v10009_v26  ;;  %v10812_v25 = vpack.c.bf16 %v247_v23, %v246_v22  ;;  %v267_v22 = vld [vmem:[%s12198_s7 + $0x168] sm:$0xff]  ;;  %v268_v23 = vld [vmem:[%s12198_s7 + $0x170] sm:$0xff] }
  0x2d   :  { %10012 = vmatpush3.bf16.msra.mxu0 %v10009_v26  ;;  %v236_v26 = vld [vmem:[%s12198_s7 + $0x70] sm:$0xff] }
  0x2e   :  { %10013 = vmatprep.subr.bf16.mxu0 %v10508_v54 }
  0x8c   :  { %v85_v29 = vpop.permute.xlu0 %84 }
  0x8d   :  { %vm89_vm0 = vcmp.eq.s32.totalorder %v85_v29, %v10669_v28 }
  0x8e   :  { %9107 = vmatprep.mubr.msk.f32.mxu0 %vm89_vm0, %v10507_v30 }
  0x90   :  { %v88_v31 = vpop.permute.xlu0 %87 }
  0x91   :  { %vm90_vm1 = vcmp.eq.s32.totalorder %v88_v31, %v10669_v28  ;;  %v248_v31 = vld [vmem:[%s12198_s7 + $0xd0] sm:$0xff] }
  0x92   :  { %9108 = vmatmul.mubr.msk.f32.vlgmr.msra.gmra.mrb[0].mxu0 %vm90_vm1, %v10507_v30  ;;  %v237_v30 = vld [vmem:[%s12198_s7 + $0x78] sm:$0xff] }
  0x93   :  { %10015 = vmatpush3.bf16.msra.mxu0 %v10701_v52  ;;  %9118 = vmatprep.mubr.msk.f32.mxu0 %vm10509_vm3, %v10510_v62 }
  0x94   :  { %10016 = vmatprep.subr.bf16.mxu0 %v10508_v54 }
  0x97   :  { %10018 = vmatpush3.bf16.msra.mxu0 %v10723_v59 }
  0x98   :  { %10037 = vmatprep.subr.bf16.mxu0 %v10508_v54 }
 0x165   :  { %v9109_v33 = vpop.f32.mrb[0].mxu0 }
 0x166   :  { %v161_v34 = vpop.f32.mrb[1].mxu0  ;;  %v10678_v36 = vadd.f32 %v9109_v33, %v170_v32 }
 0x167   :  { %v10676_v35 = vadd.f32 %v170_v32, %v161_v34  ;;  %v249_v32 = vld [vmem:[%s12198_s7 + $0xd8] sm:$0xff]  ;;  %v10834_v34 = vpack.c.bf16 %v237_v30, %v236_v26 }
 0x168   :  { %v182_v38 = vsel %vm178_vm2, %v10678_v36, 0.0  ;;  %v269_v26 = vld [vmem:[%s12198_s7 + $0x178] sm:$0xff] }
 0x169   :  { %v179_v37 = vsel %vm178_vm2, %v10676_v35, 0.0 }
 0x16a   :  { %180 = vadd.xlane.f32.xlu1 %v179_v37  ;;  %v10836_v37 = vpack.c.bf16 %v249_v32, %v248_v31  ;;  %v8449_v31 = vld [vmem:[%s12199_s8 + $0x6] ss:$0 sm:$0xff] }
 0x16e   :  { %183 = vadd.xlane.f32.xlu1 %v182_v38  ;;  %v242_v38 = vld [vmem:[%s12198_s7 + $0xa0] sm:$0xff] }
 0x1f7   :  { %v181_v39 = vpop.xlane.xlu1 %180 }
 0x1f8   :  { %v186_v40 = vmul.f32 0.03125, %v181_v39  ;;  %v243_v39 = vld [vmem:[%s12198_s7 + $0xa8] sm:$0xff] }
 0x1fa   :  { %v188_v41 = vsub.f32 %v10676_v35, %v186_v40  ;;  %v254_v40 = vld [vmem:[%s12198_s7 + $0x100] sm:$0xff] }
 0x1fb   :  { %v184_v42 = vpop.xlane.xlu1 %183 }
 0x1fc   :  { %v187_v43 = vmul.f32 0.03125, %v184_v42  ;;  %v190_v44 = vmul.f32 %v188_v41, %v188_v41 }
 0x1fe   :  { %v10686_v45 = vsub.f32 %v10678_v36, %v187_v43  ;;  %v192_v46 = vsel %vm178_vm2, %v190_v44, 0.0  ;;  %v10858_v43 = vpack.c.bf16 %v243_v39, %v242_v38 }
 0x1ff   :  { %193 = vadd.xlane.f32.xlu0 %v192_v46  ;;  %v244_v46 = vld [vmem:[%s12198_s7 + $0xb0] sm:$0xff] }
 0x200   :  { %v191_v47 = vmul.f32 %v10686_v45, %v10686_v45 }
 0x202   :  { %v195_v48 = vsel %vm178_vm2, %v191_v47, 0.0  ;;  %v245_v47 = vld [vmem:[%s12198_s7 + $0xb8] sm:$0xff] }
 0x203   :  { %196 = vadd.xlane.f32.xlu1 %v195_v48  ;;  %v256_v48 = vld [vmem:[%s12198_s7 + $0x110] sm:$0xff]  ;;  %v10882_v50 = vpack.c.bf16 %v245_v47, %v244_v46 }
 0x204   :  { %v10884_v51 = vpack.c.bf16 %v257_v49, %v256_v48 }
 0x28c   :  { %v194_v63 = vpop.xlane.xlu0 %193 }
 0x28d   :  { %v198_v0 = vmul.f32 0.03125, %v194_v63  ;;  %v10908_v63 = vpack.c.bf16 %v263_v58, %v262_v57 }
 0x28f   :  { %v200_v1 = vadd.f32 1e-05, %v198_v0  ;;  %v252_v0 = vld [vmem:[%s12198_s7 + $0xf0] sm:$0xff] }
 0x290   :  { %v197_v29 = vpop.xlane.xlu1 %196 }
 0x291   :  { %10398 = vrsqrt.f32 %v200_v1  ;;  %v199_v33 = vmul.f32 0.03125, %v197_v29  ;;  %v253_v1 = vld [vmem:[%s12198_s7 + $0xf8] sm:$0xff] }
 0x293   :  { %v201_v42 = vadd.f32 1e-05, %v199_v33 }
 0x295   :  { %10400 = vrsqrt.f32 %v201_v42 }
 0x29b   :  { %v10399_v2 = vpop.eup %10398 }
 0x29c   :  { %v204_v5 = vmul.f32 %v10399_v2, %v188_v41  ;;  %v255_v41 = vld [vmem:[%s12198_s7 + $0x108] sm:$0xff]  ;;  %v264_v2 = vld [vmem:[%s12198_s7 + $0x150] sm:$0xff] }
 0x29d   :  { %v10860_v44 = vpack.c.bf16 %v255_v41, %v254_v40  ;;  %v10932_v6 = vpack.c.bf16 %v265_v4, %v264_v2  ;;  %v8448_v41 = vld [vmem:[%s12199_s8 + $0x5] ss:$0 sm:$0xff] }
 0x29e   :  { %v212_v10 = vmul.f32 %v10741_v3, %v204_v5  ;;  %v10930_v5 = vpack.c.bf16 %v253_v1, %v252_v0 }
 0x2a0   :  { %v10769_v14 = vadd.f32 %v10758_v9, %v212_v10  ;;  %v10401_v10 = vpop.eup %10400 }
 0x2a1   :  { %v205_v15 = vmul.f32 %v10401_v10, %v10686_v45  ;;  %v10965_v45 = vpack.c.bf16 %v261_v17, %v260_v16 }
 0x2a2   :  { %9119 = vmatmul.mubr.msk.f32.vlgmr.msra.gmra.mrb[2].mxu0 %vm178_vm2, %v10769_v14  ;;  %9130 = vmatmul.mubr.msk.f32.vlgmr.msra.gmra.mrb[0].mxu1 %vm178_vm2, %v10769_v14 }
 0x2a3   :  { %10027 = vmatpush3.bf16.msra.mxu1 %v10761_v11  ;;  %10039 = vmatpush3.bf16.msra.mxu0 %v10763_v12  ;;  %v213_v20 = vmul.f32 %v10741_v3, %v205_v15 }
 0x2a4   :  { %10028 = vmatprep.subr.bf16.mxu1 %v10508_v54  ;;  %10040 = vmatprep.subr.bf16.mxu0 %v10508_v54 }
 0x2a5   :  { %9140 = vmatprep.mubr.msk.f32.mxu1 %vm10509_vm3, %v10510_v62  ;;  %9162 = vmatprep.mubr.msk.f32.mxu0 %vm10509_vm3, %v10510_v62  ;;  %v10985_v3 = vadd.f32 %v10758_v9, %v213_v20 }
 0x2a7   :  { %10030 = vmatpush3.bf16.msra.mxu1 %v10786_v18  ;;  %10042 = vmatpush3.bf16.msra.mxu0 %v10788_v19 }
 0x2a8   :  { %10031 = vmatprep.subr.bf16.mxu1 %v10508_v54  ;;  %10049 = vmatprep.subr.bf16.mxu0 %v10508_v54 }
 0x2aa   :  { %9141 = vmatmul.mubr.msk.f32.vlgmr.msra.gmra.mrb[2].mxu1 %vm178_vm2, %v10769_v14  ;;  %9163 = vmatmul.mubr.msk.f32.vlgmr.msra.gmra.mrb[4].mxu0 %vm178_vm2, %v10769_v14 }
 0x2ab   :  { %10033 = vmatpush3.bf16.msra.mxu1 %v10810_v24  ;;  %10051 = vmatpush3.bf16.msra.mxu0 %v10812_v25 }
 0x2ac   :  { %10034 = vmatprep.subr.bf16.mxu1 %v10508_v54  ;;  %10052 = vmatprep.subr.bf16.mxu0 %v10508_v54 }
 0x2ad   :  { %9151 = vmatprep.mubr.msk.f32.mxu1 %vm10509_vm3, %v10510_v62  ;;  %9184 = vmatprep.mubr.msk.f32.mxu0 %vm10509_vm3, %v10510_v62 }
 0x2af   :  { %10036 = vmatpush3.bf16.msra.mxu1 %v10834_v34  ;;  %10054 = vmatpush3.bf16.msra.mxu0 %v10836_v37 }
 0x2b0   :  { %10043 = vmatprep.subr.bf16.mxu1 %v10508_v54  ;;  %10061 = vmatprep.subr.bf16.mxu0 %v10508_v54 }
 0x2b2   :  { %9152 = vmatmul.mubr.msk.f32.vlgmr.msra.gmra.mrb[4].mxu1 %vm178_vm2, %v10769_v14  ;;  %9185 = vmatmul.mubr.msk.f32.vlgmr.msra.gmra.mrb[6].mxu0 %vm178_vm2, %v10769_v14 }
 0x2b3   :  { %10045 = vmatpush3.bf16.msra.mxu1 %v10858_v43  ;;  %10063 = vmatpush3.bf16.msra.mxu0 %v10860_v44 }
 0x2b4   :  { %10046 = vmatprep.subr.bf16.mxu1 %v10508_v54  ;;  %10064 = vmatprep.subr.bf16.mxu0 %v10508_v54 }
 0x2b5   :  { %9173 = vmatprep.mubr.msk.f32.mxu1 %vm10509_vm3, %v10510_v62  ;;  %9206 = vmatprep.mubr.msk.f32.mxu0 %vm10509_vm3, %v10510_v62 }
 0x2b7   :  { %10048 = vmatpush3.bf16.msra.mxu1 %v10882_v50  ;;  %10066 = vmatpush3.bf16.msra.mxu0 %v10884_v51 }
 0x2b8   :  { %10055 = vmatprep.subr.bf16.mxu1 %v10508_v54  ;;  %10073 = vmatprep.subr.bf16.mxu0 %v10508_v54 }
 0x2ba   :  { %9174 = vmatmul.mubr.msk.f32.vlgmr.msra.gmra.mrb[6].mxu1 %vm178_vm2, %v10769_v14  ;;  %9207 = vmatmul.mubr.msk.f32.vlgmr.msra.gmra.mrb[8].mxu0 %vm178_vm2, %v10769_v14 }
 0x2bb   :  { %10057 = vmatpush3.bf16.msra.mxu1 %v10906_v60  ;;  %10075 = vmatpush3.bf16.msra.mxu0 %v10908_v63 }
 0x2bc   :  { %10058 = vmatprep.subr.bf16.mxu1 %v10508_v54  ;;  %10076 = vmatprep.subr.bf16.mxu0 %v10508_v54 }
 0x2bd   :  { %9195 = vmatprep.mubr.msk.f32.mxu1 %vm10509_vm3, %v10510_v62  ;;  %9228 = vmatprep.mubr.msk.f32.mxu0 %vm10509_vm3, %v10510_v62 }
 0x2bf   :  { %10060 = vmatpush3.bf16.msra.mxu1 %v10930_v5  ;;  %10078 = vmatpush3.bf16.msra.mxu0 %v10932_v6 }
 0x2c0   :  { %10067 = vmatprep.subr.bf16.mxu1 %v10508_v54  ;;  %10085 = vmatprep.subr.bf16.mxu0 %v10508_v54 }
 0x2c2   :  { %9196 = vmatmul.mubr.msk.f32.vlgmr.msra.gmra.mrb[8].mxu1 %vm178_vm2, %v10769_v14  ;;  %9229 = vmatmul.mubr.msk.f32.vlgmr.msra.gmra.mrb[10].mxu0 %vm178_vm2, %v10769_v14 }
 0x2c3   :  { %10069 = vmatpush3.bf16.msra.mxu1 %v10948_v13  ;;  %10087 = vmatpush3.bf16.msra.mxu0 %v10701_v52  ;;  %v10982_v52 = vpack.c.bf16 %v267_v22, %v266_v21 }
 0x2c4   :  { %10070 = vmatprep.subr.bf16.mxu1 %v10508_v54  ;;  %10088 = vmatprep.subr.bf16.mxu0 %v10508_v54 }
 0x2c5   :  { %9217 = vmatprep.mubr.msk.f32.mxu1 %vm10509_vm3, %v10510_v62  ;;  %9250 = vmatprep.mubr.msk.f32.mxu0 %vm10509_vm3, %v10510_v62 }
 0x2c7   :  { %10072 = vmatpush3.bf16.msra.mxu1 %v10965_v45  ;;  %10090 = vmatpush3.bf16.msra.mxu0 %v10723_v59  ;;  %v11001_v59 = vpack.c.bf16 %v269_v26, %v268_v23  ;;  %v8451_v23 = vld [vmem:[%s12199_s8 + $0x8] ss:$0 sm:$0xff] }
 0x2c8   :  { %10079 = vmatprep.subr.bf16.mxu1 %v10508_v54  ;;  %10097 = vmatprep.subr.bf16.mxu0 %v10508_v54 }
 0x2ca   :  { %9218 = vmatmul.mubr.msk.f32.vlgmr.msra.gmra.mrb[10].mxu1 %vm178_vm2, %v10769_v14  ;;  %9251 = vmatmul.mubr.msk.f32.vlgmr.msra.gmra.mrb[12].mxu0 %vm178_vm2, %v10985_v3 }
 0x2cb   :  { %10081 = vmatpush3.bf16.msra.mxu1 %v10982_v52  ;;  %10099 = vmatpush3.bf16.msra.mxu0 %v10761_v11 }
 0x2cc   :  { %10082 = vmatprep.subr.bf16.mxu1 %v10508_v54  ;;  %10100 = vmatprep.subr.bf16.mxu0 %v10508_v54 }
 0x2cd   :  { %9239 = vmatprep.mubr.msk.f32.mxu1 %vm10509_vm3, %v10510_v62  ;;  %9272 = vmatprep.mubr.msk.f32.mxu0 %vm10509_vm3, %v10510_v62 }
 0x2cf   :  { %10084 = vmatpush3.bf16.msra.mxu1 %v11001_v59  ;;  %10102 = vmatpush3.bf16.msra.mxu0 %v10786_v18 }
 0x2d0   :  { %10091 = vmatprep.subr.bf16.mxu1 %v10508_v54  ;;  %10109 = vmatprep.subr.bf16.mxu0 %v10508_v54 }
 0x2d2   :  { %9240 = vmatmul.mubr.msk.f32.vlgmr.msra.gmra.mrb[12].mxu1 %vm178_vm2, %v10769_v14  ;;  %9273 = vmatmul.mubr.msk.f32.vlgmr.msra.gmra.mrb[14].mxu0 %vm178_vm2, %v10985_v3 }
 0x2d3   :  { %10093 = vmatpush3.bf16.msra.mxu1 %v10708_v55  ;;  %10111 = vmatpush3.bf16.msra.mxu0 %v10763_v12  ;;  %v8447_v12 = vld [vmem:[%s12199_s8 + $0x4] ss:$0 sm:$0xff] }
 0x2d4   :  { %10094 = vmatprep.subr.bf16.mxu1 %v10508_v54  ;;  %10112 = vmatprep.subr.bf16.mxu0 %v10508_v54 }
 0x2d5   :  { %9261 = vmatprep.mubr.msk.f32.mxu1 %vm10509_vm3, %v10510_v62  ;;  %9294 = vmatprep.mubr.msk.f32.mxu0 %vm10509_vm3, %v10510_v62 }
 0x2d7   :  { %10096 = vmatpush3.bf16.msra.mxu1 %v10728_v61  ;;  %10114 = vmatpush3.bf16.msra.mxu0 %v10788_v19  ;;  %v8443_v19 = vld [vmem:[%s12199_s8] ss:$0 sm:$0xff] }
 0x2d8   :  { %10103 = vmatprep.subr.bf16.mxu1 %v10508_v54  ;;  %10121 = vmatprep.subr.bf16.mxu0 %v10508_v54 }
 0x2da   :  { %9262 = vmatmul.mubr.msk.f32.vlgmr.msra.gmra.mrb[14].mxu1 %vm178_vm2, %v10985_v3  ;;  %9295 = vmatmul.mubr.msk.f32.vlgmr.msra.gmra.mrb[16].mxu0 %vm178_vm2, %v10985_v3 }
 0x2db   :  { %10105 = vmatpush3.bf16.msra.mxu1 %v10810_v24  ;;  %10123 = vmatpush3.bf16.msra.mxu0 %v10812_v25 }
 0x2dc   :  { %10106 = vmatprep.subr.bf16.mxu1 %v10508_v54  ;;  %10124 = vmatprep.subr.bf16.mxu0 %v10508_v54 }
 0x2dd   :  { %9283 = vmatprep.mubr.msk.f32.mxu1 %vm10509_vm3, %v10510_v62  ;;  %9316 = vmatprep.mubr.msk.f32.mxu0 %vm10509_vm3, %v10510_v62 }
 0x2df   :  { %10108 = vmatpush3.bf16.msra.mxu1 %v10834_v34  ;;  %10126 = vmatpush3.bf16.msra.mxu0 %v10836_v37  ;;  %v8445_v34 = vld [vmem:[%s12199_s8 + $0x2] ss:$0 sm:$0xff] }
 0x2e0   :  { %10115 = vmatprep.subr.bf16.mxu1 %v10508_v54  ;;  %10133 = vmatprep.subr.bf16.mxu0 %v10508_v54 }
 0x2e2   :  { %9284 = vmatmul.mubr.msk.f32.vlgmr.msra.gmra.mrb[16].mxu1 %vm178_vm2, %v10985_v3  ;;  %9317 = vmatmul.mubr.msk.f32.vlgmr.msra.gmra.mrb[18].mxu0 %vm178_vm2, %v10985_v3 }
 0x2e3   :  { %10117 = vmatpush3.bf16.msra.mxu1 %v10858_v43  ;;  %10135 = vmatpush3.bf16.msra.mxu0 %v10860_v44  ;;  %v8444_v44 = vld [vmem:[%s12199_s8 + $0x1] ss:$0 sm:$0xff] }
 0x2e4   :  { %10118 = vmatprep.subr.bf16.mxu1 %v10508_v54  ;;  %10136 = vmatprep.subr.bf16.mxu0 %v10508_v54 }
 0x2e5   :  { %9305 = vmatprep.mubr.msk.f32.mxu1 %vm10509_vm3, %v10510_v62  ;;  %9338 = vmatprep.mubr.msk.f32.mxu0 %vm10509_vm3, %v10510_v62 }
 0x2e7   :  { %10120 = vmatpush3.bf16.msra.mxu1 %v10882_v50  ;;  %10138 = vmatpush3.bf16.msra.mxu0 %v10884_v51  ;;  %v8450_v50 = vld [vmem:[%s12199_s8 + $0x7] ss:$0 sm:$0xff] }
 0x2e8   :  { %10127 = vmatprep.subr.bf16.mxu1 %v10508_v54  ;;  %10145 = vmatprep.subr.bf16.mxu0 %v10508_v54 }
 0x2ea   :  { %9306 = vmatmul.mubr.msk.f32.vlgmr.msra.gmra.mrb[18].mxu1 %vm178_vm2, %v10985_v3  ;;  %9339 = vmatmul.mubr.msk.f32.vlgmr.msra.gmra.mrb[20].mxu0 %vm178_vm2, %v10985_v3 }
 0x2eb   :  { %10129 = vmatpush3.bf16.msra.mxu1 %v10906_v60  ;;  %10147 = vmatpush3.bf16.msra.mxu0 %v10908_v63 }
 0x2ec   :  { %10130 = vmatprep.subr.bf16.mxu1 %v10508_v54  ;;  %10148 = vmatprep.subr.bf16.mxu0 %v10508_v54 }
 0x2ed   :  { %9327 = vmatprep.mubr.msk.f32.mxu1 %vm10509_vm3, %v10510_v62  ;;  %9360 = vmatprep.mubr.msk.f32.mxu0 %vm10509_vm3, %v10510_v62 }
 0x2ef   :  { %10132 = vmatpush3.bf16.msra.mxu1 %v10930_v5  ;;  %10150 = vmatpush3.bf16.msra.mxu0 %v10932_v6 }
 0x2f0   :  { %10139 = vmatprep.subr.bf16.mxu1 %v10508_v54  ;;  %9374 = vmatprep.subr.mxu0 %v10510_v62 }
 0x2f2   :  { %9328 = vmatmul.mubr.msk.f32.vlgmr.msra.gmra.mrb[20].mxu1 %vm178_vm2, %v10985_v3  ;;  %9361 = vmatmul.mubr.msk.f32.vlgmr.msra.gmra.mrb[22].mxu0 %vm178_vm2, %v10985_v3 }
 0x2f3   :  { %10141 = vmatpush3.bf16.msra.mxu1 %v10948_v13  ;;  %9349 = vmatprep.mubr.msk.f32.mxu1 %vm10509_vm3, %v10510_v62 }
 0x2f4   :  { %10142 = vmatprep.subr.bf16.mxu1 %v10508_v54  ;;  %9376 = vmatprep.mubr.msk.f32.mxu0 %vm10509_vm3, %v10510_v62 }
 0x2f7   :  { %10144 = vmatpush3.bf16.msra.mxu1 %v10965_v45 }
 0x2f8   :  { %10151 = vmatprep.subr.bf16.mxu1 %v10508_v54 }
 0x2fa   :  { %9350 = vmatmul.mubr.msk.f32.vlgmr.msra.gmra.mrb[22].mxu1 %vm178_vm2, %v10985_v3 }
 0x2fb   :  { %10153 = vmatpush3.bf16.msra.mxu1 %v10982_v52  ;;  %9371 = vmatprep.mubr.msk.f32.mxu1 %vm10509_vm3, %v10510_v62 }
 0x2fc   :  { %10154 = vmatprep.subr.bf16.mxu1 %v10508_v54 }
 0x2ff   :  { %10156 = vmatpush3.bf16.msra.mxu1 %v11001_v59 }
 0x300   :  { %9379 = vmatprep.subr.mxu1 %v10510_v62 }
 0x302   :  { %9372 = vmatmul.mubr.msk.f32.vlgmr.msra.gmra.mrb[24].mxu1 %vm178_vm2, %v10985_v3 }
 0x303   :  { %9381 = vmatprep.mubr.msk.f32.mxu1 %vm10509_vm3, %v10510_v62 }
 0x375   :  { %v356_v55 = vpop.f32.mrb[2].mxu0  ;;  %v426_v61 = vpop.f32.mrb[0].mxu1 }
 0x376   :  { %v9120_v9 = vpop.f32.mrb[3].mxu0  ;;  %v9131_v11 = vpop.f32.mrb[1].mxu1  ;;  %v2045_v30 = vadd.f32 %v8443_v19, %v356_v55  ;;  %v2046_v49 = vadd.f32 %v8444_v44, %v426_v61 }
 0x37d   :  { %v496_v14 = vpop.f32.mrb[2].mxu1  ;;  %v636_v18 = vpop.f32.mrb[4].mxu0 }
 0x37e   :  { %v2049_v24 = vadd.f32 %v8447_v12, %v636_v18  ;;  %v9142_v25 = vpop.f32.mrb[3].mxu1  ;;  %v9164_v29 = vpop.f32.mrb[5].mxu0  ;;  %v2047_v40 = vadd.f32 %v8445_v34, %v496_v14 }
 0x380   :  { %9375 = vmatpush3.xpose.msk.msra.mxu0 %vm2069_vm4, %v2049_v24 }
 0x381   :  { %9384 = vmatprep.subr.mxu0 %v10510_v62 }
 0x383   :  { %9377 = vmatmul.mubr.msk.f32.vlgmr.msra.gmra.mrb[24].mxu0 %vm2069_vm4, %v2045_v30 }
 0x384   :  { %9386 = vmatprep.mubr.msk.f32.mxu0 %vm10509_vm3, %v10510_v62 }
 0x385   :  { %v566_v32 = vpop.f32.mrb[4].mxu1  ;;  %v776_v33 = vpop.f32.mrb[6].mxu0 }
 0x386   :  { %v2051_v37 = vadd.f32 %v8449_v31, %v776_v33  ;;  %v9153_v38 = vpop.f32.mrb[5].mxu1  ;;  %v9186_v39 = vpop.f32.mrb[7].mxu0  ;;  %v2048_v63 = vadd.f32 %v8446_v56, %v566_v32 }
 0x388   :  { %9385 = vmatpush3.xpose.msk.msra.mxu0 %vm2069_vm4, %v2051_v37 }
 0x389   :  { %9394 = vmatprep.subr.mxu0 %v10510_v62 }
 0x38b   :  { %9387 = vmatmul.mubr.msk.f32.vlgmr.msra.gmra.mrb[26].mxu0 %vm2069_vm4, %v2047_v40 }
 0x38c   :  { %9396 = vmatprep.mubr.msk.f32.mxu0 %vm10509_vm3, %v10510_v62 }
 0x38d   :  { %v706_v42 = vpop.f32.mrb[6].mxu1  ;;  %v916_v43 = vpop.f32.mrb[8].mxu0 }
 0x38e   :  { %v2050_v46 = vadd.f32 %v8448_v41, %v706_v42  ;;  %v9175_v47 = vpop.f32.mrb[7].mxu1  ;;  %v9208_v48 = vpop.f32.mrb[9].mxu0  ;;  %v2053_v59 = vadd.f32 %v8451_v23, %v916_v43 }
 0x390   :  { %9380 = vmatpush3.xpose.msk.msra.mxu1 %vm2069_vm4, %v2050_v46 }
 0x391   :  { %9389 = vmatprep.subr.mxu1 %v10510_v62 }
 0x393   :  { %9382 = vmatmul.mubr.msk.f32.vlgmr.msra.gmra.mrb[26].mxu1 %vm2069_vm4, %v2046_v49 }
 0x394   :  { %9391 = vmatprep.mubr.msk.f32.mxu1 %vm10509_vm3, %v10510_v62 }
 0x395   :  { %v846_v51 = vpop.f32.mrb[8].mxu1  ;;  %v11137_v53 = vpop.f32.mrb[10].mxu0 }
 0x396   :  { %v2052_v57 = vadd.f32 %v8450_v50, %v846_v51  ;;  %v9197_v58 = vpop.f32.mrb[9].mxu1  ;;  %v9230_v60 = vpop.f32.mrb[11].mxu0 }
 0x398   :  { %9390 = vmatpush3.xpose.msk.msra.mxu1 %vm2069_vm4, %v2052_v57 }
 0x399   :  { %9399 = vmatprep.subr.mxu1 %v10510_v62 }
 0x39b   :  { %9392 = vmatmul.mubr.msk.f32.vlgmr.msra.gmra.mrb[28].mxu1 %vm2069_vm4, %v2048_v63 }
 0x39c   :  { %9401 = vmatprep.mubr.msk.f32.mxu1 %vm10509_vm3, %v10510_v62 }
 0x39d   :  { %v986_v0 = vpop.f32.mrb[10].mxu1  ;;  %v1199_v1 = vpop.f32.mrb[12].mxu0 }
 0x39e   :  { %v9219_v2 = vpop.f32.mrb[11].mxu1  ;;  %v9252_v4 = vpop.f32.mrb[13].mxu0  ;;  %v2057_v45 = vadd.f32 %v8443_v19, %v1199_v1 }
 0x3a5   :  { %v11147_v5 = vpop.f32.mrb[12].mxu1  ;;  %v1339_v6 = vpop.f32.mrb[14].mxu0 }
 0x3a6   :  { %v9241_v7 = vpop.f32.mrb[13].mxu1  ;;  %v9274_v8 = vpop.f32.mrb[15].mxu0  ;;  %v2059_v26 = vadd.f32 %v8445_v34, %v1339_v6 }
 0x3ad   :  { %v1269_v10 = vpop.f32.mrb[14].mxu1  ;;  %v1479_v13 = vpop.f32.mrb[16].mxu0 }
 0x3ae   :  { %v2061_v15 = vadd.f32 %v8447_v12, %v1479_v13  ;;  %v9263_v16 = vpop.f32.mrb[15].mxu1  ;;  %v9296_v17 = vpop.f32.mrb[17].mxu0  ;;  %v2058_v18 = vadd.f32 %v8444_v44, %v1269_v10 }
 0x3b0   :  { %9395 = vmatpush3.xpose.msk.msra.mxu0 %vm2069_vm4, %v2061_v15 }
 0x3b1   :  { %9404 = vmatprep.subr.mxu0 %v10510_v62 }
 0x3b3   :  { %9397 = vmatmul.mubr.msk.f32.vlgmr.msra.gmra.mrb[28].mxu0 %vm2069_vm4, %v2057_v45 }
 0x3b4   :  { %9406 = vmatprep.mubr.msk.f32.mxu0 %vm10509_vm3, %v10510_v62 }
 0x3b5   :  { %v1409_v20 = vpop.f32.mrb[16].mxu1  ;;  %v1619_v21 = vpop.f32.mrb[18].mxu0 }
 0x3b6   :  { %v2063_v22 = vadd.f32 %v8449_v31, %v1619_v21  ;;  %v9285_v52 = vpop.f32.mrb[17].mxu1  ;;  %v9318_v3 = vpop.f32.mrb[19].mxu0  ;;  %v8452_v31 = vld [vmem:[%s12199_s8 + $0x9] ss:$0 sm:$0xff]  ;;  %v2060_v32 = vadd.f32 %v8446_v56, %v1409_v20 }
 0x3b7   :  { %v2054_v33 = vadd.f32 %v8452_v31, %v986_v0 }
 0x3b8   :  { %9405 = vmatpush3.xpose.msk.msra.mxu0 %vm2069_vm4, %v2063_v22 }
 0x3b9   :  { %9414 = vmatprep.subr.mxu0 %v10510_v62 }
 0x3bb   :  { %9407 = vmatmul.mubr.msk.f32.vlgmr.msra.gmra.mrb[30].mxu0 %vm2069_vm4, %v2059_v26 }
 0x3bc   :  { %9415 = vmatpush3.msra.mxu0 %v2053_v59  ;;  %9416 = vmatprep.mubr.msk.f32.mxu0 %vm10509_vm3, %v10510_v62 }
 0x3bd   :  { %v1549_v55 = vpop.f32.mrb[18].mxu1  ;;  %v1759_v61 = vpop.f32.mrb[20].mxu0  ;;  %9424 = vmatprep.subr.mxu0 %v10510_v62 }
 0x3be   :  { %v2062_v9 = vadd.f32 %v8448_v41, %v1549_v55  ;;  %v11163_v11 = vadd.f32 %v8451_v23, %v1759_v61  ;;  %v9307_v12 = vpop.f32.mrb[19].mxu1  ;;  %v9340_v14 = vpop.f32.mrb[21].mxu0  ;;  %v174_v41 = vshrl.u32 %v81_v27, 7 }
 0x3c0   :  { %9400 = vmatpush3.xpose.msk.msra.mxu1 %vm2069_vm4, %v2062_v9  ;;  %vm11187_vm5 = vcmp.ge.s32.totalorder %v174_v41, %v10669_v28 }
 0x3c1   :  { %9409 = vmatprep.subr.mxu1 %v10510_v62 }
 0x3c3   :  { %9402 = vmatmul.mubr.msk.f32.vlgmr.msra.gmra.mrb[30].mxu1 %vm2069_vm4, %v2058_v18 }
 0x3c4   :  { %9411 = vmatprep.mubr.msk.f32.mxu1 %vm10509_vm3, %v10510_v62 }
 0x3c5   :  { %v1689_v19 = vpop.f32.mrb[20].mxu1  ;;  %v11170_v24 = vpop.f32.mrb[22].mxu0 }
 0x3c6   :  { %v2064_v25 = vadd.f32 %v8450_v50, %v1689_v19  ;;  %v9329_v29 = vpop.f32.mrb[21].mxu1  ;;  %v9362_v30 = vpop.f32.mrb[23].mxu0 }
 0x3c8   :  { %9410 = vmatpush3.xpose.msk.msra.mxu1 %vm2069_vm4, %v2064_v25 }
 0x3c9   :  { %9419 = vmatprep.subr.mxu1 %v10510_v62 }
 0x3cb   :  { %9412 = vmatmul.mubr.msk.f32.vlgmr.msra.gmra.mrb[32].mxu1 %vm2069_vm4, %v2060_v32 }
 0x3cc   :  { %9420 = vmatpush3.msra.mxu1 %v2054_v33  ;;  %9421 = vmatprep.mubr.msk.f32.mxu1 %vm10509_vm3, %v10510_v62 }
 0x3cd   :  { %v1829_v34 = vpop.f32.mrb[22].mxu1  ;;  %9429 = vmatprep.subr.mxu1 %v10510_v62 }
 0x3ce   :  { %v11181_v37 = vadd.f32 %v8452_v31, %v1829_v34  ;;  %v9351_v38 = vpop.f32.mrb[23].mxu1 }
 0x3d5   :  { %v11183_v39 = vpop.f32.mrb[24].mxu1 }
 0x3d6   :  { %v9373_v40 = vpop.f32.mrb[25].mxu1 }
 0x456   :  { %v2142_v43 = vpop.f32.mrb[24].mxu0 }
 0x457   :  { %v2678_v44 = vmul.f32 0.35355338, %v2142_v43  ;;  %v9378_v46 = vpop.f32.mrb[25].mxu0 }
 0x459   :  { %v2688_v47 = vsel %vm11187_vm5, %v2678_v44, -1e+30 }
 0x45a   :  { %v2696_v48 = vsel %vm2069_vm4, %v2688_v47, -inf }
 0x45b   :  { %2697 = vmax.xlane.f32.xlu1 %v2696_v48 }
 0x45e   :  { %v2294_v49 = vpop.f32.mrb[26].mxu0 }
 0x45f   :  { %v2680_v50 = vmul.f32 0.35355338, %v2294_v49  ;;  %v9388_v51 = vpop.f32.mrb[27].mxu0 }
 0x461   :  { %v2690_v27 = vsel %vm11187_vm5, %v2680_v50, -1e+30 }
 0x462   :  { %v2702_v28 = vsel %vm2069_vm4, %v2690_v27, -inf }
 0x463   :  { %2703 = vmax.xlane.f32.xlu1 %v2702_v28 }
 0x466   :  { %v2218_v56 = vpop.f32.mrb[26].mxu1 }
 0x467   :  { %v2679_v57 = vmul.f32 0.35355338, %v2218_v56  ;;  %v9383_v58 = vpop.f32.mrb[27].mxu1 }
 0x469   :  { %v2689_v60 = vsel %vm11187_vm5, %v2679_v57, -1e+30 }
 0x46a   :  { %v2699_v63 = vsel %vm2069_vm4, %v2689_v60, -inf }
 0x46b   :  { %2700 = vmax.xlane.f32.xlu1 %v2699_v63 }
 0x46e   :  { %v2370_v0 = vpop.f32.mrb[28].mxu1 }
 0x46f   :  { %v2681_v1 = vmul.f32 0.35355338, %v2370_v0  ;;  %v9393_v2 = vpop.f32.mrb[29].mxu1 }
 0x471   :  { %v2691_v4 = vsel %vm11187_vm5, %v2681_v1, -1e+30 }
 0x472   :  { %v2705_v6 = vsel %vm2069_vm4, %v2691_v4, -inf }
 0x473   :  { %2706 = vmax.xlane.f32.xlu1 %v2705_v6 }
 0x486   :  { %v2446_v7 = vpop.f32.mrb[28].mxu0 }
 0x487   :  { %v2682_v8 = vmul.f32 0.35355338, %v2446_v7  ;;  %v9398_v10 = vpop.f32.mrb[29].mxu0 }
 0x489   :  { %v2692_v13 = vsel %vm11187_vm5, %v2682_v8, -1e+30 }
 0x48a   :  { %v2708_v15 = vsel %vm2069_vm4, %v2692_v13, -inf }
 0x48b   :  { %2709 = vmax.xlane.f32.xlu1 %v2708_v15 }
 0x48e   :  { %v2598_v16 = vpop.f32.mrb[30].mxu0 }
 0x48f   :  { %v9408_v17 = vpop.f32.mrb[31].mxu0  ;;  %v2684_v20 = vmul.f32 0.35355338, %v2598_v16 }
 0x491   :  { %v2694_v23 = vsel %vm11187_vm5, %v2684_v20, -1e+30 }
 0x492   :  { %v2714_v59 = vsel %vm2069_vm4, %v2694_v23, -inf }
 0x496   :  { %v2522_v45 = vpop.f32.mrb[30].mxu1 }
 0x497   :  { %v2683_v21 = vmul.f32 0.35355338, %v2522_v45  ;;  %v9403_v22 = vpop.f32.mrb[31].mxu1 }
 0x499   :  { %v2693_v52 = vsel %vm11187_vm5, %v2683_v21, -1e+30  ;;  %v8453_v21 = vld [vmem:[%s12199_s8 + $0xa] ss:$0 sm:$0xff] }
 0x49a   :  { %v2711_v3 = vsel %vm2069_vm4, %v2693_v52, -inf }
 0x49b   :  { %2712 = vmax.xlane.f32.xlu1 %v2711_v3  ;;  %v2055_v3 = vadd.f32 %v8453_v21, %v11137_v53 }
 0x49e   :  { %v2674_v26 = vpop.f32.mrb[32].mxu1 }
 0x49f   :  { %v2685_v55 = vmul.f32 0.35355338, %v2674_v26  ;;  %v9413_v61 = vpop.f32.mrb[33].mxu1  ;;  %2715 = vmax.xlane.f32.xlu1 %v2714_v59 }
 0x4a1   :  { %v2695_v9 = vsel %vm11187_vm5, %v2685_v55, -1e+30  ;;  %v8454_v55 = vld [vmem:[%s12199_s8 + $0xb] ss:$0 sm:$0xff] }
 0x4a2   :  { %v2717_v12 = vsel %vm2069_vm4, %v2695_v9, -inf }
 0x4a3   :  { %2718 = vmax.xlane.f32.xlu0 %v2717_v12  ;;  %v2056_v12 = vadd.f32 %v8454_v55, %v11147_v5 }
 0x4e8   :  { %v2698_v14 = vpop.xlane.xlu1 %2697 }
 0x4e9   :  { %v2720_v18 = vsub.f32 %v2688_v47, %v2698_v14 }
 0x4eb   :  { %v2728_v19 = vmul.f32 1.442695, %v2720_v18 }
 0x4ed   :  { %10402 = vpow2.f32 %v2728_v19 }
 0x4f0   :  { %v2704_v25 = vpop.xlane.xlu1 %2703 }
 0x4f1   :  { %v2722_v29 = vsub.f32 %v2690_v27, %v2704_v25  ;;  %v2067_v25 = vadd.f32 %v8453_v21, %v11170_v24 }
 0x4f3   :  { %v2732_v30 = vmul.f32 1.442695, %v2722_v29 }
 0x4f5   :  { %10404 = vpow2.f32 %v2732_v30 }
 0x4f7   :  { %v10403_v31 = vpop.eup %10402 }
 0x4f8   :  { %v2701_v32 = vpop.xlane.xlu1 %2700  ;;  %v2744_v33 = vsel %vm2069_vm4, %v10403_v31, 0.0 }
 0x4f9   :  { %v2721_v34 = vsub.f32 %v2689_v60, %v2701_v32  ;;  %2745 = vadd.xlane.f32.xlu1 %v2744_v33  ;;  %v2068_v33 = vadd.f32 %v8454_v55, %v11183_v39  ;;  %v282_v39 = vld [vmem:[%s12200_s9] sm:$0xff] }
 0x4fb   :  { %v2730_v38 = vmul.f32 1.442695, %v2721_v34 }
 0x4fd   :  { %10406 = vpow2.f32 %v2730_v38 }
 0x4ff   :  { %v10405_v40 = vpop.eup %10404 }
 0x500   :  { %v2707_v41 = vpop.xlane.xlu1 %2706  ;;  %v2750_v43 = vsel %vm2069_vm4, %v10405_v40, 0.0 }
 0x501   :  { %v2723_v44 = vsub.f32 %v2691_v4, %v2707_v41  ;;  %2751 = vadd.xlane.f32.xlu1 %v2750_v43  ;;  %v283_v41 = vld [vmem:[%s12200_s9 + $0x8] sm:$0xff]  ;;  %v284_v43 = vld [vmem:[%s12200_s9 + $0x10] sm:$0xff] }
 0x503   :  { %v2734_v46 = vmul.f32 1.442695, %v2723_v44 }
 0x505   :  { %10408 = vpow2.f32 %v2734_v46 }
 0x507   :  { %v10407_v47 = vpop.eup %10406 }
 0x508   :  { %v2747_v48 = vsel %vm2069_vm4, %v10407_v47, 0.0 }
 0x509   :  { %2748 = vadd.xlane.f32.xlu0 %v2747_v48 }
 0x50f   :  { %v10409_v49 = vpop.eup %10408 }
 0x510   :  { %v2753_v50 = vsel %vm2069_vm4, %v10409_v49, 0.0 }
 0x511   :  { %2754 = vadd.xlane.f32.xlu0 %v2753_v50 }
 0x518   :  { %v2710_v51 = vpop.xlane.xlu1 %2709 }
 0x519   :  { %v2724_v27 = vsub.f32 %v2692_v13, %v2710_v51 }
 0x51b   :  { %v2736_v28 = vmul.f32 1.442695, %v2724_v27 }
 0x51d   :  { %10410 = vpow2.f32 %v2736_v28 }
 0x527   :  { %v11219_v56 = vpop.eup %10410 }
 0x528   :  { %v2713_v57 = vpop.xlane.xlu1 %2712  ;;  %v2756_v58 = vsel %vm2069_vm4, %v11219_v56, 0.0 }
 0x529   :  { %v2725_v60 = vsub.f32 %v2693_v52, %v2713_v57  ;;  %2757 = vadd.xlane.f32.xlu1 %v2756_v58 }
 0x52b   :  { %v2738_v63 = vmul.f32 1.442695, %v2725_v60 }
 0x52c   :  { %v2716_v0 = vpop.xlane.xlu1 %2715 }
 0x52d   :  { %10412 = vpow2.f32 %v2738_v63  ;;  %v2726_v1 = vsub.f32 %v2694_v23, %v2716_v0 }
 0x52f   :  { %v2740_v2 = vmul.f32 1.442695, %v2726_v1 }
 0x530   :  { %v2719_v4 = vpop.xlane.xlu0 %2718 }
 0x531   :  { %10414 = vpow2.f32 %v2740_v2  ;;  %v2727_v6 = vsub.f32 %v2695_v9, %v2719_v4 }
 0x533   :  { %v2742_v7 = vmul.f32 1.442695, %v2727_v6 }
 0x535   :  { %10416 = vpow2.f32 %v2742_v7 }
 0x537   :  { %v10413_v8 = vpop.eup %10412 }
 0x538   :  { %v2759_v10 = vsel %vm2069_vm4, %v10413_v8, 0.0 }
 0x539   :  { %2760 = vadd.xlane.f32.xlu0 %v2759_v10 }
 0x53b   :  { %v11224_v13 = vpop.eup %10414 }
 0x53c   :  { %v2762_v15 = vsel %vm2069_vm4, %v11224_v13, 0.0 }
 0x53d   :  { %2763 = vadd.xlane.f32.xlu1 %v2762_v15 }
 0x53f   :  { %v11228_v16 = vpop.eup %10416 }
 0x540   :  { %v2765_v17 = vsel %vm2069_vm4, %v11228_v16, 0.0 }
 0x541   :  { %2766 = vadd.xlane.f32.xlu0 %v2765_v17 }
 0x586   :  { %v2746_v45 = vpop.xlane.xlu1 %2745 }
 0x587   :  { %10418 = vrcp.f32 %v2746_v45 }
 0x58e   :  { %v2752_v20 = vpop.xlane.xlu1 %2751 }
 0x58f   :  { %10420 = vrcp.f32 %v2752_v20 }
 0x591   :  { %v10419_v22 = vpop.eup %10418 }
 0x592   :  { %v2776_v52 = vmul.f32 %v10419_v22, %v10403_v31  ;;  %v8487_v22 = vld [vmem:[%s12201_s10] ss:$0 sm:$0xff] }
 0x594   :  { %9417 = vmatmul.mubr.msk.f32.vlgmr.msra.gmra.mrb[32].mxu0 %vm2069_vm4, %v2776_v52 }
 0x595   :  { %9425 = vmatpush3.msra.mxu0 %v2055_v3  ;;  %9426 = vmatprep.mubr.msk.f32.mxu0 %vm10509_vm3, %v10510_v62 }
 0x596   :  { %v2749_v23 = vpop.xlane.xlu0 %2748  ;;  %9434 = vmatprep.subr.mxu0 %v10510_v62 }
 0x597   :  { %10422 = vrcp.f32 %v2749_v23 }
 0x599   :  { %v10421_v26 = vpop.eup %10420 }
 0x59a   :  { %v2778_v59 = vmul.f32 %v10421_v26, %v10405_v40 }
 0x59c   :  { %9427 = vmatmul.mubr.msk.f32.vlgmr.msra.gmra.mrb[34].mxu0 %vm2069_vm4, %v2778_v59 }
 0x59d   :  { %9435 = vmatpush3.msra.mxu0 %v11163_v11  ;;  %9436 = vmatprep.mubr.msk.f32.mxu0 %vm10509_vm3, %v10510_v62 }
 0x59e   :  { %v2755_v53 = vpop.xlane.xlu0 %2754  ;;  %9444 = vmatprep.subr.mxu0 %v10510_v62 }
 0x59f   :  { %10424 = vrcp.f32 %v2755_v53 }
 0x5a1   :  { %v10423_v61 = vpop.eup %10422 }
 0x5a2   :  { %v2777_v9 = vmul.f32 %v10423_v61, %v10407_v47 }
 0x5a4   :  { %9422 = vmatmul.mubr.msk.f32.vlgmr.msra.gmra.mrb[34].mxu1 %vm2069_vm4, %v2777_v9 }
 0x5a5   :  { %9430 = vmatpush3.msra.mxu1 %v2056_v12  ;;  %9431 = vmatprep.mubr.msk.f32.mxu1 %vm10509_vm3, %v10510_v62 }
 0x5a6   :  { %9439 = vmatprep.subr.mxu1 %v10510_v62 }
 0x5a9   :  { %v10425_v11 = vpop.eup %10424 }
 0x5aa   :  { %v2779_v14 = vmul.f32 %v10425_v11, %v10409_v49  ;;  %v285_v49 = vld [vmem:[%s12200_s9 + $0x18] sm:$0xff] }
 0x5ac   :  { %9432 = vmatmul.mubr.msk.f32.vlgmr.msra.gmra.mrb[36].mxu1 %vm2069_vm4, %v2779_v14 }
 0x5ad   :  { %9440 = vmatpush3.msra.mxu1 %v11181_v37  ;;  %9441 = vmatprep.mubr.msk.f32.mxu1 %vm10509_vm3, %v10510_v62 }
 0x5ae   :  { %9449 = vmatprep.subr.mxu1 %v10510_v62 }
 0x5b6   :  { %v2758_v5 = vpop.xlane.xlu1 %2757 }
 0x5b7   :  { %10426 = vrcp.f32 %v2758_v5 }
 0x5c1   :  { %v10427_v18 = vpop.eup %10426 }
 0x5c2   :  { %v2780_v19 = vmul.f32 %v10427_v18, %v11219_v56 }
 0x5c4   :  { %9437 = vmatmul.mubr.msk.f32.vlgmr.msra.gmra.mrb[36].mxu0 %vm2069_vm4, %v2780_v19 }
 0x5c5   :  { %9445 = vmatpush3.msra.mxu0 %v2067_v25  ;;  %9446 = vmatprep.mubr.msk.f32.mxu0 %vm10509_vm3, %v10510_v62 }
 0x5c6   :  { %v2761_v29 = vpop.xlane.xlu0 %2760  ;;  %9454 = vmatprep.subr.mxu0 %v10510_v62 }
 0x5c7   :  { %10428 = vrcp.f32 %v2761_v29 }
 0x5ca   :  { %v2764_v37 = vpop.xlane.xlu1 %2763 }
 0x5cb   :  { %10430 = vrcp.f32 %v2764_v37 }
 0x5ce   :  { %v2767_v30 = vpop.xlane.xlu0 %2766 }
 0x5cf   :  { %10432 = vrcp.f32 %v2767_v30 }
 0x5d1   :  { %v10429_v31 = vpop.eup %10428 }
 0x5d2   :  { %v2781_v32 = vmul.f32 %v10429_v31, %v10413_v8 }
 0x5d4   :  { %9442 = vmatmul.mubr.msk.f32.vlgmr.msra.gmra.mrb[38].mxu1 %vm2069_vm4, %v2781_v32 }
 0x5d5   :  { %v10431_v24 = vpop.eup %10430  ;;  %9450 = vmatpush3.msra.mxu1 %v2068_v33  ;;  %9451 = vmatprep.mubr.msk.f32.mxu1 %vm10509_vm3, %v10510_v62 }
 0x5d6   :  { %v2782_v34 = vmul.f32 %v10431_v24, %v11224_v13  ;;  %9459 = vmatprep.subr.mxu1 %v10510_v62 }
 0x5d8   :  { %9447 = vmatmul.mubr.msk.f32.vlgmr.msra.gmra.mrb[38].mxu0 %vm2069_vm4, %v2782_v34 }
 0x5d9   :  { %v10433_v38 = vpop.eup %10432  ;;  %9456 = vmatprep.mubr.msk.f32.mxu0 %vm10509_vm3, %v10510_v62  ;;  %9455 = vmatpush3.msra.mxu0 %v282_v39 }
 0x5da   :  { %v2783_v40 = vmul.f32 %v10433_v38, %v11228_v16  ;;  %9464 = vmatprep.subr.mxu0 %v10510_v62 }
 0x5dc   :  { %9452 = vmatmul.mubr.msk.f32.vlgmr.msra.gmra.mrb[40].mxu1 %vm2069_vm4, %v2783_v40 }
 0x5dd   :  { %9461 = vmatprep.mubr.msk.f32.mxu1 %vm10509_vm3, %v10510_v62  ;;  %9460 = vmatpush3.msra.mxu1 %v283_v41 }
 0x5de   :  { %9469 = vmatprep.subr.mxu1 %v10510_v62 }
 0x667   :  { %v2853_v44 = vpop.f32.mrb[32].mxu0 }
 0x668   :  { %v9418_v46 = vpop.f32.mrb[33].mxu0  ;;  %9457 = vmatmul.mubr.msk.f32.vlgmr.msra.gmra.mrb[40].mxu0 %vm2069_vm4, %v2853_v44 }
 0x669   :  { %9465 = vmatpush3.msra.mxu0 %v284_v43  ;;  %9466 = vmatprep.mubr.msk.f32.mxu0 %vm10509_vm3, %v10510_v62 }
 0x66a   :  { %9474 = vmatprep.subr.mxu0 %v10510_v62 }
 0x66f   :  { %v2999_v47 = vpop.f32.mrb[34].mxu0 }
 0x670   :  { %v9428_v48 = vpop.f32.mrb[35].mxu0  ;;  %9467 = vmatmul.mubr.msk.f32.vlgmr.msra.gmra.mrb[42].mxu0 %vm2069_vm4, %v2999_v47 }
 0x671   :  { %9475 = vmatpush3.msra.mxu0 %v282_v39  ;;  %9476 = vmatprep.mubr.msk.f32.mxu0 %vm10509_vm3, %v10510_v62  ;;  %v4020_v48 = vld [vmem:[%s12202_s11] sm:$0xff] }
 0x672   :  { %9484 = vmatprep.subr.mxu0 %v10510_v62 }
 0x677   :  { %v2926_v50 = vpop.f32.mrb[34].mxu1 }
 0x678   :  { %v9423_v51 = vpop.f32.mrb[35].mxu1  ;;  %9462 = vmatmul.mubr.msk.f32.vlgmr.msra.gmra.mrb[42].mxu1 %vm2069_vm4, %v2926_v50 }
 0x679   :  { %9470 = vmatpush3.msra.mxu1 %v285_v49  ;;  %9471 = vmatprep.mubr.msk.f32.mxu1 %vm10509_vm3, %v10510_v62  ;;  %v4022_v51 = vld [vmem:[%s12202_s11 + $0x10] sm:$0xff] }
 0x67a   :  { %9479 = vmatprep.subr.mxu1 %v10510_v62 }
 0x67f   :  { %v3072_v27 = vpop.f32.mrb[36].mxu1 }
 0x680   :  { %v9433_v28 = vpop.f32.mrb[37].mxu1  ;;  %9472 = vmatmul.mubr.msk.f32.vlgmr.msra.gmra.mrb[44].mxu1 %vm2069_vm4, %v3072_v27  ;;  %v4023_v27 = vld [vmem:[%s12202_s11 + $0x18] sm:$0xff] }
 0x681   :  { %9480 = vmatpush3.msra.mxu1 %v283_v41  ;;  %9481 = vmatprep.mubr.msk.f32.mxu1 %vm10509_vm3, %v10510_v62  ;;  %v10161_v28 = vpack.c.bf16 %v4023_v27, %v4022_v51 }
 0x682   :  { %9489 = vmatprep.subr.mxu1 %v10510_v62 }
 0x697   :  { %v3145_v56 = vpop.f32.mrb[36].mxu0 }
 0x698   :  { %v9438_v57 = vpop.f32.mrb[37].mxu0  ;;  %9477 = vmatmul.mubr.msk.f32.vlgmr.msra.gmra.mrb[44].mxu0 %vm2069_vm4, %v3145_v56  ;;  %v4114_v56 = vld [vmem:[%s12204_s13] sm:$0xff] }
 0x699   :  { %9485 = vmatpush3.msra.mxu0 %v284_v43  ;;  %9486 = vmatprep.mubr.msk.f32.mxu0 %vm10509_vm3, %v10510_v62  ;;  %v4115_v57 = vld [vmem:[%s12204_s13 + $0x8] sm:$0xff] }
 0x6a7   :  { %v3218_v58 = vpop.f32.mrb[38].mxu1 }
 0x6a8   :  { %v9443_v60 = vpop.f32.mrb[39].mxu1  ;;  %9482 = vmatmul.mubr.msk.f32.vlgmr.msra.gmra.mrb[46].mxu1 %vm2069_vm4, %v3218_v58  ;;  %v4116_v58 = vld [vmem:[%s12204_s13 + $0x10] sm:$0xff] }
 0x6a9   :  { %9490 = vmatpush3.msra.mxu1 %v285_v49  ;;  %9491 = vmatprep.mubr.msk.f32.mxu1 %vm10509_vm3, %v10510_v62  ;;  %v4021_v49 = vld [vmem:[%s12202_s11 + $0x8] sm:$0xff]  ;;  %v10165_v60 = vpack.c.bf16 %v4115_v57, %v4114_v56 }
 0x6aa   :  { %v10157_v50 = vpack.c.bf16 %v4021_v49, %v4020_v48 }
 0x6ab   :  { %v3291_v63 = vpop.f32.mrb[38].mxu0  ;;  %10166 = vmatprep.subr.bf16.mxu1 %v10165_v60 }
 0x6ac   :  { %v9448_v0 = vpop.f32.mrb[39].mxu0  ;;  %9487 = vmatmul.mubr.msk.f32.vlgmr.msra.gmra.mrb[46].mxu0 %vm2069_vm4, %v3291_v63  ;;  %10158 = vmatprep.subr.bf16.mxu0 %v10157_v50  ;;  %v4117_v63 = vld [vmem:[%s12204_s13 + $0x18] sm:$0xff] }
 0x6ad   :  { %10160 = vmatpush3.bf16.msra.mxu0 %v10157_v50  ;;  %v10169_v0 = vpack.c.bf16 %v4117_v63, %v4116_v58 }
 0x6ae   :  { %10162 = vmatprep.subr.bf16.mxu0 %v10161_v28 }
 0x6af   :  { %v3364_v1 = vpop.f32.mrb[40].mxu1 }
 0x6b0   :  { %v9453_v2 = vpop.f32.mrb[41].mxu1  ;;  %9492 = vmatmul.mubr.msk.f32.vlgmr.msra.gmra.mrb[48].mxu1 %vm2069_vm4, %v3364_v1  ;;  %v4118_v1 = vld [vmem:[%s12204_s13 + $0x20] sm:$0xff] }
 0x6b1   :  { %10164 = vmatpush3.bf16.msra.mxu0 %v10161_v28  ;;  %v4119_v2 = vld [vmem:[%s12204_s13 + $0x28] sm:$0xff]  ;;  %10168 = vmatpush3.bf16.msra.mxu1 %v10165_v60 }
 0x6b2   :  { %10197 = vmatprep.subr.bf16.mxu0 %v10508_v54  ;;  %10170 = vmatprep.subr.bf16.mxu1 %v10169_v0 }
 0x6b5   :  { %10172 = vmatpush3.bf16.msra.mxu1 %v10169_v0  ;;  %v8498_v0 = vld [vmem:[%s12198_s7 + $0x180] sm:$0xff] }
 0x73b   :  { %v3437_v4 = vpop.f32.mrb[40].mxu0 }
 0x73c   :  { %v9458_v6 = vpop.f32.mrb[41].mxu0  ;;  %v3952_v13 = vsel %vm178_vm2, %v3437_v4, 0.0  ;;  %v10173_v4 = vpack.c.bf16 %v4119_v2, %v4118_v1  ;;  %v8499_v1 = vld [vmem:[%s12198_s7 + $0x188] sm:$0xff]  ;;  %v8514_v2 = vld [vmem:[%s12198_s7 + $0x200] sm:$0xff] }
 0x73d   :  { %v4120_v6 = vld [vmem:[%s12204_s13 + $0x30] sm:$0xff] }
 0x73e   :  { %10174 = vmatprep.subr.bf16.mxu1 %v10173_v4 }
 0x73f   :  { %10176 = vmatpush3.bf16.msra.mxu1 %v10173_v4  ;;  %v11452_v4 = vpack.c.bf16 %v8499_v1, %v8498_v0 }
 0x743   :  { %v3583_v7 = vpop.f32.mrb[42].mxu0 }
 0x744   :  { %v9468_v8 = vpop.f32.mrb[43].mxu0  ;;  %v3955_v45 = vsel %vm178_vm2, %v3583_v7, 0.0  ;;  %v4121_v7 = vld [vmem:[%s12204_s13 + $0x38] sm:$0xff] }
 0x745   :  { %v10177_v8 = vpack.c.bf16 %v4121_v7, %v4120_v6  ;;  %v8515_v6 = vld [vmem:[%s12198_s7 + $0x208] sm:$0xff] }
 0x746   :  { %v11457_v7 = vpack.c.bf16 %v8515_v6, %v8514_v2  ;;  %v8518_v2 = vld [vmem:[%s12198_s7 + $0x220] sm:$0xff]  ;;  %v8519_v6 = vld [vmem:[%s12198_s7 + $0x228] sm:$0xff] }
 0x747   :  { %10178 = vmatprep.subr.bf16.mxu1 %v10177_v8 }
 0x748   :  { %10180 = vmatpush3.bf16.msra.mxu1 %v10177_v8  ;;  %v8500_v8 = vld [vmem:[%s12198_s7 + $0x190] sm:$0xff] }
 0x74b   :  { %v3510_v10 = vpop.f32.mrb[42].mxu1 }
 0x74c   :  { %v3953_v15 = vsel %vm178_vm2, %v3510_v10, 0.0  ;;  %v9463_v16 = vpop.f32.mrb[43].mxu1  ;;  %v4122_v10 = vld [vmem:[%s12204_s13 + $0x40] sm:$0xff] }
 0x74d   :  { %v3954_v17 = vadd.f32 %v3953_v15, %v3952_v13  ;;  %v4123_v13 = vld [vmem:[%s12204_s13 + $0x48] sm:$0xff]  ;;  %v4124_v16 = vld [vmem:[%s12204_s13 + $0x50] sm:$0xff] }
 0x74e   :  { %v10181_v15 = vpack.c.bf16 %v4123_v13, %v4122_v10  ;;  %v8501_v10 = vld [vmem:[%s12198_s7 + $0x198] sm:$0xff]  ;;  %v8516_v13 = vld [vmem:[%s12198_s7 + $0x210] sm:$0xff] }
 0x74f   :  { %v3956_v20 = vadd.f32 %v3955_v45, %v3954_v17  ;;  %v4125_v17 = vld [vmem:[%s12204_s13 + $0x58] sm:$0xff] }
 0x750   :  { %10182 = vmatprep.subr.bf16.mxu1 %v10181_v15  ;;  %v10185_v45 = vpack.c.bf16 %v4125_v17, %v4124_v16  ;;  %v8517_v16 = vld [vmem:[%s12198_s7 + $0x218] sm:$0xff] }
 0x751   :  { %10184 = vmatpush3.bf16.msra.mxu1 %v10181_v15  ;;  %v11472_v15 = vpack.c.bf16 %v8501_v10, %v8500_v8  ;;  %v11477_v17 = vpack.c.bf16 %v8517_v16, %v8516_v13  ;;  %v11645_v10 = vpack.c.bf16 %v8519_v6, %v8518_v2  ;;  %v8520_v16 = vld [vmem:[%s12198_s7 + $0x230] sm:$0xff] }
 0x752   :  { %10186 = vmatprep.subr.bf16.mxu1 %v10185_v45  ;;  %v8594_v2 = vld [vmem:[%s12199_s8 + $0x13] ss:$0 sm:$0xff] }
 0x753   :  { %v3656_v21 = vpop.f32.mrb[44].mxu1 }
 0x754   :  { %v3957_v52 = vsel %vm178_vm2, %v3656_v21, 0.0  ;;  %v9473_v3 = vpop.f32.mrb[45].mxu1  ;;  %v4127_v21 = vld [vmem:[%s12204_s13 + $0x68] sm:$0xff] }
 0x755   :  { %v3958_v23 = vadd.f32 %v3957_v52, %v3956_v20  ;;  %v4126_v20 = vld [vmem:[%s12204_s13 + $0x60] sm:$0xff]  ;;  %10188 = vmatpush3.bf16.msra.mxu1 %v10185_v45 }
 0x757   :  { %v3972_v26 = vadd.f32 %v8487_v22, %v3958_v23 }
 0x759   :  { %v11323_v59 = vadd.f32 %v3972_v26, %v10676_v35 }
 0x75b   :  { %v3978_v53 = vsel %vm178_vm2, %v11323_v59, 0.0 }
 0x75c   :  { %3979 = vadd.xlane.f32.xlu1 %v3978_v53  ;;  %v8488_v53 = vld [vmem:[%s12196_s5] ss:$0 sm:$0xff] }
 0x76b   :  { %v3729_v55 = vpop.f32.mrb[44].mxu0 }
 0x76c   :  { %v9478_v61 = vpop.f32.mrb[45].mxu0  ;;  %v3959_v12 = vsel %vm178_vm2, %v3729_v55, 0.0 }
 0x76d   :  { %v8489_v61 = vld [vmem:[%s12197_s6] ss:$0 sm:$0xff] }
 0x77b   :  { %v3802_v9 = vpop.f32.mrb[46].mxu1 }
 0x77c   :  { %v3960_v11 = vsel %vm178_vm2, %v3802_v9, 0.0  ;;  %v9483_v14 = vpop.f32.mrb[47].mxu1 }
 0x77d   :  { %v3961_v5 = vadd.f32 %v3960_v11, %v3959_v12 }
 0x77f   :  { %v3875_v18 = vpop.f32.mrb[46].mxu0 }
 0x780   :  { %v3962_v19 = vsel %vm178_vm2, %v3875_v18, 0.0  ;;  %v9488_v25 = vpop.f32.mrb[47].mxu0 }
 0x781   :  { %v3963_v29 = vadd.f32 %v3962_v19, %v3961_v5 }
 0x783   :  { %v3948_v35 = vpop.f32.mrb[48].mxu1 }
 0x784   :  { %v3964_v37 = vsel %vm178_vm2, %v3948_v35, 0.0  ;;  %v9493_v30 = vpop.f32.mrb[49].mxu1  ;;  %v4128_v35 = vld [vmem:[%s12204_s13 + $0x70] sm:$0xff] }
 0x785   :  { %v3965_v31 = vadd.f32 %v3964_v37, %v3963_v29  ;;  %v4129_v37 = vld [vmem:[%s12204_s13 + $0x78] sm:$0xff] }
 0x786   :  { %v10193_v30 = vpack.c.bf16 %v4129_v37, %v4128_v35 }
 0x787   :  { %v3973_v32 = vadd.f32 %v8487_v22, %v3965_v31  ;;  %v10189_v22 = vpack.c.bf16 %v4127_v21, %v4126_v20  ;;  %v8490_v31 = vld [vmem:[%s12203_s12] ss:$0 sm:$0xff] }
 0x789   :  { %v11332_v33 = vadd.f32 %v3973_v32, %v10678_v36  ;;  %10190 = vmatprep.subr.bf16.mxu1 %v10189_v22 }
 0x78a   :  { %10192 = vmatpush3.bf16.msra.mxu1 %v10189_v22 }
 0x78b   :  { %v3981_v24 = vsel %vm178_vm2, %v11332_v33, 0.0  ;;  %10194 = vmatprep.subr.bf16.mxu1 %v10193_v30 }
 0x78c   :  { %3982 = vadd.xlane.f32.xlu0 %v3981_v24 }
 0x78e   :  { %10196 = vmatpush3.bf16.msra.mxu1 %v10193_v30 }
 0x78f   :  { %10221 = vmatprep.subr.bf16.mxu1 %v10508_v54 }
 0x7e9   :  { %v3980_v34 = vpop.xlane.xlu1 %3979 }
 0x7ea   :  { %v3984_v38 = vmul.f32 0.03125, %v3980_v34 }
 0x7ec   :  { %v3986_v40 = vsub.f32 %v11323_v59, %v3984_v38 }
 0x7ee   :  { %v3988_v39 = vmul.f32 %v3986_v40, %v3986_v40 }
 0x7f0   :  { %v3990_v41 = vsel %vm178_vm2, %v3988_v39, 0.0 }
 0x7f1   :  { %3991 = vadd.xlane.f32.xlu1 %v3990_v41  ;;  %v8493_v41 = vld [vmem:[%s12226_s3] ss:$0 sm:$0xff] }
 0x819   :  { %v3983_v43 = vpop.xlane.xlu0 %3982 }
 0x81a   :  { %v3985_v44 = vmul.f32 0.03125, %v3983_v43 }
 0x81c   :  { %v11339_v46 = vsub.f32 %v11332_v33, %v3985_v44 }
 0x81e   :  { %v3989_v36 = vmul.f32 %v11339_v46, %v11339_v46 }
 0x820   :  { %v3993_v47 = vsel %vm178_vm2, %v3989_v36, 0.0 }
 0x821   :  { %3994 = vadd.xlane.f32.xlu0 %v3993_v47 }
 0x87e   :  { %v3992_v52 = vpop.xlane.xlu1 %3991 }
 0x87f   :  { %v3996_v3 = vmul.f32 0.03125, %v3992_v52  ;;  %v11486_v52 = vld [vmem:[%s12223_s26 + $0x1] ss:$0 sm:$0xff] }
 0x881   :  { %v3998_v23 = vadd.f32 1e-05, %v3996_v3  ;;  %v8502_v3 = vld [vmem:[%s12198_s7 + $0x1a0] sm:$0xff] }
 0x883   :  { %10434 = vrsqrt.f32 %v3998_v23 }
 0x88d   :  { %v10435_v26 = vpop.eup %10434 }
 0x88e   :  { %v4002_v55 = vmul.f32 %v10435_v26, %v3986_v40  ;;  %v8503_v26 = vld [vmem:[%s12198_s7 + $0x1a8] sm:$0xff] }
 0x890   :  { %v4010_v9 = vmul.f32 %v8488_v53, %v4002_v55  ;;  %v8523_v55 = vld [vmem:[%s12198_s7 + $0x248] sm:$0xff] }
 0x892   :  { %v4018_v12 = vadd.f32 %v8489_v61, %v4010_v9 }
 0x894   :  { %9502 = vmatprep.mubr.msk.f32.mxu0 %vm178_vm2, %v4018_v12  ;;  %v11506_v12 = vpack.c.bf16 %v8503_v26, %v8502_v3  ;;  %v8528_v3 = vld [vmem:[%s12198_s7 + $0x270] sm:$0xff]  ;;  %v8534_v26 = vld [vmem:[%s12198_s7 + $0x2a0] sm:$0xff] }
 0x8ae   :  { %v3995_v11 = vpop.xlane.xlu0 %3994 }
 0x8af   :  { %v3997_v14 = vmul.f32 0.03125, %v3995_v11 }
 0x8b1   :  { %v3999_v5 = vadd.f32 1e-05, %v3997_v14  ;;  %v8504_v14 = vld [vmem:[%s12198_s7 + $0x1b0] sm:$0xff] }
 0x8b3   :  { %10436 = vrsqrt.f32 %v3999_v5 }
 0x8bd   :  { %v10437_v18 = vpop.eup %10436 }
 0x8be   :  { %v4003_v19 = vmul.f32 %v10437_v18, %v11339_v46 }
 0x8c0   :  { %v4011_v25 = vmul.f32 %v8488_v53, %v4003_v19  ;;  %v8522_v53 = vld [vmem:[%s12198_s7 + $0x240] sm:$0xff]  ;;  %v8505_v19 = vld [vmem:[%s12198_s7 + $0x1b8] sm:$0xff] }
 0x8c1   :  { %v11508_v11 = vpack.c.bf16 %v8523_v55, %v8522_v53  ;;  %v11531_v37 = vpack.c.bf16 %v8505_v19, %v8504_v14  ;;  %v8535_v53 = vld [vmem:[%s12198_s7 + $0x2a8] sm:$0xff] }
 0x8c2   :  { %v4019_v29 = vadd.f32 %v8489_v61, %v4011_v25  ;;  %v11503_v61 = vld [vmem:[%s12195_s4 + $0x1] ss:$0 sm:$0xff]  ;;  %v8524_v25 = vld [vmem:[%s12198_s7 + $0x250] sm:$0xff]  ;;  %v11714_v55 = vpack.c.bf16 %v8535_v53, %v8534_v26  ;;  %v8543_v19 = vld [vmem:[%s12198_s7 + $0x2e8] sm:$0xff] }
 0x8c4   :  { %9503 = vmatmul.mubr.msk.f32.vlgmr.msra.gmra.mrb[48].mxu0 %vm178_vm2, %v4019_v29  ;;  %v8525_v29 = vld [vmem:[%s12198_s7 + $0x258] sm:$0xff] }
 0x8c5   :  { %9548 = vmatprep.mubr.msk.f32.mxu0 %vm10509_vm3, %v10510_v62  ;;  %10199 = vmatpush3.bf16.msra.mxu0 %v11452_v4  ;;  %v11533_v30 = vpack.c.bf16 %v8525_v29, %v8524_v25  ;;  %v8544_v25 = vld [vmem:[%s12198_s7 + $0x2f0] sm:$0xff]  ;;  %v8545_v29 = vld [vmem:[%s12198_s7 + $0x2f8] sm:$0xff] }
 0x8c6   :  { %10200 = vmatprep.subr.bf16.mxu0 %v10508_v54 }
 0x8c9   :  { %10202 = vmatpush3.bf16.msra.mxu0 %v11472_v15 }
 0x8ca   :  { %10203 = vmatprep.subr.bf16.mxu0 %v10508_v54 }
 0x997   :  { %v9504_v32 = vpop.f32.mrb[48].mxu0 }
 0x998   :  { %v4109_v24 = vadd.f32 %v9504_v32, %v8490_v31  ;;  %v4103_v34 = vpop.f32.mrb[49].mxu0  ;;  %v8507_v32 = vld [vmem:[%s12198_s7 + $0x1c8] sm:$0xff] }
 0x999   :  { %v4104_v38 = vadd.f32 %v8490_v31, %v4103_v34  ;;  %v8506_v31 = vld [vmem:[%s12198_s7 + $0x1c0] sm:$0xff]  ;;  %v8531_v34 = vld [vmem:[%s12198_s7 + $0x288] sm:$0xff] }
 0x99a   :  { %v4113_v39 = vmax.f32 %v4109_v24, 0.0  ;;  %v8530_v24 = vld [vmem:[%s12198_s7 + $0x280] sm:$0xff] }
 0x99b   :  { %v4112_v40 = vmax.f32 %v4104_v38, 0.0 }
 0x99d   :  { %9537 = vmatprep.mubr.f32.mxu1 %v4112_v40  ;;  %v11555_v40 = vpack.c.bf16 %v8507_v32, %v8506_v31  ;;  %v8593_v32 = vld [vmem:[%s12199_s8 + $0x12] ss:$0 sm:$0xff] }
 0x99e   :  { %9538 = vmatmul.mubr.f32.vlgmr.msra.gmra.mrb[50].mxu1 %v4113_v39  ;;  %v11557_v39 = vpack.c.bf16 %v8531_v34, %v8530_v24 }
 0x99f   :  { %9592 = vmatprep.mubr.msk.f32.mxu1 %vm10509_vm3, %v10510_v62  ;;  %10223 = vmatpush3.bf16.msra.mxu1 %v11457_v7 }
 0x9a0   :  { %10224 = vmatprep.subr.bf16.mxu1 %v10508_v54 }
 0x9a3   :  { %10226 = vmatpush3.bf16.msra.mxu1 %v11477_v17 }
 0x9a4   :  { %10233 = vmatprep.subr.bf16.mxu1 %v10508_v54 }
 0xa71   :  { %v9539_v43 = vpop.f32.mrb[50].mxu1 }
 0xa72   :  { %v4209_v44 = vadd.f32 %v9539_v43, %v8493_v41  ;;  %v4203_v46 = vpop.f32.mrb[51].mxu1  ;;  %v8509_v43 = vld [vmem:[%s12198_s7 + $0x1d8] sm:$0xff] }
 0xa73   :  { %v4204_v36 = vadd.f32 %v8493_v41, %v4203_v46  ;;  %v8508_v41 = vld [vmem:[%s12198_s7 + $0x1d0] sm:$0xff]  ;;  %v8533_v46 = vld [vmem:[%s12198_s7 + $0x298] sm:$0xff] }
 0xa74   :  { %v11426_v47 = vadd.f32 %v4209_v44, %v11332_v33  ;;  %v8532_v44 = vld [vmem:[%s12198_s7 + $0x290] sm:$0xff] }
 0xa75   :  { %v11429_v48 = vadd.f32 %v4204_v36, %v11323_v59  ;;  %v11579_v36 = vpack.c.bf16 %v8509_v43, %v8508_v41  ;;  %v8589_v41 = vld [vmem:[%s12199_s8 + $0xe] ss:$0 sm:$0xff] }
 0xa76   :  { %v4221_v49 = vsel %vm178_vm2, %v11426_v47, 0.0 }
 0xa77   :  { %4222 = vadd.xlane.f32.xlu0 %v4221_v49  ;;  %v4218_v50 = vsel %vm178_vm2, %v11429_v48, 0.0  ;;  %v11581_v49 = vpack.c.bf16 %v8533_v46, %v8532_v44 }
 0xa78   :  { %4219 = vadd.xlane.f32.xlu1 %v4218_v50  ;;  %v8510_v50 = vld [vmem:[%s12198_s7 + $0x1e0] sm:$0xff] }
 0xb04   :  { %v4223_v51 = vpop.xlane.xlu0 %4222 }
 0xb05   :  { %v4225_v27 = vmul.f32 0.03125, %v4223_v51  ;;  %v4220_v28 = vpop.xlane.xlu1 %4219  ;;  %v8511_v51 = vld [vmem:[%s12198_s7 + $0x1e8] sm:$0xff] }
 0xb06   :  { %v4224_v56 = vmul.f32 0.03125, %v4220_v28  ;;  %v8539_v28 = vld [vmem:[%s12198_s7 + $0x2c8] sm:$0xff] }
 0xb07   :  { %v11436_v57 = vsub.f32 %v11426_v47, %v4225_v27  ;;  %v8538_v27 = vld [vmem:[%s12198_s7 + $0x2c0] sm:$0xff] }
 0xb08   :  { %v4226_v33 = vsub.f32 %v11429_v48, %v4224_v56  ;;  %v11603_v56 = vpack.c.bf16 %v8511_v51, %v8510_v50 }
 0xb09   :  { %v4229_v59 = vmul.f32 %v11436_v57, %v11436_v57 }
 0xb0a   :  { %v4228_v58 = vmul.f32 %v4226_v33, %v4226_v33 }
 0xb0b   :  { %v4233_v60 = vsel %vm178_vm2, %v4229_v59, 0.0  ;;  %v8512_v59 = vld [vmem:[%s12198_s7 + $0x1f0] sm:$0xff] }
 0xb0c   :  { %4234 = vadd.xlane.f32.xlu0 %v4233_v60  ;;  %v4230_v63 = vsel %vm178_vm2, %v4228_v58, 0.0  ;;  %v8513_v58 = vld [vmem:[%s12198_s7 + $0x1f8] sm:$0xff]  ;;  %v8540_v60 = vld [vmem:[%s12198_s7 + $0x2d0] sm:$0xff] }
 0xb0d   :  { %4231 = vadd.xlane.f32.xlu1 %v4230_v63  ;;  %v8541_v63 = vld [vmem:[%s12198_s7 + $0x2d8] sm:$0xff]  ;;  %v11627_v0 = vpack.c.bf16 %v8513_v58, %v8512_v59  ;;  %v8588_v58 = vld [vmem:[%s12199_s8 + $0xd] ss:$0 sm:$0xff] }
 0xb0e   :  { %v11629_v1 = vpack.c.bf16 %v8541_v63, %v8540_v60 }
 0xb99   :  { %v4235_v5 = vpop.xlane.xlu0 %4234 }
 0xb9a   :  { %v4232_v45 = vpop.xlane.xlu1 %4231  ;;  %v4237_v35 = vmul.f32 0.03125, %v4235_v5  ;;  %v8542_v5 = vld [vmem:[%s12198_s7 + $0x2e0] sm:$0xff] }
 0xb9b   :  { %v4236_v20 = vmul.f32 0.03125, %v4232_v45  ;;  %v8521_v45 = vld [vmem:[%s12198_s7 + $0x238] sm:$0xff] }
 0xb9c   :  { %v4239_v38 = vadd.f32 1e-05, %v4237_v35  ;;  %v8587_v35 = vld [vmem:[%s12199_s8 + $0xc] ss:$0 sm:$0xff] }
 0xb9d   :  { %v4238_v21 = vadd.f32 1e-05, %v4236_v20 }
 0xb9f   :  { %10438 = vrsqrt.f32 %v4238_v21  ;;  %v8526_v21 = vld [vmem:[%s12198_s7 + $0x260] sm:$0xff] }
 0xba0   :  { %10440 = vrsqrt.f32 %v4239_v38 }
 0xba9   :  { %v10439_v22 = vpop.eup %10438 }
 0xbaa   :  { %v4242_v23 = vmul.f32 %v10439_v22, %v4226_v33  ;;  %v11605_v33 = vpack.c.bf16 %v8539_v28, %v8538_v27  ;;  %v10441_v8 = vpop.eup %10440  ;;  %v8527_v22 = vld [vmem:[%s12198_s7 + $0x268] sm:$0xff] }
 0xbab   :  { %v4243_v13 = vmul.f32 %v10441_v8, %v11436_v57  ;;  %v11662_v57 = vpack.c.bf16 %v8521_v45, %v8520_v16 }
 0xbac   :  { %v4250_v9 = vmul.f32 %v11486_v52, %v4242_v23  ;;  %v8529_v23 = vld [vmem:[%s12198_s7 + $0x278] sm:$0xff] }
 0xbad   :  { %v4251_v20 = vmul.f32 %v11486_v52, %v4243_v13 }
 0xbae   :  { %v11514_v18 = vadd.f32 %v11503_v61, %v4250_v9  ;;  %v8537_v9 = vld [vmem:[%s12198_s7 + $0x2b8] sm:$0xff] }
 0xbaf   :  { %v11682_v52 = vadd.f32 %v11503_v61, %v4251_v20  ;;  %v8536_v61 = vld [vmem:[%s12198_s7 + $0x2b0] sm:$0xff] }
 0xbb0   :  { %9549 = vmatmul.mubr.msk.f32.vlgmr.msra.gmra.mrb[50].mxu0 %vm178_vm2, %v11514_v18  ;;  %9593 = vmatmul.mubr.msk.f32.vlgmr.msra.gmra.mrb[52].mxu1 %vm178_vm2, %v11514_v18  ;;  %v11730_v14 = vpack.c.bf16 %v8537_v9, %v8536_v61  ;;  %v8595_v61 = vld [vmem:[%s12199_s8 + $0x14] ss:$0 sm:$0xff] }
 0xbb1   :  { %10205 = vmatpush3.bf16.msra.mxu0 %v11506_v12  ;;  %10235 = vmatpush3.bf16.msra.mxu1 %v11508_v11 }
 0xbb2   :  { %10206 = vmatprep.subr.bf16.mxu0 %v10508_v54  ;;  %10236 = vmatprep.subr.bf16.mxu1 %v10508_v54 }
 0xbb3   :  { %9559 = vmatprep.mubr.msk.f32.mxu0 %vm10509_vm3, %v10510_v62  ;;  %9614 = vmatprep.mubr.msk.f32.mxu1 %vm10509_vm3, %v10510_v62 }
 0xbb5   :  { %10208 = vmatpush3.bf16.msra.mxu0 %v11531_v37  ;;  %10238 = vmatpush3.bf16.msra.mxu1 %v11533_v30 }
 0xbb6   :  { %10209 = vmatprep.subr.bf16.mxu0 %v10508_v54  ;;  %10245 = vmatprep.subr.bf16.mxu1 %v10508_v54 }
 0xbb8   :  { %9560 = vmatmul.mubr.msk.f32.vlgmr.msra.gmra.mrb[52].mxu0 %vm178_vm2, %v11514_v18  ;;  %9615 = vmatmul.mubr.msk.f32.vlgmr.msra.gmra.mrb[54].mxu1 %vm178_vm2, %v11514_v18 }
 0xbb9   :  { %10211 = vmatpush3.bf16.msra.mxu0 %v11555_v40  ;;  %10247 = vmatpush3.bf16.msra.mxu1 %v11557_v39 }
 0xbba   :  { %10212 = vmatprep.subr.bf16.mxu0 %v10508_v54  ;;  %10248 = vmatprep.subr.bf16.mxu1 %v10508_v54 }
 0xbbb   :  { %9570 = vmatprep.mubr.msk.f32.mxu0 %vm10509_vm3, %v10510_v62  ;;  %9636 = vmatprep.mubr.msk.f32.mxu1 %vm10509_vm3, %v10510_v62 }
 0xbbd   :  { %10214 = vmatpush3.bf16.msra.mxu0 %v11579_v36  ;;  %10250 = vmatpush3.bf16.msra.mxu1 %v11581_v49 }
 0xbbe   :  { %10215 = vmatprep.subr.bf16.mxu0 %v10508_v54  ;;  %10257 = vmatprep.subr.bf16.mxu1 %v10508_v54 }
 0xbc0   :  { %9571 = vmatmul.mubr.msk.f32.vlgmr.msra.gmra.mrb[54].mxu0 %vm178_vm2, %v11514_v18  ;;  %9637 = vmatmul.mubr.msk.f32.vlgmr.msra.gmra.mrb[56].mxu1 %vm178_vm2, %v11514_v18 }
 0xbc1   :  { %10217 = vmatpush3.bf16.msra.mxu0 %v11603_v56  ;;  %10259 = vmatpush3.bf16.msra.mxu1 %v11605_v33 }
 0xbc2   :  { %10218 = vmatprep.subr.bf16.mxu0 %v10508_v54  ;;  %10260 = vmatprep.subr.bf16.mxu1 %v10508_v54 }
 0xbc3   :  { %9581 = vmatprep.mubr.msk.f32.mxu0 %vm10509_vm3, %v10510_v62  ;;  %9658 = vmatprep.mubr.msk.f32.mxu1 %vm10509_vm3, %v10510_v62 }
 0xbc5   :  { %10220 = vmatpush3.bf16.msra.mxu0 %v11627_v0  ;;  %10262 = vmatpush3.bf16.msra.mxu1 %v11629_v1 }
 0xbc6   :  { %10227 = vmatprep.subr.bf16.mxu0 %v10508_v54  ;;  %10269 = vmatprep.subr.bf16.mxu1 %v10508_v54 }
 0xbc8   :  { %9582 = vmatmul.mubr.msk.f32.vlgmr.msra.gmra.mrb[56].mxu0 %vm178_vm2, %v11514_v18  ;;  %9659 = vmatmul.mubr.msk.f32.vlgmr.msra.gmra.mrb[58].mxu1 %vm178_vm2, %v11514_v18 }
 0xbc9   :  { %10229 = vmatpush3.bf16.msra.mxu0 %v11645_v10  ;;  %10271 = vmatpush3.bf16.msra.mxu1 %v11452_v4  ;;  %v11679_v4 = vpack.c.bf16 %v8527_v22, %v8526_v21 }
 0xbca   :  { %10230 = vmatprep.subr.bf16.mxu0 %v10508_v54  ;;  %10272 = vmatprep.subr.bf16.mxu1 %v10508_v54 }
 0xbcb   :  { %9603 = vmatprep.mubr.msk.f32.mxu0 %vm10509_vm3, %v10510_v62  ;;  %9680 = vmatprep.mubr.msk.f32.mxu1 %vm10509_vm3, %v10510_v62 }
 0xbcd   :  { %10232 = vmatpush3.bf16.msra.mxu0 %v11662_v57  ;;  %10274 = vmatpush3.bf16.msra.mxu1 %v11472_v15  ;;  %v11698_v15 = vpack.c.bf16 %v8529_v23, %v8528_v3 }
 0xbce   :  { %10239 = vmatprep.subr.bf16.mxu0 %v10508_v54  ;;  %10281 = vmatprep.subr.bf16.mxu1 %v10508_v54 }
 0xbd0   :  { %9604 = vmatmul.mubr.msk.f32.vlgmr.msra.gmra.mrb[58].mxu0 %vm178_vm2, %v11514_v18  ;;  %9681 = vmatmul.mubr.msk.f32.vlgmr.msra.gmra.mrb[60].mxu1 %vm178_vm2, %v11682_v52 }
 0xbd1   :  { %10241 = vmatpush3.bf16.msra.mxu0 %v11679_v4  ;;  %10283 = vmatpush3.bf16.msra.mxu1 %v11555_v40 }
 0xbd2   :  { %10242 = vmatprep.subr.bf16.mxu0 %v10508_v54  ;;  %10284 = vmatprep.subr.bf16.mxu1 %v10508_v54 }
 0xbd3   :  { %9625 = vmatprep.mubr.msk.f32.mxu0 %vm10509_vm3, %v10510_v62  ;;  %9702 = vmatprep.mubr.msk.f32.mxu1 %vm10509_vm3, %v10510_v62 }
 0xbd5   :  { %10244 = vmatpush3.bf16.msra.mxu0 %v11698_v15  ;;  %10286 = vmatpush3.bf16.msra.mxu1 %v11579_v36 }
 0xbd6   :  { %10251 = vmatprep.subr.bf16.mxu0 %v10508_v54  ;;  %10293 = vmatprep.subr.bf16.mxu1 %v10508_v54 }
 0xbd8   :  { %9626 = vmatmul.mubr.msk.f32.vlgmr.msra.gmra.mrb[60].mxu0 %vm178_vm2, %v11514_v18  ;;  %9703 = vmatmul.mubr.msk.f32.vlgmr.msra.gmra.mrb[62].mxu1 %vm178_vm2, %v11682_v52 }
 0xbd9   :  { %10253 = vmatpush3.bf16.msra.mxu0 %v11714_v55  ;;  %10295 = vmatpush3.bf16.msra.mxu1 %v11457_v7  ;;  %v11746_v7 = vpack.c.bf16 %v8543_v19, %v8542_v5 }
 0xbda   :  { %10254 = vmatprep.subr.bf16.mxu0 %v10508_v54  ;;  %10296 = vmatprep.subr.bf16.mxu1 %v10508_v54 }
 0xbdb   :  { %9647 = vmatprep.mubr.msk.f32.mxu0 %vm10509_vm3, %v10510_v62  ;;  %9724 = vmatprep.mubr.msk.f32.mxu1 %vm10509_vm3, %v10510_v62 }
 0xbdd   :  { %10256 = vmatpush3.bf16.msra.mxu0 %v11730_v14  ;;  %10298 = vmatpush3.bf16.msra.mxu1 %v11477_v17  ;;  %v10267_v17 = vpack.c.bf16 %v8545_v29, %v8544_v25 }
 0xbde   :  { %10263 = vmatprep.subr.bf16.mxu0 %v10508_v54  ;;  %10305 = vmatprep.subr.bf16.mxu1 %v10508_v54 }
 0xbe0   :  { %9648 = vmatmul.mubr.msk.f32.vlgmr.msra.gmra.mrb[62].mxu0 %vm178_vm2, %v11514_v18  ;;  %9725 = vmatmul.mubr.msk.f32.vlgmr.msra.gmra.mrb[64].mxu1 %vm178_vm2, %v11682_v52 }
 0xbe1   :  { %10265 = vmatpush3.bf16.msra.mxu0 %v11746_v7  ;;  %10307 = vmatpush3.bf16.msra.mxu1 %v11508_v11 }
 0xbe2   :  { %10266 = vmatprep.subr.bf16.mxu0 %v10508_v54  ;;  %10308 = vmatprep.subr.bf16.mxu1 %v10508_v54 }
 0xbe3   :  { %9669 = vmatprep.mubr.msk.f32.mxu0 %vm10509_vm3, %v10510_v62  ;;  %9746 = vmatprep.mubr.msk.f32.mxu1 %vm10509_vm3, %v10510_v62 }
 0xbe5   :  { %10268 = vmatpush3.bf16.msra.mxu0 %v10267_v17  ;;  %10310 = vmatpush3.bf16.msra.mxu1 %v11533_v30 }
 0xbe6   :  { %10275 = vmatprep.subr.bf16.mxu0 %v10508_v54  ;;  %10317 = vmatprep.subr.bf16.mxu1 %v10508_v54 }
 0xbe8   :  { %9670 = vmatmul.mubr.msk.f32.vlgmr.msra.gmra.mrb[64].mxu0 %vm178_vm2, %v11514_v18  ;;  %9747 = vmatmul.mubr.msk.f32.vlgmr.msra.gmra.mrb[66].mxu1 %vm178_vm2, %v11682_v52 }
 0xbe9   :  { %10277 = vmatpush3.bf16.msra.mxu0 %v11506_v12  ;;  %10319 = vmatpush3.bf16.msra.mxu1 %v11557_v39  ;;  %v8591_v12 = vld [vmem:[%s12199_s8 + $0x10] ss:$0 sm:$0xff] }
 0xbea   :  { %10278 = vmatprep.subr.bf16.mxu0 %v10508_v54  ;;  %10320 = vmatprep.subr.bf16.mxu1 %v10508_v54 }
 0xbeb   :  { %9691 = vmatprep.mubr.msk.f32.mxu0 %vm10509_vm3, %v10510_v62  ;;  %9768 = vmatprep.mubr.msk.f32.mxu1 %vm10509_vm3, %v10510_v62 }
 0xbed   :  { %10280 = vmatpush3.bf16.msra.mxu0 %v11531_v37  ;;  %10322 = vmatpush3.bf16.msra.mxu1 %v11581_v49 }
 0xbee   :  { %10287 = vmatprep.subr.bf16.mxu0 %v10508_v54  ;;  %10329 = vmatprep.subr.bf16.mxu1 %v10508_v54 }
 0xbf0   :  { %9692 = vmatmul.mubr.msk.f32.vlgmr.msra.gmra.mrb[66].mxu0 %vm178_vm2, %v11682_v52  ;;  %9769 = vmatmul.mubr.msk.f32.vlgmr.msra.gmra.mrb[68].mxu1 %vm178_vm2, %v11682_v52 }
 0xbf1   :  { %10289 = vmatpush3.bf16.msra.mxu0 %v11603_v56  ;;  %10331 = vmatpush3.bf16.msra.mxu1 %v11605_v33  ;;  %v8592_v56 = vld [vmem:[%s12199_s8 + $0x11] ss:$0 sm:$0xff] }
 0xbf2   :  { %10290 = vmatprep.subr.bf16.mxu0 %v10508_v54  ;;  %10332 = vmatprep.subr.bf16.mxu1 %v10508_v54 }
 0xbf3   :  { %9713 = vmatprep.mubr.msk.f32.mxu0 %vm10509_vm3, %v10510_v62  ;;  %9790 = vmatprep.mubr.msk.f32.mxu1 %vm10509_vm3, %v10510_v62 }
 0xbf5   :  { %10292 = vmatpush3.bf16.msra.mxu0 %v11627_v0  ;;  %10334 = vmatpush3.bf16.msra.mxu1 %v11629_v1 }
 0xbf6   :  { %10299 = vmatprep.subr.bf16.mxu0 %v10508_v54  ;;  %9804 = vmatprep.subr.mxu1 %v10510_v62 }
 0xbf8   :  { %9714 = vmatmul.mubr.msk.f32.vlgmr.msra.gmra.mrb[68].mxu0 %vm178_vm2, %v11682_v52  ;;  %9791 = vmatmul.mubr.msk.f32.vlgmr.msra.gmra.mrb[70].mxu1 %vm178_vm2, %v11682_v52 }
 0xbf9   :  { %10301 = vmatpush3.bf16.msra.mxu0 %v11645_v10  ;;  %9735 = vmatprep.mubr.msk.f32.mxu0 %vm10509_vm3, %v10510_v62  ;;  %v8590_v10 = vld [vmem:[%s12199_s8 + $0xf] ss:$0 sm:$0xff] }
 0xbfa   :  { %10302 = vmatprep.subr.bf16.mxu0 %v10508_v54  ;;  %9806 = vmatprep.mubr.msk.f32.mxu1 %vm10509_vm3, %v10510_v62 }
 0xbfd   :  { %10304 = vmatpush3.bf16.msra.mxu0 %v11662_v57 }
 0xbfe   :  { %10311 = vmatprep.subr.bf16.mxu0 %v10508_v54 }
 0xc00   :  { %9736 = vmatmul.mubr.msk.f32.vlgmr.msra.gmra.mrb[70].mxu0 %vm178_vm2, %v11682_v52 }
 0xc01   :  { %10313 = vmatpush3.bf16.msra.mxu0 %v11679_v4  ;;  %9757 = vmatprep.mubr.msk.f32.mxu0 %vm10509_vm3, %v10510_v62 }
 0xc02   :  { %10314 = vmatprep.subr.bf16.mxu0 %v10508_v54 }
 0xc05   :  { %10316 = vmatpush3.bf16.msra.mxu0 %v11698_v15 }
 0xc06   :  { %10323 = vmatprep.subr.bf16.mxu0 %v10508_v54 }
 0xc08   :  { %9758 = vmatmul.mubr.msk.f32.vlgmr.msra.gmra.mrb[72].mxu0 %vm178_vm2, %v11682_v52 }
 0xc09   :  { %10325 = vmatpush3.bf16.msra.mxu0 %v11714_v55  ;;  %9779 = vmatprep.mubr.msk.f32.mxu0 %vm10509_vm3, %v10510_v62 }
 0xc0a   :  { %10326 = vmatprep.subr.bf16.mxu0 %v10508_v54 }
 0xc0d   :  { %10328 = vmatpush3.bf16.msra.mxu0 %v11730_v14 }
 0xc0e   :  { %10335 = vmatprep.subr.bf16.mxu0 %v10508_v54 }
 0xc10   :  { %9780 = vmatmul.mubr.msk.f32.vlgmr.msra.gmra.mrb[74].mxu0 %vm178_vm2, %v11682_v52 }
 0xc11   :  { %10337 = vmatpush3.bf16.msra.mxu0 %v11746_v7  ;;  %9801 = vmatprep.mubr.msk.f32.mxu0 %vm10509_vm3, %v10510_v62 }
 0xc12   :  { %10338 = vmatprep.subr.bf16.mxu0 %v10508_v54 }
 0xc15   :  { %10340 = vmatpush3.bf16.msra.mxu0 %v10267_v17 }
 0xc16   :  { %9814 = vmatprep.subr.mxu0 %v10510_v62 }
 0xc18   :  { %9802 = vmatmul.mubr.msk.f32.vlgmr.msra.gmra.mrb[76].mxu0 %vm178_vm2, %v11682_v52 }
 0xc19   :  { %9816 = vmatprep.mubr.msk.f32.mxu0 %vm10509_vm3, %v10510_v62 }
 0xc83   :  { %v4398_v11 = vpop.f32.mrb[50].mxu0  ;;  %v4678_v18 = vpop.f32.mrb[52].mxu1 }
 0xc84   :  { %v6091_v54 = vadd.f32 %v8591_v12, %v4678_v18  ;;  %v9550_v37 = vpop.f32.mrb[51].mxu0  ;;  %v9594_v30 = vpop.f32.mrb[53].mxu1  ;;  %v6087_v31 = vadd.f32 %v8587_v35, %v4398_v11 }
 0xc86   :  { %9805 = vmatpush3.xpose.msk.msra.mxu1 %vm2069_vm4, %v6091_v54 }
 0xc87   :  { %9809 = vmatprep.subr.mxu1 %v10510_v62 }
 0xc89   :  { %9807 = vmatmul.mubr.msk.f32.vlgmr.msra.gmra.mrb[72].mxu1 %vm2069_vm4, %v6087_v31 }
 0xc8a   :  { %9811 = vmatprep.mubr.msk.f32.mxu1 %vm10509_vm3, %v10510_v62 }
 0xc8b   :  { %v4468_v24 = vpop.f32.mrb[52].mxu0  ;;  %v4818_v34 = vpop.f32.mrb[54].mxu1 }
 0xc8c   :  { %v6093_v38 = vadd.f32 %v8593_v32, %v4818_v34  ;;  %v9561_v40 = vpop.f32.mrb[53].mxu0  ;;  %v9616_v39 = vpop.f32.mrb[55].mxu1  ;;  %v6088_v1 = vadd.f32 %v8588_v58, %v4468_v24  ;;  %v8596_v34 = vld [vmem:[%s12199_s8 + $0x15] ss:$0 sm:$0xff] }
 0xc8e   :  { %9815 = vmatpush3.xpose.msk.msra.mxu0 %vm2069_vm4, %v6093_v38 }
 0xc8f   :  { %9824 = vmatprep.subr.mxu0 %v10510_v62 }
 0xc93   :  { %v4538_v43 = vpop.f32.mrb[54].mxu0  ;;  %v4958_v44 = vpop.f32.mrb[56].mxu1 }
 0xc94   :  { %v6089_v46 = vadd.f32 %v8589_v41, %v4538_v43  ;;  %v9572_v36 = vpop.f32.mrb[55].mxu0  ;;  %v9638_v49 = vpop.f32.mrb[57].mxu1  ;;  %v6095_v14 = vadd.f32 %v8595_v61, %v4958_v44 }
 0xc96   :  { %9817 = vmatmul.mubr.msk.f32.vlgmr.msra.gmra.mrb[78].mxu0 %vm2069_vm4, %v6089_v46 }
 0xc97   :  { %9826 = vmatprep.mubr.msk.f32.mxu0 %vm10509_vm3, %v10510_v62 }
 0xc9b   :  { %v4608_v50 = vpop.f32.mrb[56].mxu0  ;;  %v11864_v51 = vpop.f32.mrb[58].mxu1 }
 0xc9c   :  { %v9583_v27 = vpop.f32.mrb[57].mxu0  ;;  %v9660_v28 = vpop.f32.mrb[59].mxu1  ;;  %v6090_v57 = vadd.f32 %v8590_v10, %v4608_v50 }
 0xca3   :  { %v4748_v33 = vpop.f32.mrb[58].mxu0  ;;  %v5241_v59 = vpop.f32.mrb[60].mxu1 }
 0xca4   :  { %v6092_v60 = vadd.f32 %v8592_v56, %v4748_v33  ;;  %v9605_v63 = vpop.f32.mrb[59].mxu0  ;;  %v9682_v0 = vpop.f32.mrb[61].mxu1  ;;  %v6099_v3 = vadd.f32 %v8587_v35, %v5241_v59 }
 0xca6   :  { %9810 = vmatpush3.xpose.msk.msra.mxu1 %vm2069_vm4, %v6092_v60 }
 0xca7   :  { %9819 = vmatprep.subr.mxu1 %v10510_v62 }
 0xca9   :  { %9812 = vmatmul.mubr.msk.f32.vlgmr.msra.gmra.mrb[74].mxu1 %vm2069_vm4, %v6088_v1 }
 0xcaa   :  { %9821 = vmatprep.mubr.msk.f32.mxu1 %vm10509_vm3, %v10510_v62 }
 0xcab   :  { %v4888_v6 = vpop.f32.mrb[60].mxu0  ;;  %v5381_v8 = vpop.f32.mrb[62].mxu1 }
 0xcac   :  { %v6094_v13 = vadd.f32 %v8594_v2, %v4888_v6  ;;  %v9627_v16 = vpop.f32.mrb[61].mxu0  ;;  %v9704_v45 = vpop.f32.mrb[63].mxu1  ;;  %v6101_v9 = vadd.f32 %v8589_v41, %v5381_v8 }
 0xcae   :  { %9820 = vmatpush3.xpose.msk.msra.mxu1 %vm2069_vm4, %v6094_v13 }
 0xcaf   :  { %9829 = vmatprep.subr.mxu1 %v10510_v62 }
 0xcb1   :  { %9822 = vmatmul.mubr.msk.f32.vlgmr.msra.gmra.mrb[76].mxu1 %vm2069_vm4, %v6090_v57 }
 0xcb2   :  { %9831 = vmatprep.mubr.msk.f32.mxu1 %vm10509_vm3, %v10510_v62 }
 0xcb3   :  { %v5028_v20 = vpop.f32.mrb[62].mxu0  ;;  %v5521_v21 = vpop.f32.mrb[64].mxu1 }
 0xcb4   :  { %v6103_v22 = vadd.f32 %v8591_v12, %v5521_v21  ;;  %v9649_v4 = vpop.f32.mrb[63].mxu0  ;;  %v9726_v52 = vpop.f32.mrb[65].mxu1  ;;  %v6096_v40 = vadd.f32 %v8596_v34, %v5028_v20 }
 0xcb6   :  { %9825 = vmatpush3.xpose.msk.msra.mxu0 %vm2069_vm4, %v6103_v22 }
 0xcb7   :  { %9834 = vmatprep.subr.mxu0 %v10510_v62 }
 0xcb9   :  { %9827 = vmatmul.mubr.msk.f32.vlgmr.msra.gmra.mrb[80].mxu0 %vm2069_vm4, %v6099_v3 }
 0xcba   :  { %9836 = vmatprep.mubr.msk.f32.mxu0 %vm10509_vm3, %v10510_v62 }
 0xcbb   :  { %v11893_v23 = vpop.f32.mrb[64].mxu0  ;;  %v5661_v15 = vpop.f32.mrb[66].mxu1 }
 0xcbc   :  { %v6105_v26 = vadd.f32 %v8593_v32, %v5661_v15  ;;  %v9671_v53 = vpop.f32.mrb[65].mxu0  ;;  %v9748_v55 = vpop.f32.mrb[67].mxu1 }
 0xcbe   :  { %9835 = vmatpush3.xpose.msk.msra.mxu0 %vm2069_vm4, %v6105_v26 }
 0xcbf   :  { %9844 = vmatprep.subr.mxu0 %v10510_v62 }
 0xcc1   :  { %9837 = vmatmul.mubr.msk.f32.vlgmr.msra.gmra.mrb[82].mxu0 %vm2069_vm4, %v6101_v9 }
 0xcc2   :  { %9845 = vmatpush3.msra.mxu0 %v6095_v14  ;;  %9846 = vmatprep.mubr.msk.f32.mxu0 %vm10509_vm3, %v10510_v62 }
 0xcc3   :  { %v5311_v5 = vpop.f32.mrb[66].mxu0  ;;  %v5801_v19 = vpop.f32.mrb[68].mxu1  ;;  %9854 = vmatprep.subr.mxu0 %v10510_v62 }
 0xcc4   :  { %v11904_v7 = vadd.f32 %v8595_v61, %v5801_v19  ;;  %v9693_v25 = vpop.f32.mrb[67].mxu0  ;;  %v9770_v29 = vpop.f32.mrb[69].mxu1  ;;  %v6100_v30 = vadd.f32 %v8588_v58, %v5311_v5 }
 0xccb   :  { %v5451_v17 = vpop.f32.mrb[68].mxu0  ;;  %v11906_v12 = vpop.f32.mrb[70].mxu1 }
 0xccc   :  { %v9715_v11 = vpop.f32.mrb[69].mxu0  ;;  %v9792_v18 = vpop.f32.mrb[71].mxu1  ;;  %v6102_v38 = vadd.f32 %v8590_v10, %v5451_v17 }
 0xcd3   :  { %v5591_v35 = vpop.f32.mrb[70].mxu0 }
 0xcd4   :  { %v6104_v54 = vadd.f32 %v8592_v56, %v5591_v35  ;;  %v9737_v37 = vpop.f32.mrb[71].mxu0 }
 0xcd6   :  { %9830 = vmatpush3.xpose.msk.msra.mxu1 %vm2069_vm4, %v6104_v54 }
 0xcd7   :  { %9839 = vmatprep.subr.mxu1 %v10510_v62 }
 0xcd9   :  { %9832 = vmatmul.mubr.msk.f32.vlgmr.msra.gmra.mrb[78].mxu1 %vm2069_vm4, %v6100_v30 }
 0xcda   :  { %9841 = vmatprep.mubr.msk.f32.mxu1 %vm10509_vm3, %v10510_v62 }
 0xcdb   :  { %v5731_v31 = vpop.f32.mrb[72].mxu0 }
 0xcdc   :  { %v6106_v32 = vadd.f32 %v8594_v2, %v5731_v31  ;;  %v9759_v24 = vpop.f32.mrb[73].mxu0 }
 0xcde   :  { %9840 = vmatpush3.xpose.msk.msra.mxu1 %vm2069_vm4, %v6106_v32 }
 0xcdf   :  { %9849 = vmatprep.subr.mxu1 %v10510_v62 }
 0xce1   :  { %9842 = vmatmul.mubr.msk.f32.vlgmr.msra.gmra.mrb[80].mxu1 %vm2069_vm4, %v6102_v38 }
 0xce2   :  { %9850 = vmatpush3.msra.mxu1 %v6096_v40  ;;  %9851 = vmatprep.mubr.msk.f32.mxu1 %vm10509_vm3, %v10510_v62 }
 0xce3   :  { %v5871_v39 = vpop.f32.mrb[74].mxu0  ;;  %9859 = vmatprep.subr.mxu1 %v10510_v62 }
 0xce4   :  { %v11922_v41 = vadd.f32 %v8596_v34, %v5871_v39  ;;  %v9781_v43 = vpop.f32.mrb[75].mxu0 }
 0xceb   :  { %v11924_v44 = vpop.f32.mrb[76].mxu0 }
 0xcec   :  { %v9803_v46 = vpop.f32.mrb[77].mxu0 }
 0xd5c   :  { %v6183_v36 = vpop.f32.mrb[72].mxu1 }
 0xd5d   :  { %v6719_v49 = vmul.f32 0.35355338, %v6183_v36  ;;  %v9808_v50 = vpop.f32.mrb[73].mxu1 }
 0xd5f   :  { %v6727_v27 = vsel %vm11187_vm5, %v6719_v49, -1e+30 }
 0xd60   :  { %v6735_v28 = vsel %vm2069_vm4, %v6727_v27, -inf }
 0xd61   :  { %6736 = vmax.xlane.f32.xlu1 %v6735_v28 }
 0xd69   :  { %v6335_v56 = vpop.f32.mrb[78].mxu0 }
 0xd6a   :  { %v6721_v33 = vmul.f32 0.35355338, %v6335_v56  ;;  %v9818_v59 = vpop.f32.mrb[79].mxu0 }
 0xd6c   :  { %v6729_v58 = vsel %vm11187_vm5, %v6721_v33, -1e+30 }
 0xd6d   :  { %v6741_v60 = vsel %vm2069_vm4, %v6729_v58, -inf }
 0xd6e   :  { %6742 = vmax.xlane.f32.xlu1 %v6741_v60 }
 0xd7c   :  { %v6259_v63 = vpop.f32.mrb[74].mxu1 }
 0xd7d   :  { %v6720_v0 = vmul.f32 0.35355338, %v6259_v63  ;;  %v9813_v1 = vpop.f32.mrb[75].mxu1 }
 0xd7f   :  { %v6728_v2 = vsel %vm11187_vm5, %v6720_v0, -1e+30 }
 0xd80   :  { %v6738_v6 = vsel %vm2069_vm4, %v6728_v2, -inf }
 0xd81   :  { %6739 = vmax.xlane.f32.xlu0 %v6738_v6 }
 0xd84   :  { %v6411_v8 = vpop.f32.mrb[76].mxu1 }
 0xd85   :  { %v6722_v10 = vmul.f32 0.35355338, %v6411_v8  ;;  %v9823_v13 = vpop.f32.mrb[77].mxu1 }
 0xd87   :  { %v6730_v16 = vsel %vm11187_vm5, %v6722_v10, -1e+30 }
 0xd88   :  { %v6744_v45 = vsel %vm2069_vm4, %v6730_v16, -inf }
 0xd89   :  { %6745 = vmax.xlane.f32.xlu0 %v6744_v45 }
 0xd8c   :  { %v6487_v57 = vpop.f32.mrb[80].mxu0 }
 0xd8d   :  { %v6723_v20 = vmul.f32 0.35355338, %v6487_v57  ;;  %v9828_v21 = vpop.f32.mrb[81].mxu0 }
 0xd8f   :  { %v6731_v22 = vsel %vm11187_vm5, %v6723_v20, -1e+30 }
 0xd90   :  { %v6747_v4 = vsel %vm2069_vm4, %v6731_v22, -inf }
 0xd91   :  { %6748 = vmax.xlane.f32.xlu1 %v6747_v4 }
 0xd94   :  { %v6639_v52 = vpop.f32.mrb[82].mxu0 }
 0xd95   :  { %v6725_v3 = vmul.f32 0.35355338, %v6639_v52  ;;  %v9838_v15 = vpop.f32.mrb[83].mxu0 }
 0xd97   :  { %v6733_v26 = vsel %vm11187_vm5, %v6725_v3, -1e+30  ;;  %v8597_v3 = vld [vmem:[%s12199_s8 + $0x16] ss:$0 sm:$0xff] }
 0xd98   :  { %v6753_v53 = vsel %vm2069_vm4, %v6733_v26, -inf }
 0xd99   :  { %6754 = vmax.xlane.f32.xlu1 %v6753_v53  ;;  %v6097_v53 = vadd.f32 %v8597_v3, %v11864_v51 }
 0xdac   :  { %v6563_v55 = vpop.f32.mrb[78].mxu1 }
 0xdad   :  { %v6724_v61 = vmul.f32 0.35355338, %v6563_v55  ;;  %v9833_v9 = vpop.f32.mrb[79].mxu1 }
 0xdaf   :  { %v6732_v14 = vsel %vm11187_vm5, %v6724_v61, -1e+30 }
 0xdb0   :  { %v6750_v5 = vsel %vm2069_vm4, %v6732_v14, -inf }
 0xdb1   :  { %6751 = vmax.xlane.f32.xlu0 %v6750_v5  ;;  %v8598_v5 = vld [vmem:[%s12199_s8 + $0x17] ss:$0 sm:$0xff] }
 0xdb4   :  { %v6715_v19 = vpop.f32.mrb[80].mxu1 }
 0xdb5   :  { %v6726_v25 = vmul.f32 0.35355338, %v6715_v19  ;;  %v9843_v29 = vpop.f32.mrb[81].mxu1 }
 0xdb6   :  { %v6098_v29 = vadd.f32 %v8598_v5, %v11893_v23 }
 0xdb7   :  { %v6734_v17 = vsel %vm11187_vm5, %v6726_v25, -1e+30 }
 0xdb8   :  { %v6756_v11 = vsel %vm2069_vm4, %v6734_v17, -inf }
 0xdb9   :  { %6757 = vmax.xlane.f32.xlu0 %v6756_v11 }
 0xdee   :  { %v6737_v18 = vpop.xlane.xlu1 %6736 }
 0xdef   :  { %v6759_v35 = vsub.f32 %v6727_v27, %v6737_v18 }
 0xdf1   :  { %v6767_v54 = vmul.f32 1.442695, %v6759_v35 }
 0xdf3   :  { %10442 = vpow2.f32 %v6767_v54  ;;  %v6109_v54 = vadd.f32 %v8597_v3, %v11906_v12 }
 0xdfb   :  { %v6743_v37 = vpop.xlane.xlu1 %6742 }
 0xdfc   :  { %v6761_v30 = vsub.f32 %v6729_v58, %v6743_v37 }
 0xdfd   :  { %v10443_v31 = vpop.eup %10442 }
 0xdfe   :  { %v6771_v32 = vmul.f32 1.442695, %v6761_v30  ;;  %v6783_v24 = vsel %vm2069_vm4, %v10443_v31, 0.0 }
 0xdff   :  { %6784 = vadd.xlane.f32.xlu1 %v6783_v24  ;;  %v6110_v24 = vadd.f32 %v8598_v5, %v11924_v44  ;;  %v8559_v44 = vld [vmem:[%s12200_s9 + $0x28] sm:$0xff] }
 0xe00   :  { %10444 = vpow2.f32 %v6771_v32 }
 0xe0a   :  { %v10445_v34 = vpop.eup %10444 }
 0xe0b   :  { %v6789_v38 = vsel %vm2069_vm4, %v10445_v34, 0.0 }
 0xe0c   :  { %6790 = vadd.xlane.f32.xlu1 %v6789_v38 }
 0xe0e   :  { %v6740_v42 = vpop.xlane.xlu0 %6739 }
 0xe0f   :  { %v6760_v40 = vsub.f32 %v6728_v2, %v6740_v42 }
 0xe11   :  { %v6769_v39 = vmul.f32 1.442695, %v6760_v40  ;;  %v8560_v40 = vld [vmem:[%s12200_s9 + $0x30] sm:$0xff] }
 0xe13   :  { %10446 = vpow2.f32 %v6769_v39 }
 0xe16   :  { %v6746_v43 = vpop.xlane.xlu0 %6745 }
 0xe17   :  { %v6762_v46 = vsub.f32 %v6730_v16, %v6746_v43 }
 0xe19   :  { %v6773_v36 = vmul.f32 1.442695, %v6762_v46 }
 0xe1b   :  { %10448 = vpow2.f32 %v6773_v36 }
 0xe1d   :  { %v10447_v49 = vpop.eup %10446 }
 0xe1e   :  { %v6749_v50 = vpop.xlane.xlu1 %6748  ;;  %v6786_v27 = vsel %vm2069_vm4, %v10447_v49, 0.0 }
 0xe1f   :  { %v6763_v28 = vsub.f32 %v6731_v22, %v6749_v50  ;;  %6787 = vadd.xlane.f32.xlu0 %v6786_v27 }
 0xe21   :  { %v6775_v56 = vmul.f32 1.442695, %v6763_v28 }
 0xe23   :  { %10450 = vpow2.f32 %v6775_v56 }
 0xe25   :  { %v10449_v33 = vpop.eup %10448 }
 0xe26   :  { %v6755_v59 = vpop.xlane.xlu1 %6754  ;;  %v6792_v58 = vsel %vm2069_vm4, %v10449_v33, 0.0 }
 0xe27   :  { %v6765_v60 = vsub.f32 %v6733_v26, %v6755_v59  ;;  %6793 = vadd.xlane.f32.xlu0 %v6792_v58 }
 0xe29   :  { %v6779_v63 = vmul.f32 1.442695, %v6765_v60 }
 0xe2b   :  { %10452 = vpow2.f32 %v6779_v63 }
 0xe2d   :  { %v10451_v0 = vpop.eup %10450 }
 0xe2e   :  { %v6795_v1 = vsel %vm2069_vm4, %v10451_v0, 0.0 }
 0xe2f   :  { %6796 = vadd.xlane.f32.xlu1 %v6795_v1 }
 0xe35   :  { %v11955_v2 = vpop.eup %10452 }
 0xe36   :  { %v6801_v6 = vsel %vm2069_vm4, %v11955_v2, 0.0 }
 0xe37   :  { %6802 = vadd.xlane.f32.xlu1 %v6801_v6 }
 0xe3e   :  { %v6752_v8 = vpop.xlane.xlu0 %6751 }
 0xe3f   :  { %v6764_v10 = vsub.f32 %v6732_v14, %v6752_v8 }
 0xe41   :  { %v6777_v13 = vmul.f32 1.442695, %v6764_v10 }
 0xe43   :  { %10454 = vpow2.f32 %v6777_v13 }
 0xe46   :  { %v6758_v16 = vpop.xlane.xlu0 %6757 }
 0xe47   :  { %v6766_v45 = vsub.f32 %v6734_v17, %v6758_v16 }
 0xe49   :  { %v6781_v57 = vmul.f32 1.442695, %v6766_v45 }
 0xe4b   :  { %10456 = vpow2.f32 %v6781_v57 }
 0xe4d   :  { %v10455_v20 = vpop.eup %10454 }
 0xe4e   :  { %v6798_v21 = vsel %vm2069_vm4, %v10455_v20, 0.0 }
 0xe4f   :  { %6799 = vadd.xlane.f32.xlu0 %v6798_v21 }
 0xe55   :  { %v11960_v22 = vpop.eup %10456 }
 0xe56   :  { %v6804_v4 = vsel %vm2069_vm4, %v11960_v22, 0.0 }
 0xe57   :  { %6805 = vadd.xlane.f32.xlu0 %v6804_v4 }
 0xe8c   :  { %v6785_v52 = vpop.xlane.xlu1 %6784 }
 0xe8d   :  { %10458 = vrcp.f32 %v6785_v52 }
 0xe97   :  { %v10459_v15 = vpop.eup %10458 }
 0xe98   :  { %v6815_v26 = vmul.f32 %v10459_v15, %v10443_v31 }
 0xe99   :  { %v6791_v55 = vpop.xlane.xlu1 %6790 }
 0xe9a   :  { %10460 = vrcp.f32 %v6791_v55  ;;  %9847 = vmatmul.mubr.msk.f32.vlgmr.msra.gmra.mrb[84].mxu0 %vm2069_vm4, %v6815_v26 }
 0xe9b   :  { %9855 = vmatpush3.msra.mxu0 %v6097_v53  ;;  %9856 = vmatprep.mubr.msk.f32.mxu0 %vm10509_vm3, %v10510_v62 }
 0xe9c   :  { %9864 = vmatprep.subr.mxu0 %v10510_v62 }
 0xea4   :  { %v10461_v61 = vpop.eup %10460 }
 0xea5   :  { %v6817_v9 = vmul.f32 %v10461_v61, %v10445_v34  ;;  %v8558_v34 = vld [vmem:[%s12200_s9 + $0x20] sm:$0xff] }
 0xea7   :  { %9857 = vmatmul.mubr.msk.f32.vlgmr.msra.gmra.mrb[86].mxu0 %vm2069_vm4, %v6817_v9 }
 0xea8   :  { %9865 = vmatpush3.msra.mxu0 %v11904_v7  ;;  %9866 = vmatprep.mubr.msk.f32.mxu0 %vm10509_vm3, %v10510_v62 }
 0xea9   :  { %9874 = vmatprep.subr.mxu0 %v10510_v62 }
 0xeac   :  { %v6788_v51 = vpop.xlane.xlu0 %6787 }
 0xead   :  { %10462 = vrcp.f32 %v6788_v51 }
 0xeb4   :  { %v6794_v14 = vpop.xlane.xlu0 %6793 }
 0xeb5   :  { %10464 = vrcp.f32 %v6794_v14 }
 0xeb7   :  { %v10463_v19 = vpop.eup %10462 }
 0xeb8   :  { %v6816_v25 = vmul.f32 %v10463_v19, %v10447_v49  ;;  %v8561_v49 = vld [vmem:[%s12200_s9 + $0x38] sm:$0xff] }
 0xeba   :  { %9852 = vmatmul.mubr.msk.f32.vlgmr.msra.gmra.mrb[82].mxu1 %vm2069_vm4, %v6816_v25 }
 0xebb   :  { %9860 = vmatpush3.msra.mxu1 %v6098_v29  ;;  %9861 = vmatprep.mubr.msk.f32.mxu1 %vm10509_vm3, %v10510_v62 }
 0xebc   :  { %v6797_v7 = vpop.xlane.xlu1 %6796  ;;  %9869 = vmatprep.subr.mxu1 %v10510_v62 }
 0xebd   :  { %10466 = vrcp.f32 %v6797_v7 }
 0xebf   :  { %v10465_v17 = vpop.eup %10464 }
 0xec0   :  { %v6818_v11 = vmul.f32 %v10465_v17, %v10449_v33 }
 0xec2   :  { %9862 = vmatmul.mubr.msk.f32.vlgmr.msra.gmra.mrb[84].mxu1 %vm2069_vm4, %v6818_v11 }
 0xec3   :  { %9870 = vmatpush3.msra.mxu1 %v11922_v41  ;;  %9871 = vmatprep.mubr.msk.f32.mxu1 %vm10509_vm3, %v10510_v62 }
 0xec4   :  { %v6803_v23 = vpop.xlane.xlu1 %6802  ;;  %9879 = vmatprep.subr.mxu1 %v10510_v62 }
 0xec5   :  { %10468 = vrcp.f32 %v6803_v23 }
 0xec7   :  { %v10467_v18 = vpop.eup %10466 }
 0xec8   :  { %v6819_v35 = vmul.f32 %v10467_v18, %v10451_v0 }
 0xeca   :  { %9867 = vmatmul.mubr.msk.f32.vlgmr.msra.gmra.mrb[88].mxu0 %vm2069_vm4, %v6819_v35 }
 0xecb   :  { %9875 = vmatpush3.msra.mxu0 %v6109_v54  ;;  %9876 = vmatprep.mubr.msk.f32.mxu0 %vm10509_vm3, %v10510_v62 }
 0xecc   :  { %9884 = vmatprep.subr.mxu0 %v10510_v62 }
 0xecf   :  { %v10469_v41 = vpop.eup %10468 }
 0xed0   :  { %v6821_v37 = vmul.f32 %v10469_v41, %v11955_v2 }
 0xed2   :  { %9877 = vmatmul.mubr.msk.f32.vlgmr.msra.gmra.mrb[90].mxu0 %vm2069_vm4, %v6821_v37 }
 0xed3   :  { %9886 = vmatprep.mubr.msk.f32.mxu0 %vm10509_vm3, %v10510_v62  ;;  %9885 = vmatpush3.msra.mxu0 %v8558_v34 }
 0xed4   :  { %9894 = vmatprep.subr.mxu0 %v10510_v62 }
 0xedc   :  { %v6800_v30 = vpop.xlane.xlu0 %6799 }
 0xedd   :  { %10470 = vrcp.f32 %v6800_v30 }
 0xee4   :  { %v6806_v31 = vpop.xlane.xlu0 %6805 }
 0xee5   :  { %10472 = vrcp.f32 %v6806_v31 }
 0xee7   :  { %v10471_v12 = vpop.eup %10470 }
 0xee8   :  { %v6820_v32 = vmul.f32 %v10471_v12, %v10455_v20 }
 0xeea   :  { %9872 = vmatmul.mubr.msk.f32.vlgmr.msra.gmra.mrb[86].mxu1 %vm2069_vm4, %v6820_v32 }
 0xeeb   :  { %9880 = vmatpush3.msra.mxu1 %v6110_v24  ;;  %9881 = vmatprep.mubr.msk.f32.mxu1 %vm10509_vm3, %v10510_v62 }
 0xeec   :  { %9889 = vmatprep.subr.mxu1 %v10510_v62 }
 0xeef   :  { %v10473_v38 = vpop.eup %10472 }
 0xef0   :  { %v6822_v42 = vmul.f32 %v10473_v38, %v11960_v22 }
 0xef2   :  { %9882 = vmatmul.mubr.msk.f32.vlgmr.msra.gmra.mrb[88].mxu1 %vm2069_vm4, %v6822_v42 }
 0xef3   :  { %9891 = vmatprep.mubr.msk.f32.mxu1 %vm10509_vm3, %v10510_v62  ;;  %9890 = vmatpush3.msra.mxu1 %v8559_v44 }
 0xef4   :  { %9899 = vmatprep.subr.mxu1 %v10510_v62 }
 0xf6d   :  { %v6892_v39 = vpop.f32.mrb[84].mxu0 }
 0xf6e   :  { %v9848_v43 = vpop.f32.mrb[85].mxu0  ;;  %9887 = vmatmul.mubr.msk.f32.vlgmr.msra.gmra.mrb[92].mxu0 %vm2069_vm4, %v6892_v39  ;;  %v8636_v39 = vld [vmem:[%s12202_s11 + $0x20] sm:$0xff] }
 0xf6f   :  { %9895 = vmatpush3.msra.mxu0 %v8560_v40  ;;  %9896 = vmatprep.mubr.msk.f32.mxu0 %vm10509_vm3, %v10510_v62  ;;  %v8637_v43 = vld [vmem:[%s12202_s11 + $0x28] sm:$0xff] }
 0xf70   :  { %9904 = vmatprep.subr.mxu0 %v10510_v62 }
 0xf7a   :  { %v7038_v46 = vpop.f32.mrb[86].mxu0 }
 0xf7b   :  { %v9858_v36 = vpop.f32.mrb[87].mxu0  ;;  %9897 = vmatmul.mubr.msk.f32.vlgmr.msra.gmra.mrb[94].mxu0 %vm2069_vm4, %v7038_v46  ;;  %v10341_v46 = vpack.c.bf16 %v8637_v43, %v8636_v39 }
 0xf7c   :  { %9905 = vmatpush3.msra.mxu0 %v8558_v34  ;;  %9906 = vmatprep.mubr.msk.f32.mxu0 %vm10509_vm3, %v10510_v62  ;;  %v8638_v36 = vld [vmem:[%s12202_s11 + $0x30] sm:$0xff] }
 0xf7d   :  { %9914 = vmatprep.subr.mxu0 %v10510_v62 }
 0xf8d   :  { %v6965_v50 = vpop.f32.mrb[82].mxu1 }
 0xf8e   :  { %v9853_v27 = vpop.f32.mrb[83].mxu1  ;;  %9892 = vmatmul.mubr.msk.f32.vlgmr.msra.gmra.mrb[90].mxu1 %vm2069_vm4, %v6965_v50 }
 0xf8f   :  { %9900 = vmatpush3.msra.mxu1 %v8561_v49  ;;  %9901 = vmatprep.mubr.msk.f32.mxu1 %vm10509_vm3, %v10510_v62  ;;  %v8644_v27 = vld [vmem:[%s12204_s13 + $0x80] sm:$0xff] }
 0xf90   :  { %9909 = vmatprep.subr.mxu1 %v10510_v62 }
 0xf95   :  { %v7111_v28 = vpop.f32.mrb[84].mxu1 }
 0xf96   :  { %v9863_v56 = vpop.f32.mrb[85].mxu1  ;;  %9902 = vmatmul.mubr.msk.f32.vlgmr.msra.gmra.mrb[92].mxu1 %vm2069_vm4, %v7111_v28  ;;  %v8645_v28 = vld [vmem:[%s12204_s13 + $0x88] sm:$0xff] }
 0xf97   :  { %9910 = vmatpush3.msra.mxu1 %v8559_v44  ;;  %9911 = vmatprep.mubr.msk.f32.mxu1 %vm10509_vm3, %v10510_v62  ;;  %v8646_v56 = vld [vmem:[%s12204_s13 + $0x90] sm:$0xff] }
 0xf98   :  { %9919 = vmatprep.subr.mxu1 %v10510_v62 }
 0xf9d   :  { %v7184_v33 = vpop.f32.mrb[88].mxu0 }
 0xf9e   :  { %v9868_v59 = vpop.f32.mrb[89].mxu0  ;;  %9907 = vmatmul.mubr.msk.f32.vlgmr.msra.gmra.mrb[96].mxu0 %vm2069_vm4, %v7184_v33  ;;  %v10349_v33 = vpack.c.bf16 %v8645_v28, %v8644_v27 }
 0xf9f   :  { %9915 = vmatpush3.msra.mxu0 %v8560_v40  ;;  %9916 = vmatprep.mubr.msk.f32.mxu0 %vm10509_vm3, %v10510_v62  ;;  %v8647_v59 = vld [vmem:[%s12204_s13 + $0x98] sm:$0xff] }
 0xfa0   :  { %10342 = vmatprep.subr.bf16.mxu0 %v10341_v46 }
 0xfa5   :  { %v7330_v58 = vpop.f32.mrb[90].mxu0 }
 0xfa6   :  { %v9878_v60 = vpop.f32.mrb[91].mxu0  ;;  %9917 = vmatmul.mubr.msk.f32.vlgmr.msra.gmra.mrb[98].mxu0 %vm2069_vm4, %v7330_v58  ;;  %v10353_v58 = vpack.c.bf16 %v8647_v59, %v8646_v56 }
 0xfa7   :  { %10344 = vmatpush3.bf16.msra.mxu0 %v10341_v46  ;;  %v8648_v60 = vld [vmem:[%s12204_s13 + $0xa0] sm:$0xff] }
 0xfbd   :  { %v7257_v63 = vpop.f32.mrb[86].mxu1 }
 0xfbe   :  { %v9873_v0 = vpop.f32.mrb[87].mxu1  ;;  %9912 = vmatmul.mubr.msk.f32.vlgmr.msra.gmra.mrb[94].mxu1 %vm2069_vm4, %v7257_v63  ;;  %v8649_v63 = vld [vmem:[%s12204_s13 + $0xa8] sm:$0xff] }
 0xfbf   :  { %9920 = vmatpush3.msra.mxu1 %v8561_v49  ;;  %9921 = vmatprep.mubr.msk.f32.mxu1 %vm10509_vm3, %v10510_v62  ;;  %v8631_v62 = vld [vmem:[%s12201_s10 + $0x1] ss:$0 sm:$0xff]  ;;  %v8639_v49 = vld [vmem:[%s12202_s11 + $0x38] sm:$0xff]  ;;  %v10357_v0 = vpack.c.bf16 %v8649_v63, %v8648_v60 }
 0xfc0   :  { %v10345_v50 = vpack.c.bf16 %v8639_v49, %v8638_v36  ;;  %10350 = vmatprep.subr.bf16.mxu1 %v10349_v33  ;;  %v8306_v60 = vld [vmem:[%s12208_s17 + $0x18] sm:$0xff] }
 0xfc2   :  { %10346 = vmatprep.subr.bf16.mxu0 %v10345_v50 }
 0xfc3   :  { %10348 = vmatpush3.bf16.msra.mxu0 %v10345_v50 }
 0xfc5   :  { %v7403_v1 = vpop.f32.mrb[88].mxu1 }
 0xfc6   :  { %v9883_v2 = vpop.f32.mrb[89].mxu1  ;;  %9922 = vmatmul.mubr.msk.f32.vlgmr.msra.gmra.mrb[96].mxu1 %vm2069_vm4, %v7403_v1  ;;  %v8650_v1 = vld [vmem:[%s12204_s13 + $0xb0] sm:$0xff] }
 0xfc7   :  { %10352 = vmatpush3.bf16.msra.mxu1 %v10349_v33  ;;  %v8651_v2 = vld [vmem:[%s12204_s13 + $0xb8] sm:$0xff]  ;;  %v8304_v33 = vld [vmem:[%s12208_s17 + $0x8] sm:$0xff] }
 0xfc8   :  { %10354 = vmatprep.subr.bf16.mxu1 %v10353_v58 }
 0xfcb   :  { %10356 = vmatpush3.bf16.msra.mxu1 %v10353_v58  ;;  %v8305_v58 = vld [vmem:[%s12208_s17 + $0x10] sm:$0xff] }
 0xfcc   :  { %10358 = vmatprep.subr.bf16.mxu1 %v10357_v0  ;;  %v10385_v63 = vpack.c.bf16 %v8306_v60, %v8305_v58 }
 0xfcf   :  { %10360 = vmatpush3.bf16.msra.mxu1 %v10357_v0 }
0x1041   :  { %v7476_v6 = vpop.f32.mrb[92].mxu0 }
0x1042   :  { %v9888_v8 = vpop.f32.mrb[93].mxu0  ;;  %v7991_v45 = vsel %vm178_vm2, %v7476_v6, 0.0  ;;  %v10361_v6 = vpack.c.bf16 %v8651_v2, %v8650_v1 }
0x1043   :  { %v8652_v8 = vld [vmem:[%s12204_s13 + $0xc0] sm:$0xff] }
0x1044   :  { %10362 = vmatprep.subr.bf16.mxu1 %v10361_v6 }
0x1045   :  { %10364 = vmatpush3.bf16.msra.mxu1 %v10361_v6 }
0x104e   :  { %v7622_v10 = vpop.f32.mrb[94].mxu0 }
0x104f   :  { %v9898_v13 = vpop.f32.mrb[95].mxu0  ;;  %v7994_v22 = vsel %vm178_vm2, %v7622_v10, 0.0  ;;  %v8653_v10 = vld [vmem:[%s12204_s13 + $0xc8] sm:$0xff] }
0x1050   :  { %v10365_v13 = vpack.c.bf16 %v8653_v10, %v8652_v8 }
0x1052   :  { %10366 = vmatprep.subr.bf16.mxu1 %v10365_v13 }
0x1053   :  { %10368 = vmatpush3.bf16.msra.mxu1 %v10365_v13 }
0x1061   :  { %v7549_v16 = vpop.f32.mrb[90].mxu1 }
0x1062   :  { %v7992_v57 = vsel %vm178_vm2, %v7549_v16, 0.0  ;;  %v9893_v20 = vpop.f32.mrb[91].mxu1  ;;  %v8654_v16 = vld [vmem:[%s12204_s13 + $0xd0] sm:$0xff] }
0x1063   :  { %v7993_v21 = vadd.f32 %v7992_v57, %v7991_v45  ;;  %v8655_v45 = vld [vmem:[%s12204_s13 + $0xd8] sm:$0xff]  ;;  %v8656_v20 = vld [vmem:[%s12204_s13 + $0xe0] sm:$0xff] }
0x1064   :  { %v10369_v57 = vpack.c.bf16 %v8655_v45, %v8654_v16  ;;  %v8662_v16 = vld [vmem:[%s12206_s15] ss:$0 sm:$0xff]  ;;  %s10511_s15 = smov [#allocation2]  }
0x1065   :  { %v7995_v4 = vadd.f32 %v7994_v22, %v7993_v21  ;;  %v8657_v21 = vld [vmem:[%s12204_s13 + $0xe8] sm:$0xff]  ;;  %s8402_s27 = sshll.u32 %s10511_s15, 4  ;;  %s8403_s27 = int_to_ptr.vmem [resolvable:$true] %s8402_s27 }
0x1066   :  { %10370 = vmatprep.subr.bf16.mxu1 %v10369_v57  ;;  %v10373_v22 = vpack.c.bf16 %v8657_v21, %v8656_v20  ;;  %v8663_v21 = vld [vmem:[%s12207_s16] ss:$0 sm:$0xff]  ;;  %s10482_s16 = scalar_lea.vmem %s8403_s27, 256  ;;  %p10487_p1 = scmp.lt.s32.totalorder %s8403_s27, %s8403_s27 }
0x1067   :  { %10372 = vmatpush3.bf16.msra.mxu1 %v10369_v57  ;;  %p10483_p0 = scmp.ne.s32.totalorder %s8403_s27, %s10482_s16  ;;  %p10488_p2 = scmp.lt.s32.totalorder %s10482_s16, %s10482_s16 }
0x1068   :  { %10374 = vmatprep.subr.bf16.mxu1 %v10373_v22 }
0x1069   :  { %v7695_v52 = vpop.f32.mrb[92].mxu1  ;;  %p10489_p3 = por %p10488_p2, %p10487_p1 }
0x106a   :  { %v7996_v3 = vsel %vm178_vm2, %v7695_v52, 0.0  ;;  %v9903_v15 = vpop.f32.mrb[93].mxu1 }
0x106b   :  { %v7997_v26 = vadd.f32 %v7996_v3, %v7995_v4  ;;  %10376 = vmatpush3.bf16.msra.mxu1 %v10373_v22  ;;  %v8634_v15 = vld [vmem:[%s12196_s5 + $0x1] ss:$0 sm:$0xff]  ;;  %p10490_p4 = pnand %p10489_p3, %p10483_p0 }
0x106d   :  { %v8011_v53 = vadd.f32 %v8631_v62, %v7997_v26 }
0x106f   :  { %v12054_v55 = vadd.f32 %v8011_v53, %v11429_v48  ;;  %v8635_v53 = vld [vmem:[%s12197_s6 + $0x1] ss:$0 sm:$0xff] }
0x1071   :  { %v7768_v61 = vpop.f32.mrb[96].mxu0  ;;  %v8019_v9 = vsel %vm178_vm2, %v12054_v55, 0.0 }
0x1072   :  { %8020 = vadd.xlane.f32.xlu1 %v8019_v9  ;;  %v9908_v51 = vpop.f32.mrb[97].mxu0  ;;  %v7998_v25 = vsel %vm178_vm2, %v7768_v61, 0.0 }
0x1079   :  { %v7914_v14 = vpop.f32.mrb[98].mxu0 }
0x107a   :  { %v9918_v5 = vpop.f32.mrb[99].mxu0  ;;  %v8001_v11 = vsel %vm178_vm2, %v7914_v14, 0.0 }
0x1091   :  { %v7841_v19 = vpop.f32.mrb[94].mxu1 }
0x1092   :  { %v7999_v29 = vsel %vm178_vm2, %v7841_v19, 0.0  ;;  %v9913_v7 = vpop.f32.mrb[95].mxu1 }
0x1093   :  { %v8000_v17 = vadd.f32 %v7999_v29, %v7998_v25 }
0x1095   :  { %v8002_v23 = vadd.f32 %v8001_v11, %v8000_v17  ;;  %v8658_v17 = vld [vmem:[%s12204_s13 + $0xf0] sm:$0xff]  ;;  %v8659_v11 = vld [vmem:[%s12204_s13 + $0xf8] sm:$0xff] }
0x1099   :  { %v7987_v48 = vpop.f32.mrb[96].mxu1 }
0x109a   :  { %v8003_v18 = vsel %vm178_vm2, %v7987_v48, 0.0  ;;  %v9923_v35 = vpop.f32.mrb[97].mxu1  ;;  %v8641_v48 = vld [vmem:[%s12203_s12 + $0x1] ss:$0 sm:$0xff] }
0x109b   :  { %v8004_v54 = vadd.f32 %v8003_v18, %v8002_v23  ;;  %v10377_v23 = vpack.c.bf16 %v8659_v11, %v8658_v17 }
0x109d   :  { %v8012_v41 = vadd.f32 %v8631_v62, %v8004_v54  ;;  %10378 = vmatprep.subr.bf16.mxu1 %v10377_v23 }
0x109e   :  { %10380 = vmatpush3.bf16.msra.mxu1 %v10377_v23 }
0x109f   :  { %v12063_v37 = vadd.f32 %v8012_v41, %v11426_v47 }
0x10a1   :  { %v8022_v30 = vsel %vm178_vm2, %v12063_v37, 0.0 }
0x10a2   :  { %8023 = vadd.xlane.f32.xlu0 %v8022_v30 }
0x10ff   :  { %v8021_v31 = vpop.xlane.xlu1 %8020 }
0x1100   :  { %v8025_v12 = vmul.f32 0.03125, %v8021_v31 }
0x1102   :  { %v8027_v32 = vsub.f32 %v12054_v55, %v8025_v12  ;;  %v8661_v12 = vld [vmem:[%s12226_s3 + $0x1] ss:$0 sm:$0xff] }
0x1104   :  { %v8029_v24 = vmul.f32 %v8027_v32, %v8027_v32 }
0x1106   :  { %v8031_v34 = vsel %vm178_vm2, %v8029_v24, 0.0 }
0x1107   :  { %8032 = vadd.xlane.f32.xlu1 %v8031_v34 }
0x112f   :  { %v8024_v38 = vpop.xlane.xlu0 %8023 }
0x1130   :  { %v8026_v42 = vmul.f32 0.03125, %v8024_v38 }
0x1132   :  { %v12070_v44 = vsub.f32 %v12063_v37, %v8026_v42 }
0x1134   :  { %v8030_v47 = vmul.f32 %v12070_v44, %v12070_v44 }
0x1136   :  { %v8034_v40 = vsel %vm178_vm2, %v8030_v47, 0.0 }
0x1137   :  { %8035 = vadd.xlane.f32.xlu0 %v8034_v40 }
0x1194   :  { %v8033_v4 = vpop.xlane.xlu1 %8032 }
0x1195   :  { %v8037_v52 = vmul.f32 0.03125, %v8033_v4 }
0x1197   :  { %v8039_v62 = vadd.f32 1e-05, %v8037_v52 }
0x1199   :  { %10474 = vrsqrt.f32 %v8039_v62 }
0x11a3   :  { %v10475_v3 = vpop.eup %10474 }
0x11a4   :  { %v8043_v26 = vmul.f32 %v10475_v3, %v8027_v32  ;;  %v8664_v3 = vld [vmem:[%s12209_s18] ss:$0 sm:$0xff] }
0x11a6   :  { %v8051_v61 = vmul.f32 %v8634_v15, %v8043_v26 }
0x11a8   :  { %v8059_v9 = vadd.f32 %v8635_v53, %v8051_v61 }
0x11aa   :  { %9932 = vmatprep.mubr.msk.f32.mxu0 %vm178_vm2, %v8059_v9 }
0x11c4   :  { %v8036_v51 = vpop.xlane.xlu0 %8035 }
0x11c5   :  { %v8038_v14 = vmul.f32 0.03125, %v8036_v51 }
0x11c7   :  { %v8040_v5 = vadd.f32 1e-05, %v8038_v14 }
0x11c9   :  { %10476 = vrsqrt.f32 %v8040_v5 }
0x11d3   :  { %v10477_v19 = vpop.eup %10476 }
0x11d4   :  { %v8044_v25 = vmul.f32 %v10477_v19, %v12070_v44 }
0x11d6   :  { %v8052_v29 = vmul.f32 %v8634_v15, %v8044_v25 }
0x11d8   :  { %v8060_v7 = vadd.f32 %v8635_v53, %v8052_v29 }
0x11da   :  { %9933 = vmatmul.mubr.msk.f32.vlgmr.msra.gmra.mrb[100].mxu0 %vm178_vm2, %v8060_v7 }
0x12ad   :  { %v9934_v18 = vpop.f32.mrb[100].mxu0 }
0x12ae   :  { %v8152_v35 = vadd.f32 %v9934_v18, %v8641_v48  ;;  %v8146_v54 = vpop.f32.mrb[101].mxu0 }
0x12af   :  { %v8147_v41 = vadd.f32 %v8641_v48, %v8146_v54 }
0x12b0   :  { %v8156_v31 = vmax.f32 %v8152_v35, 0.0 }
0x12b1   :  { %v8155_v30 = vmax.f32 %v8147_v41, 0.0 }
0x12b3   :  { %9967 = vmatprep.mubr.f32.mxu1 %v8155_v30 }
0x12b4   :  { %9968 = vmatmul.mubr.f32.vlgmr.msra.gmra.mrb[98].mxu1 %v8156_v31 }
0x1387   :  { %v9969_v32 = vpop.f32.mrb[98].mxu1 }
0x1388   :  { %v8254_v24 = vadd.f32 %v9969_v32, %v8661_v12  ;;  %v8248_v34 = vpop.f32.mrb[99].mxu1 }
0x1389   :  { %v8249_v38 = vadd.f32 %v8661_v12, %v8248_v34 }
0x138a   :  { %v8258_v42 = vadd.f32 %v8254_v24, %v12063_v37 }
0x138b   :  { %v8257_v44 = vadd.f32 %v8249_v38, %v12054_v55  ;;  %v8303_v55 = vld [vmem:[%s12208_s17] sm:$0xff] }
0x138c   :  { %v8264_v47 = vsel %vm178_vm2, %v8258_v42, 0.0  ;;  %v10381_v59 = vpack.c.bf16 %v8304_v33, %v8303_v55 }
0x138d   :  { %8265 = vadd.xlane.f32.xlu0 %v8264_v47  ;;  %v8261_v40 = vsel %vm178_vm2, %v8257_v44, 0.0 }
0x138e   :  { %8262 = vadd.xlane.f32.xlu1 %v8261_v40  ;;  %10382 = vmatprep.subr.bf16.mxu0 %v10381_v59 }
0x138f   :  { %10384 = vmatpush3.bf16.msra.mxu0 %v10381_v59 }
0x1390   :  { %10386 = vmatprep.subr.bf16.mxu0 %v10385_v63 }
0x1393   :  { %10388 = vmatpush3.bf16.msra.mxu0 %v10385_v63 }
0x141a   :  { %v8266_v39 = vpop.xlane.xlu0 %8265 }
0x141b   :  { %v8268_v43 = vmul.f32 0.03125, %v8266_v39  ;;  %v8263_v46 = vpop.xlane.xlu1 %8262 }
0x141c   :  { %v8267_v36 = vmul.f32 0.03125, %v8263_v46 }
0x141d   :  { %v8270_v49 = vsub.f32 %v8258_v42, %v8268_v43 }
0x141e   :  { %v8269_v50 = vsub.f32 %v8257_v44, %v8267_v36 }
0x141f   :  { %v8272_v27 = vmul.f32 %v8270_v49, %v8270_v49 }
0x1420   :  { %v8271_v28 = vmul.f32 %v8269_v50, %v8269_v50 }
0x1421   :  { %v8276_v56 = vsel %vm178_vm2, %v8272_v27, 0.0 }
0x1422   :  { %8277 = vadd.xlane.f32.xlu0 %v8276_v56  ;;  %v8273_v37 = vsel %vm178_vm2, %v8271_v28, 0.0 }
0x1423   :  { %8274 = vadd.xlane.f32.xlu1 %v8273_v37 }
0x14af   :  { %v8278_v0 = vpop.xlane.xlu0 %8277 }
0x14b0   :  { %v8280_v1 = vmul.f32 0.03125, %v8278_v0  ;;  %v8275_v2 = vpop.xlane.xlu1 %8274 }
0x14b1   :  { %v8279_v6 = vmul.f32 0.03125, %v8275_v2 }
0x14b2   :  { %v8282_v8 = vadd.f32 1e-05, %v8280_v1 }
0x14b3   :  { %v8281_v10 = vadd.f32 1e-05, %v8279_v6 }
0x14b4   :  { %10478 = vrsqrt.f32 %v8282_v8 }
0x14b5   :  { %10480 = vrsqrt.f32 %v8281_v10 }
0x14be   :  { %v10479_v13 = vpop.eup %10478 }
0x14bf   :  { %v10481_v45 = vpop.eup %10480  ;;  %v8286_v57 = vmul.f32 %v10479_v13, %v8270_v49 }
0x14c0   :  { %v8285_v20 = vmul.f32 %v10481_v45, %v8269_v50 }
0x14c1   :  { %v8294_v22 = vmul.f32 %v8662_v16, %v8286_v57 }
0x14c2   :  { %v8293_v4 = vmul.f32 %v8662_v16, %v8285_v20 }
0x14c3   :  { %v8302_v62 = vadd.f32 %v8663_v21, %v8294_v22 }
0x14c4   :  { %v8301_v52 = vadd.f32 %v8663_v21, %v8293_v4 }
0x14c6   :  { %9978 = vmatprep.mubr.msk.f32.mxu0 %vm178_vm2, %v8301_v52 }
0x14c7   :  { %9979 = vmatmul.mubr.msk.f32.vlgmr.msra.gmra.mrb[102].mxu0 %vm178_vm2, %v8302_v62 }
0x159a   :  { %v9980_v15 = vpop.f32.mrb[102].mxu0 }
0x159b   :  { %v8392_v26 = vadd.f32 %v9980_v15, %v8664_v3  ;;  %v8386_v53 = vpop.f32.mrb[103].mxu0 }
0x159c   :  { %v8387_v61 = vadd.f32 %v8664_v3, %v8386_v53 }
0x159d   :  { %8396 = vst [vmem:[#allocation2 + $0x8] sm:$0xff] %v8392_v26 }
0x159e   :  { %8395 = vst [vmem:[#allocation2] sm:$0xff] %v8387_v61 }
0x159f   :  { %10493 = shalt.err (!%p10490_p4)
}
0x15a0   :  { %s10494_s18 = scalar_lea.hbm %s12210_s19, 256 }
0x15a1   :  { %p10495_p5 = scmp.ne.s32.totalorder %s12210_s19, %s10494_s18  ;;  %p10498_p6 = scmp.lt.u32.totalorder %s10494_s18, %s12210_s19 }
0x15a3   :  { %p10500_p7 = pnand %p10498_p6, %p10495_p5 }
0x15a5   :  { %10503 = shalt.err (!%p10500_p7)
}
0x15a6   :  { %s10512_s6 = smov 128   ;;  %s10513_s0 = smov 8  }
0x15a7   :  { %8408 = dma.vmem_to_hbm [thread:$0]  %s8403_s27, 256, %s12210_s19, [#allocation3], %s10512_s6, %s10512_s6, %s10513_s0  }
0x15a8   :  { %10504 = dma.done.wait [#allocation3], 256  }
0x15a9   :  { %10505 = vsyncadd [#allocation3], 4294967040 }
0x15aa   :  { %8412 = vsyncpa [#allocation3], 1 }

</bundles_post_ra>
